<compile_context>
chip_gen: v6e
topology: v6e:2x2x1
jax: 0.10.0
libtpu: 0.0.40
codegen_flags: <defaults>
</compile_context>

<pallas_src>
import functools
import math

import jax
import jax.numpy as jnp
from jax.experimental import pallas as pl
from jax.experimental.pallas import tpu as pltpu

_LANE = 128


def _encoder_kernel(vid_ref, txt_ref, mask_ref,
                    wq_ref, wk_ref, wv_ref, bq_ref, bk_ref, bv_ref,
                    wo_ref, bo_ref, ln1w_ref, ln1b_ref,
                    w1_ref, b1_ref, w2_ref, b2_ref, ln2w_ref, ln2b_ref,
                    out_ref, x_sc, ctx_sc, *, n_heads, eps, resident_weights):
    layer = pl.program_id(1)
    n_layers = pl.num_programs(1)

    TB, Lv, D = vid_ref.shape
    Lt = txt_ref.shape[1]
    hd = D // n_heads
    f32, bf16 = jnp.float32, jnp.bfloat16

    def W(ref):
        # Resident mode keeps the whole (n_layers, ...) stack in VMEM and indexes
        # the current layer; streamed mode already sees a per-layer block.
        return ref[layer] if resident_weights else ref[...]

    # Load the video features into the resident activation scratch on layer 0.
    @pl.when(layer == 0)
    def _():
        x_sc[...] = vid_ref[...].reshape(TB * Lv, D).astype(f32)

    x = x_sc[...]                                 # (TB*Lv, D) f32, resident
    x_bf = x.astype(bf16)
    t_bf = txt_ref[...].reshape(TB * Lt, D)       # already bf16 (wrapper pre-cast)

    # In-projections over the whole batch tile: M = TB*L, K = N = D (full MXU depth).
    # 1/sqrt(hd) is folded into wq/bq in the wrapper.
    q = jnp.dot(x_bf, W(wq_ref), preferred_element_type=f32) + W(bq_ref)
    k = jnp.dot(t_bf, W(wk_ref), preferred_element_type=f32) + W(bk_ref)
    v = jnp.dot(t_bf, W(wv_ref), preferred_element_type=f32) + W(bv_ref)

    q_bf, k_bf, v_bf = q.astype(bf16), k.astype(bf16), v.astype(bf16)

    nt_dims = (((1,), (1,)), ((), ()))            # Q @ K^T without materializing K.T

    for b in range(TB):
        # Key-padding-mask broadcast hoisted out of the head loop.
        mask_b = jnp.broadcast_to(mask_ref[b], (Lv, Lt)).astype(f32)
        qb = q_bf[b * Lv:(b + 1) * Lv]
        kb = k_bf[b * Lt:(b + 1) * Lt]
        vb = v_bf[b * Lt:(b + 1) * Lt]
        for h in range(n_heads):
            qh = qb[:, h * hd:(h + 1) * hd]
            kh = kb[:, h * hd:(h + 1) * hd]
            vh = vb[:, h * hd:(h + 1) * hd]
            s = jax.lax.dot_general(qh, kh, nt_dims,
                                    preferred_element_type=f32) + mask_b
            s = s - jnp.max(s, axis=-1, keepdims=True)
            e = jnp.exp(s)
            p = e * pl.reciprocal(jnp.sum(e, axis=-1, keepdims=True), approx=True)
            ctx = jnp.dot(p.astype(bf16), vh, preferred_element_type=f32)
            # Per-head context goes straight into its lane slice of a lane-dense
            # (TB*Lv, D) scratch: no per-head W_o fold, no concat over heads/batch.
            ctx_sc[b * Lv:(b + 1) * Lv, h * hd:(h + 1) * hd] = ctx.astype(bf16)

    # Single lane-dense output projection with full contraction depth K = D.
    attn = jnp.dot(ctx_sc[...], W(wo_ref), preferred_element_type=f32) + W(bo_ref)

    def layer_norm(y, w, b):
        mu = jnp.mean(y, axis=-1, keepdims=True)
        var = jnp.mean((y - mu) ** 2, axis=-1, keepdims=True)
        return (y - mu) * jax.lax.rsqrt(var + eps) * w + b

    # dropout_1/2/3 are identity at inference.
    x1 = layer_norm(x + attn, W(ln1w_ref), W(ln1b_ref))

    # FFN: linear -> relu -> linear (bf16 MXU operands, f32 accumulation).
    h1 = jnp.dot(x1.astype(bf16), W(w1_ref), preferred_element_type=f32) + W(b1_ref)
    h1 = jnp.maximum(h1, 0.0)
    ff = jnp.dot(h1.astype(bf16), W(w2_ref), preferred_element_type=f32) + W(b2_ref)
    x2 = layer_norm(x1 + ff, W(ln2w_ref), W(ln2b_ref))

    # Keep the activations resident for the next layer of this batch tile.
    x_sc[...] = x2

    @pl.when(layer == n_layers - 1)
    def _():
        out_ref[...] = x2.reshape(TB, Lv, D).astype(out_ref.dtype)


def _vmem_policy():
    """Per-generation VMEM cap + target rows (TB*Lv) per grid step."""
    cap = 128 * 2 ** 20
    try:
        cap = int(getattr(pltpu.get_tpu_info(), "vmem_capacity_bytes", cap))
    except Exception:
        pass
    kind = ""
    try:
        kind = jax.devices()[0].device_kind.lower()
    except Exception:
        pass
    is_v7 = ("v7" in kind) or cap <= 64 * 2 ** 20
    is_v5 = "v5" in kind
    vmem_limit = int(cap * 0.72)      # headroom for compiler-internal scratch / buffers
    if is_v5:
        target_rows = 384             # 128-wide MXU, single vst slot: keep spills low
    elif is_v7:
        target_rows = 512             # 64 MiB VMEM: smaller tiles
    else:
        target_rows = 1024            # v6e: fill the 256-wide MXU, amortize weight DMA
    return vmem_limit, target_rows, is_v7


def _tile_bytes(tb, Lv, Lt, D, Dff, weight_vmem_bytes):
    """Rough per-grid-step VMEM footprint (pipeline blocks + scratch + live temps)."""
    rows_v, rows_t = tb * Lv, tb * Lt
    blocks = 2 * (2 * rows_v * D          # video bf16, double-buffered
                  + 2 * rows_t * D        # text bf16
                  + 4 * tb * Lt           # mask f32
                  + 4 * rows_v * D)       # output f32
    scratch = 4 * rows_v * D + 2 * rows_v * D        # x_sc (f32) + ctx_sc (bf16)
    inter = 4 * (3 * rows_v * D           # q + x1/attn + x2 (f32)
                 + 2 * rows_t * D         # k, v (f32)
                 + rows_v * Dff           # h1 (f32)
                 + 2 * rows_v * D)        # ff + slack (f32)
    return weight_vmem_bytes + blocks + scratch + inter + (2 << 20)


def cross_attention_encoder(video, text, mask, params, n_heads, eps=1e-5,
                            block_batch=None):
    """Full CrossAttentionEncoder forward (inference) as a single fused Pallas call."""
    B, Lv, D = video.shape
    _, Lt, _ = text.shape
    n_layers = len(params)
    Dff = params[0]["w1"].shape[1]
    assert D % n_heads == 0, "d_model must be divisible by n_heads"
    out_dtype = video.dtype

    f32, bf16 = jnp.float32, jnp.bfloat16
    scale = 1.0 / math.sqrt(D // n_heads)

    # Pad the text length to a multiple of 128 so scores / P.V are lane-dense;
    # padded key columns get -1e9 in the additive mask => exp() == 0, same result.
    Lt_pad = ((Lt + _LANE - 1) // _LANE) * _LANE
    if Lt_pad != Lt:
        text = jnp.pad(text, ((0, 0), (0, Lt_pad - Lt), (0, 0)))
        mask = jnp.pad(mask.astype(f32), ((0, 0), (0, Lt_pad - Lt)),
                       constant_values=-1e9)
        Lt = Lt_pad

    # Pre-cast activations to bf16 (half the HBM->VMEM bytes); mask stays f32.
    video_bf = video.astype(bf16)
    text_bf = text.astype(bf16)
    mask3 = mask[:, None, :].astype(f32)          # (B, 1, Lt) additive mask

    def stack(name, dtype, mul=None):
        arrs = [p[name] if mul is None else p[name] * mul for p in params]
        return jnp.stack(arrs).astype(dtype)

    # bf16 matmul weights (halves weight DMA); f32 biases / LN params.
    # 1/sqrt(hd) is folded into the query projection.
    wq, bq = stack("wq", bf16, scale), stack("bq", f32, scale)
    wk, bk = stack("wk", bf16), stack("bk", f32)
    wv, bv = stack("wv", bf16), stack("bv", f32)
    wo, bo = stack("wo", bf16), stack("bo", f32)
    w1, b1 = stack("w1", bf16), stack("b1", f32)
    w2, b2 = stack("w2", bf16), stack("b2", f32)
    ln1w, ln1b = stack("ln1w", f32), stack("ln1b", f32)
    ln2w, ln2b = stack("ln2w", f32), stack("ln2b", f32)

    vmem_limit, target_rows, is_v7 = _vmem_policy()

    per_layer_wbytes = 2 * (4 * D * D + 2 * D * Dff)      # bf16 matmul weights
    per_layer_sbytes = 4 * (9 * D + Dff)                  # f32 biases + LN params
    stacked_bytes = n_layers * (per_layer_wbytes + per_layer_sbytes)
    # Keep the whole stacked weight set VMEM-resident when it fits comfortably.
    resident = 2 * stacked_bytes <= int(0.4 * vmem_limit)
    weight_vmem = 2 * (stacked_bytes if resident
                       else per_layer_wbytes + per_layer_sbytes)

    if block_batch is None:
        divs = [d for d in range(B, 0, -1) if B % d == 0]
        if is_v7 and B >= 2:
            # Keep >= 2 batch tiles so both v7x TensorCores get work.
            divs = [d for d in divs if d <= B // 2] or [1]
        TB = None
        for d in divs:                 # largest tile within row target + VMEM budget
            if d * Lv <= target_rows and _tile_bytes(d, Lv, Lt, D, Dff,
                                                     weight_vmem) <= vmem_limit:
                TB = d
                break
        if TB is None:                 # otherwise smallest tile that fits
            TB = 1
            for d in sorted(divs):
                if _tile_bytes(d, Lv, Lt, D, Dff, weight_vmem) <= vmem_limit:
                    TB = d
                    break
    else:
        TB = block_batch
    assert B % TB == 0

    if resident:
        def wspec(shape):
            blk = (n_layers,) + shape
            return pl.BlockSpec(blk, lambda b, l, _n=len(blk): (0,) * _n)
    else:
        def wspec(shape):
            return pl.BlockSpec((None,) + shape,
                                lambda b, l, _k=len(shape): (l,) + (0,) * _k)

    grid = (B // TB, n_layers)
    kernel = functools.partial(_encoder_kernel, n_heads=n_heads, eps=eps,
                               resident_weights=resident)

    return pl.pallas_call(
        kernel,
        out_shape=jax.ShapeDtypeStruct((B, Lv, D), out_dtype),
        grid=grid,
        in_specs=[
            pl.BlockSpec((TB, Lv, D), lambda b, l: (b, 0, 0)),   # video (bf16)
            pl.BlockSpec((TB, Lt, D), lambda b, l: (b, 0, 0)),   # text (bf16)
            pl.BlockSpec((TB, 1, Lt), lambda b, l: (b, 0, 0)),   # additive mask (f32)
            wspec((D, D)), wspec((D, D)), wspec((D, D)),          # wq, wk, wv
            wspec((1, D)), wspec((1, D)), wspec((1, D)),          # bq, bk, bv
            wspec((D, D)), wspec((1, D)),                         # wo, bo
            wspec((1, D)), wspec((1, D)),                         # ln1 w, b
            wspec((D, Dff)), wspec((1, Dff)),                     # w1, b1
            wspec((Dff, D)), wspec((1, D)),                       # w2, b2
            wspec((1, D)), wspec((1, D)),                         # ln2 w, b
        ],
        out_specs=pl.BlockSpec((TB, Lv, D), lambda b, l: (b, 0, 0)),
        scratch_shapes=[pltpu.VMEM((TB * Lv, D), jnp.float32),    # resident activations
                        pltpu.VMEM((TB * Lv, D), jnp.bfloat16)],  # lane-dense attn ctx
        compiler_params=pltpu.CompilerParams(
            dimension_semantics=("parallel", "arbitrary"),
            vmem_limit_bytes=int(vmem_limit)),
    )(video_bf, text_bf, mask3,
      wq, wk, wv, bq, bk, bv, wo, bo, ln1w, ln1b, w1, b1, w2, b2, ln2w, ln2b)


def init_params(key, n_layers, d_model, dim_feedforward):
    params = []
    for _ in range(n_layers):
        key, *ks = jax.random.split(key, 11)

        def rnd(k, shape, scale=0.05):
            return scale * jax.random.normal(k, shape, jnp.float32)

        params.append(dict(
            wq=rnd(ks[0], (d_model, d_model)),
            wk=rnd(ks[1], (d_model, d_model)),
            wv=rnd(ks[2], (d_model, d_model)),
            bq=rnd(ks[3], (1, d_model)),
            bk=rnd(ks[4], (1, d_model)),
            bv=rnd(ks[5], (1, d_model)),
            wo=rnd(ks[6], (d_model, d_model)),
            bo=rnd(ks[7], (1, d_model)),
            ln1w=jnp.ones((1, d_model), jnp.float32),
            ln1b=jnp.zeros((1, d_model), jnp.float32),
            w1=rnd(ks[8], (d_model, dim_feedforward)),
            b1=jnp.zeros((1, dim_feedforward), jnp.float32),
            w2=rnd(ks[9], (dim_feedforward, d_model)),
            b2=jnp.zeros((1, d_model), jnp.float32),
            ln2w=jnp.ones((1, d_model), jnp.float32),
            ln2b=jnp.zeros((1, d_model), jnp.float32),
        ))
    return params


def reference(video, text, mask, params, n_heads, eps=1e-5):
    """Pure-JAX f32 reference matching the PyTorch forward (dropout = identity)."""
    def ln(y, w, b):
        mu = y.mean(-1, keepdims=True)
        var = ((y - mu) ** 2).mean(-1, keepdims=True)
        return (y - mu) / jnp.sqrt(var + eps) * w + b

    x = video
    B, Lv, D = x.shape
    Lt = text.shape[1]
    hd = D // n_heads
    for p in params:
        q = x @ p["wq"] + p["bq"]
        k = text @ p["wk"] + p["bk"]
        v = text @ p["wv"] + p["bv"]
        qh = q.reshape(B, Lv, n_heads, hd).transpose(0, 2, 1, 3)
        kh = k.reshape(B, Lt, n_heads, hd).transpose(0, 2, 1, 3)
        vh = v.reshape(B, Lt, n_heads, hd).transpose(0, 2, 1, 3)
        s = jnp.einsum("bhqd,bhkd->bhqk", qh, kh) / math.sqrt(hd)
        s = s + mask[:, None, None, :]
        pw = jax.nn.softmax(s, axis=-1)
        a = jnp.einsum("bhqk,bhkd->bhqd", pw, vh).transpose(0, 2, 1, 3).reshape(B, Lv, D)
        a = a @ p["wo"] + p["bo"]
        x = ln(x + a, p["ln1w"], p["ln1b"])
        h1 = jax.nn.relu(x @ p["w1"] + p["b1"])
        ff = h1 @ p["w2"] + p["b2"]
        x = ln(x + ff, p["ln2w"], p["ln2b"])
    return x


if __name__ == "__main__":
    # Small but lane-dense shapes (D multiple of 128; Lt is padded internally).
    B, Lv, Lt = 2, 16, 8
    d_model, n_heads, dim_feedforward, n_layers = 128, 4, 256, 2

    key = jax.random.PRNGKey(0)
    k1, k2, kp = jax.random.split(key, 3)
    video = jax.random.normal(k1, (B, Lv, d_model), jnp.float32)
    text = jax.random.normal(k2, (B, Lt, d_model), jnp.float32)
    # float key_padding_mask: 0.0 = attend, -1e9 = masked (pad last 2 text tokens of batch 1)
    text_mask = jnp.zeros((B, Lt), jnp.float32).at[1, -2:].set(-1e9)

    params = init_params(kp, n_layers, d_model, dim_feedforward)

    out = cross_attention_encoder(video, text, text_mask, params, n_heads)
    jax.block_until_ready(out)

    ref = reference(video, text, text_mask, params, n_heads)
    assert out.shape == (B, Lv, d_model)
    # bf16 MXU operands + approx softmax reciprocal => loose-but-structure-sensitive
    # tolerance against the f32 reference.
    assert jnp.allclose(out, ref, atol=5e-2, rtol=5e-2), "mismatch vs. pure-JAX reference"

    print("KERNEL_OK")
</pallas_src>

<mosaic_0001>
module attributes {stable_mosaic.version = 11 : i64} {
  func.func @_encoder_kernel(%arg0: i32, %arg1: i32, %arg2: memref<2x16x128xbf16, #tpu.memory_space<vmem>>, %arg3: memref<2x128x128xbf16, #tpu.memory_space<vmem>>, %arg4: memref<2x1x128xf32, #tpu.memory_space<vmem>>, %arg5: memref<2x128x128xbf16, #tpu.memory_space<vmem>>, %arg6: memref<2x128x128xbf16, #tpu.memory_space<vmem>>, %arg7: memref<2x128x128xbf16, #tpu.memory_space<vmem>>, %arg8: memref<2x1x128xf32, #tpu.memory_space<vmem>>, %arg9: memref<2x1x128xf32, #tpu.memory_space<vmem>>, %arg10: memref<2x1x128xf32, #tpu.memory_space<vmem>>, %arg11: memref<2x128x128xbf16, #tpu.memory_space<vmem>>, %arg12: memref<2x1x128xf32, #tpu.memory_space<vmem>>, %arg13: memref<2x1x128xf32, #tpu.memory_space<vmem>>, %arg14: memref<2x1x128xf32, #tpu.memory_space<vmem>>, %arg15: memref<2x128x256xbf16, #tpu.memory_space<vmem>>, %arg16: memref<2x1x256xf32, #tpu.memory_space<vmem>>, %arg17: memref<2x256x128xbf16, #tpu.memory_space<vmem>>, %arg18: memref<2x1x128xf32, #tpu.memory_space<vmem>>, %arg19: memref<2x1x128xf32, #tpu.memory_space<vmem>>, %arg20: memref<2x1x128xf32, #tpu.memory_space<vmem>>, %arg21: memref<2x16x128xf32, #tpu.memory_space<vmem>>, %arg22: memref<32x128xf32, #tpu.memory_space<vmem>>, %arg23: memref<32x128xbf16, #tpu.memory_space<vmem>>) attributes {dimension_semantics = [#tpu.dimension_semantics<parallel>, #tpu.dimension_semantics<arbitrary>], iteration_bounds = array<i64: 1, 2>, scalar_prefetch = 0 : i64, scratch_operands = 2 : i64, tpu.core_type = #tpu.core_type<tc>, window_params = [{transform_indices = @transform_0, window_bounds = array<i64: 2, 16, 128>}, {transform_indices = @transform_1, window_bounds = array<i64: 2, 128, 128>}, {transform_indices = @transform_2, window_bounds = array<i64: 2, 1, 128>}, {pipeline_mode = #tpu.pipeline_mode<synchronous>, transform_indices = @transform_3, window_bounds = array<i64: 2, 128, 128>}, {pipeline_mode = #tpu.pipeline_mode<synchronous>, transform_indices = @transform_4, window_bounds = array<i64: 2, 128, 128>}, {pipeline_mode = #tpu.pipeline_mode<synchronous>, transform_indices = @transform_5, window_bounds = array<i64: 2, 128, 128>}, {pipeline_mode = #tpu.pipeline_mode<synchronous>, transform_indices = @transform_6, window_bounds = array<i64: 2, 1, 128>}, {pipeline_mode = #tpu.pipeline_mode<synchronous>, transform_indices = @transform_7, window_bounds = array<i64: 2, 1, 128>}, {pipeline_mode = #tpu.pipeline_mode<synchronous>, transform_indices = @transform_8, window_bounds = array<i64: 2, 1, 128>}, {pipeline_mode = #tpu.pipeline_mode<synchronous>, transform_indices = @transform_9, window_bounds = array<i64: 2, 128, 128>}, {pipeline_mode = #tpu.pipeline_mode<synchronous>, transform_indices = @transform_10, window_bounds = array<i64: 2, 1, 128>}, {pipeline_mode = #tpu.pipeline_mode<synchronous>, transform_indices = @transform_11, window_bounds = array<i64: 2, 1, 128>}, {pipeline_mode = #tpu.pipeline_mode<synchronous>, transform_indices = @transform_12, window_bounds = array<i64: 2, 1, 128>}, {pipeline_mode = #tpu.pipeline_mode<synchronous>, transform_indices = @transform_13, window_bounds = array<i64: 2, 128, 256>}, {pipeline_mode = #tpu.pipeline_mode<synchronous>, transform_indices = @transform_14, window_bounds = array<i64: 2, 1, 256>}, {pipeline_mode = #tpu.pipeline_mode<synchronous>, transform_indices = @transform_15, window_bounds = array<i64: 2, 256, 128>}, {pipeline_mode = #tpu.pipeline_mode<synchronous>, transform_indices = @transform_16, window_bounds = array<i64: 2, 1, 128>}, {pipeline_mode = #tpu.pipeline_mode<synchronous>, transform_indices = @transform_17, window_bounds = array<i64: 2, 1, 128>}, {pipeline_mode = #tpu.pipeline_mode<synchronous>, transform_indices = @transform_18, window_bounds = array<i64: 2, 1, 128>}, {transform_indices = @transform_19, window_bounds = array<i64: 2, 16, 128>}]} {
    %c0_i32 = arith.constant 0 : i32
    %0 = arith.cmpi eq, %arg1, %c0_i32 : i32
    %1 = arith.extui %0 : i1 to i32
    %c0_i32_0 = arith.constant 0 : i32
    %2 = arith.cmpi ne, %1, %c0_i32_0 : i32
    scf.if %2 {
      %c0_107 = arith.constant 0 : index
      %c0_108 = arith.constant 0 : index
      %c0_109 = arith.constant 0 : index
      %297 = vector.load %arg2[%c0_107, %c0_108, %c0_109] : memref<2x16x128xbf16, #tpu.memory_space<vmem>>, vector<2x16x128xbf16>
      %298 = vector.shape_cast %297 : vector<2x16x128xbf16> to vector<32x128xbf16>
      %299 = arith.extf %298 : vector<32x128xbf16> to vector<32x128xf32>
      %c0_110 = arith.constant 0 : index
      %c0_111 = arith.constant 0 : index
      %300 = vector.load %arg22[%c0_110, %c0_111] : memref<32x128xf32, #tpu.memory_space<vmem>>, vector<32x128xf32>
      tpu.vector_store %arg22[%c0_110, %c0_111], %299 {strides = array<i32>} : memref<32x128xf32, #tpu.memory_space<vmem>>, vector<32x128xf32>,
    } else {
    }
    %c0 = arith.constant 0 : index
    %c0_1 = arith.constant 0 : index
    %3 = vector.load %arg22[%c0, %c0_1] : memref<32x128xf32, #tpu.memory_space<vmem>>, vector<32x128xf32>
    %4 = arith.truncf %3 : vector<32x128xf32> to vector<32x128xbf16>
    %c0_2 = arith.constant 0 : index
    %c0_3 = arith.constant 0 : index
    %c0_4 = arith.constant 0 : index
    %5 = vector.load %arg3[%c0_2, %c0_3, %c0_4] : memref<2x128x128xbf16, #tpu.memory_space<vmem>>, vector<2x128x128xbf16>
    %6 = vector.shape_cast %5 : vector<2x128x128xbf16> to vector<256x128xbf16>
    %7 = arith.index_cast %arg1 : i32 to index
    %c0_5 = arith.constant 0 : index
    %c0_6 = arith.constant 0 : index
    %8 = vector.load %arg5[%7, %c0_5, %c0_6] : memref<2x128x128xbf16, #tpu.memory_space<vmem>>, vector<1x128x128xbf16>
    %9 = vector.shape_cast %8 : vector<1x128x128xbf16> to vector<128x128xbf16>
    %cst = arith.constant dense<0.000000e+00> : vector<32x128xf32>
    %10 = tpu.matmul %4, %9, %cst {dimension_numbers = #tpu.dot_dimension_numbers<[1], [0], [0], [1], [0, 0, 1, 1], [], []>} : vector<32x128xbf16>, vector<128x128xbf16>, vector<32x128xf32> -> vector<32x128xf32>
    %11 = arith.index_cast %arg1 : i32 to index
    %c0_7 = arith.constant 0 : index
    %c0_8 = arith.constant 0 : index
    %12 = vector.load %arg8[%11, %c0_7, %c0_8] : memref<2x1x128xf32, #tpu.memory_space<vmem>>, vector<1x1x128xf32>
    %13 = vector.shape_cast %12 : vector<1x1x128xf32> to vector<1x128xf32>
    %14 = vector.broadcast %13 : vector<1x128xf32> to vector<32x128xf32>
    %15 = arith.addf %10, %14 : vector<32x128xf32>
    %16 = arith.index_cast %arg1 : i32 to index
    %c0_9 = arith.constant 0 : index
    %c0_10 = arith.constant 0 : index
    %17 = vector.load %arg6[%16, %c0_9, %c0_10] : memref<2x128x128xbf16, #tpu.memory_space<vmem>>, vector<1x128x128xbf16>
    %18 = vector.shape_cast %17 : vector<1x128x128xbf16> to vector<128x128xbf16>
    %cst_11 = arith.constant dense<0.000000e+00> : vector<256x128xf32>
    %19 = tpu.matmul %6, %18, %cst_11 {dimension_numbers = #tpu.dot_dimension_numbers<[1], [0], [0], [1], [0, 0, 1, 1], [], []>} : vector<256x128xbf16>, vector<128x128xbf16>, vector<256x128xf32> -> vector<256x128xf32>
    %20 = arith.index_cast %arg1 : i32 to index
    %c0_12 = arith.constant 0 : index
    %c0_13 = arith.constant 0 : index
    %21 = vector.load %arg9[%20, %c0_12, %c0_13] : memref<2x1x128xf32, #tpu.memory_space<vmem>>, vector<1x1x128xf32>
    %22 = vector.shape_cast %21 : vector<1x1x128xf32> to vector<1x128xf32>
    %23 = vector.broadcast %22 : vector<1x128xf32> to vector<256x128xf32>
    %24 = arith.addf %19, %23 : vector<256x128xf32>
    %25 = arith.index_cast %arg1 : i32 to index
    %c0_14 = arith.constant 0 : index
    %c0_15 = arith.constant 0 : index
    %26 = vector.load %arg7[%25, %c0_14, %c0_15] : memref<2x128x128xbf16, #tpu.memory_space<vmem>>, vector<1x128x128xbf16>
    %27 = vector.shape_cast %26 : vector<1x128x128xbf16> to vector<128x128xbf16>
    %cst_16 = arith.constant dense<0.000000e+00> : vector<256x128xf32>
    %28 = tpu.matmul %6, %27, %cst_16 {dimension_numbers = #tpu.dot_dimension_numbers<[1], [0], [0], [1], [0, 0, 1, 1], [], []>} : vector<256x128xbf16>, vector<128x128xbf16>, vector<256x128xf32> -> vector<256x128xf32>
    %29 = arith.index_cast %arg1 : i32 to index
    %c0_17 = arith.constant 0 : index
    %c0_18 = arith.constant 0 : index
    %30 = vector.load %arg10[%29, %c0_17, %c0_18] : memref<2x1x128xf32, #tpu.memory_space<vmem>>, vector<1x1x128xf32>
    %31 = vector.shape_cast %30 : vector<1x1x128xf32> to vector<1x128xf32>
    %32 = vector.broadcast %31 : vector<1x128xf32> to vector<256x128xf32>
    %33 = arith.addf %28, %32 : vector<256x128xf32>
    %34 = arith.truncf %15 : vector<32x128xf32> to vector<32x128xbf16>
    %35 = arith.truncf %24 : vector<256x128xf32> to vector<256x128xbf16>
    %36 = arith.truncf %33 : vector<256x128xf32> to vector<256x128xbf16>
    %c0_19 = arith.constant 0 : index
    %c0_20 = arith.constant 0 : index
    %c0_21 = arith.constant 0 : index
    %37 = vector.load %arg4[%c0_19, %c0_20, %c0_21] : memref<2x1x128xf32, #tpu.memory_space<vmem>>, vector<1x1x128xf32>
    %38 = vector.shape_cast %37 : vector<1x1x128xf32> to vector<1x128xf32>
    %39 = vector.shape_cast %38 : vector<1x128xf32> to vector<1x128xf32>
    %40 = vector.broadcast %39 : vector<1x128xf32> to vector<16x128xf32>
    %41 = vector.extract_strided_slice %34 {offsets = [0, 0], sizes = [16, 128], strides = [1, 1]} : vector<32x128xbf16> to vector<16x128xbf16>
    %42 = vector.extract_strided_slice %35 {offsets = [0, 0], sizes = [128, 128], strides = [1, 1]} : vector<256x128xbf16> to vector<128x128xbf16>
    %43 = vector.extract_strided_slice %36 {offsets = [0, 0], sizes = [128, 128], strides = [1, 1]} : vector<256x128xbf16> to vector<128x128xbf16>
    %44 = vector.extract_strided_slice %41 {offsets = [0, 0], sizes = [16, 32], strides = [1, 1]} : vector<16x128xbf16> to vector<16x32xbf16>
    %45 = vector.extract_strided_slice %42 {offsets = [0, 0], sizes = [128, 32], strides = [1, 1]} : vector<128x128xbf16> to vector<128x32xbf16>
    %46 = vector.extract_strided_slice %43 {offsets = [0, 0], sizes = [128, 32], strides = [1, 1]} : vector<128x128xbf16> to vector<128x32xbf16>
    %cst_22 = arith.constant dense<0.000000e+00> : vector<16x128xf32>
    %47 = tpu.matmul %44, %45, %cst_22 {dimension_numbers = #tpu.dot_dimension_numbers<[1], [1], [0], [0], [0, 0, 1, 0], [], []>} : vector<16x32xbf16>, vector<128x32xbf16>, vector<16x128xf32> -> vector<16x128xf32>
    %48 = arith.addf %47, %40 : vector<16x128xf32>
    %cst_23 = arith.constant dense<0xFF800000> : vector<16xf32>
    %49 = vector.multi_reduction <maximumf>, %48, %cst_23 [1] : vector<16x128xf32> to vector<16xf32>
    %50 = vector.shape_cast %49 : vector<16xf32> to vector<16x1xf32>
    %51 = vector.broadcast %50 : vector<16x1xf32> to vector<16x128xf32>
    %52 = arith.subf %48, %51 : vector<16x128xf32>
    %53 = math.exp %52 : vector<16x128xf32>
    %cst_24 = arith.constant dense<0.000000e+00> : vector<16xf32>
    %54 = vector.multi_reduction <add>, %53, %cst_24 [1] : vector<16x128xf32> to vector<16xf32>
    %55 = vector.shape_cast %54 : vector<16xf32> to vector<16x1xf32>
    %56 = tpu.reciprocal %55 {approx = true} : vector<16x1xf32> -> vector<16x1xf32>
    %57 = vector.broadcast %56 : vector<16x1xf32> to vector<16x128xf32>
    %58 = arith.mulf %53, %57 : vector<16x128xf32>
    %59 = arith.truncf %58 : vector<16x128xf32> to vector<16x128xbf16>
    %cst_25 = arith.constant dense<0.000000e+00> : vector<16x32xf32>
    %60 = tpu.matmul %59, %46, %cst_25 {dimension_numbers = #tpu.dot_dimension_numbers<[1], [0], [0], [1], [0, 0, 1, 1], [], []>} : vector<16x128xbf16>, vector<128x32xbf16>, vector<16x32xf32> -> vector<16x32xf32>
    %61 = arith.truncf %60 : vector<16x32xf32> to vector<16x32xbf16>
    %c0_26 = arith.constant 0 : index
    %c0_27 = arith.constant 0 : index
    %62 = vector.load %arg23[%c0_26, %c0_27] : memref<32x128xbf16, #tpu.memory_space<vmem>>, vector<16x32xbf16>
    tpu.vector_store %arg23[%c0_26, %c0_27], %61 {strides = array<i32>} : memref<32x128xbf16, #tpu.memory_space<vmem>>, vector<16x32xbf16>,
    %63 = vector.extract_strided_slice %41 {offsets = [0, 32], sizes = [16, 32], strides = [1, 1]} : vector<16x128xbf16> to vector<16x32xbf16>
    %64 = vector.extract_strided_slice %42 {offsets = [0, 32], sizes = [128, 32], strides = [1, 1]} : vector<128x128xbf16> to vector<128x32xbf16>
    %65 = vector.extract_strided_slice %43 {offsets = [0, 32], sizes = [128, 32], strides = [1, 1]} : vector<128x128xbf16> to vector<128x32xbf16>
    %cst_28 = arith.constant dense<0.000000e+00> : vector<16x128xf32>
    %66 = tpu.matmul %63, %64, %cst_28 {dimension_numbers = #tpu.dot_dimension_numbers<[1], [1], [0], [0], [0, 0, 1, 0], [], []>} : vector<16x32xbf16>, vector<128x32xbf16>, vector<16x128xf32> -> vector<16x128xf32>
    %67 = arith.addf %66, %40 : vector<16x128xf32>
    %cst_29 = arith.constant dense<0xFF800000> : vector<16xf32>
    %68 = vector.multi_reduction <maximumf>, %67, %cst_29 [1] : vector<16x128xf32> to vector<16xf32>
    %69 = vector.shape_cast %68 : vector<16xf32> to vector<16x1xf32>
    %70 = vector.broadcast %69 : vector<16x1xf32> to vector<16x128xf32>
    %71 = arith.subf %67, %70 : vector<16x128xf32>
    %72 = math.exp %71 : vector<16x128xf32>
    %cst_30 = arith.constant dense<0.000000e+00> : vector<16xf32>
    %73 = vector.multi_reduction <add>, %72, %cst_30 [1] : vector<16x128xf32> to vector<16xf32>
    %74 = vector.shape_cast %73 : vector<16xf32> to vector<16x1xf32>
    %75 = tpu.reciprocal %74 {approx = true} : vector<16x1xf32> -> vector<16x1xf32>
    %76 = vector.broadcast %75 : vector<16x1xf32> to vector<16x128xf32>
    %77 = arith.mulf %72, %76 : vector<16x128xf32>
    %78 = arith.truncf %77 : vector<16x128xf32> to vector<16x128xbf16>
    %cst_31 = arith.constant dense<0.000000e+00> : vector<16x32xf32>
    %79 = tpu.matmul %78, %65, %cst_31 {dimension_numbers = #tpu.dot_dimension_numbers<[1], [0], [0], [1], [0, 0, 1, 1], [], []>} : vector<16x128xbf16>, vector<128x32xbf16>, vector<16x32xf32> -> vector<16x32xf32>
    %80 = arith.truncf %79 : vector<16x32xf32> to vector<16x32xbf16>
    %c0_32 = arith.constant 0 : index
    %c32 = arith.constant 32 : index
    %81 = vector.load %arg23[%c0_32, %c32] : memref<32x128xbf16, #tpu.memory_space<vmem>>, vector<16x32xbf16>
    tpu.vector_store %arg23[%c0_32, %c32], %80 {strides = array<i32>} : memref<32x128xbf16, #tpu.memory_space<vmem>>, vector<16x32xbf16>,
    %82 = vector.extract_strided_slice %41 {offsets = [0, 64], sizes = [16, 32], strides = [1, 1]} : vector<16x128xbf16> to vector<16x32xbf16>
    %83 = vector.extract_strided_slice %42 {offsets = [0, 64], sizes = [128, 32], strides = [1, 1]} : vector<128x128xbf16> to vector<128x32xbf16>
    %84 = vector.extract_strided_slice %43 {offsets = [0, 64], sizes = [128, 32], strides = [1, 1]} : vector<128x128xbf16> to vector<128x32xbf16>
    %cst_33 = arith.constant dense<0.000000e+00> : vector<16x128xf32>
    %85 = tpu.matmul %82, %83, %cst_33 {dimension_numbers = #tpu.dot_dimension_numbers<[1], [1], [0], [0], [0, 0, 1, 0], [], []>} : vector<16x32xbf16>, vector<128x32xbf16>, vector<16x128xf32> -> vector<16x128xf32>
    %86 = arith.addf %85, %40 : vector<16x128xf32>
    %cst_34 = arith.constant dense<0xFF800000> : vector<16xf32>
    %87 = vector.multi_reduction <maximumf>, %86, %cst_34 [1] : vector<16x128xf32> to vector<16xf32>
    %88 = vector.shape_cast %87 : vector<16xf32> to vector<16x1xf32>
    %89 = vector.broadcast %88 : vector<16x1xf32> to vector<16x128xf32>
    %90 = arith.subf %86, %89 : vector<16x128xf32>
    %91 = math.exp %90 : vector<16x128xf32>
    %cst_35 = arith.constant dense<0.000000e+00> : vector<16xf32>
    %92 = vector.multi_reduction <add>, %91, %cst_35 [1] : vector<16x128xf32> to vector<16xf32>
    %93 = vector.shape_cast %92 : vector<16xf32> to vector<16x1xf32>
    %94 = tpu.reciprocal %93 {approx = true} : vector<16x1xf32> -> vector<16x1xf32>
    %95 = vector.broadcast %94 : vector<16x1xf32> to vector<16x128xf32>
    %96 = arith.mulf %91, %95 : vector<16x128xf32>
    %97 = arith.truncf %96 : vector<16x128xf32> to vector<16x128xbf16>
    %cst_36 = arith.constant dense<0.000000e+00> : vector<16x32xf32>
    %98 = tpu.matmul %97, %84, %cst_36 {dimension_numbers = #tpu.dot_dimension_numbers<[1], [0], [0], [1], [0, 0, 1, 1], [], []>} : vector<16x128xbf16>, vector<128x32xbf16>, vector<16x32xf32> -> vector<16x32xf32>
    %99 = arith.truncf %98 : vector<16x32xf32> to vector<16x32xbf16>
    %c0_37 = arith.constant 0 : index
    %c64 = arith.constant 64 : index
    %100 = vector.load %arg23[%c0_37, %c64] : memref<32x128xbf16, #tpu.memory_space<vmem>>, vector<16x32xbf16>
    tpu.vector_store %arg23[%c0_37, %c64], %99 {strides = array<i32>} : memref<32x128xbf16, #tpu.memory_space<vmem>>, vector<16x32xbf16>,
    %101 = vector.extract_strided_slice %41 {offsets = [0, 96], sizes = [16, 32], strides = [1, 1]} : vector<16x128xbf16> to vector<16x32xbf16>
    %102 = vector.extract_strided_slice %42 {offsets = [0, 96], sizes = [128, 32], strides = [1, 1]} : vector<128x128xbf16> to vector<128x32xbf16>
    %103 = vector.extract_strided_slice %43 {offsets = [0, 96], sizes = [128, 32], strides = [1, 1]} : vector<128x128xbf16> to vector<128x32xbf16>
    %cst_38 = arith.constant dense<0.000000e+00> : vector<16x128xf32>
    %104 = tpu.matmul %101, %102, %cst_38 {dimension_numbers = #tpu.dot_dimension_numbers<[1], [1], [0], [0], [0, 0, 1, 0], [], []>} : vector<16x32xbf16>, vector<128x32xbf16>, vector<16x128xf32> -> vector<16x128xf32>
    %105 = arith.addf %104, %40 : vector<16x128xf32>
    %cst_39 = arith.constant dense<0xFF800000> : vector<16xf32>
    %106 = vector.multi_reduction <maximumf>, %105, %cst_39 [1] : vector<16x128xf32> to vector<16xf32>
    %107 = vector.shape_cast %106 : vector<16xf32> to vector<16x1xf32>
    %108 = vector.broadcast %107 : vector<16x1xf32> to vector<16x128xf32>
    %109 = arith.subf %105, %108 : vector<16x128xf32>
    %110 = math.exp %109 : vector<16x128xf32>
    %cst_40 = arith.constant dense<0.000000e+00> : vector<16xf32>
    %111 = vector.multi_reduction <add>, %110, %cst_40 [1] : vector<16x128xf32> to vector<16xf32>
    %112 = vector.shape_cast %111 : vector<16xf32> to vector<16x1xf32>
    %113 = tpu.reciprocal %112 {approx = true} : vector<16x1xf32> -> vector<16x1xf32>
    %114 = vector.broadcast %113 : vector<16x1xf32> to vector<16x128xf32>
    %115 = arith.mulf %110, %114 : vector<16x128xf32>
    %116 = arith.truncf %115 : vector<16x128xf32> to vector<16x128xbf16>
    %cst_41 = arith.constant dense<0.000000e+00> : vector<16x32xf32>
    %117 = tpu.matmul %116, %103, %cst_41 {dimension_numbers = #tpu.dot_dimension_numbers<[1], [0], [0], [1], [0, 0, 1, 1], [], []>} : vector<16x128xbf16>, vector<128x32xbf16>, vector<16x32xf32> -> vector<16x32xf32>
    %118 = arith.truncf %117 : vector<16x32xf32> to vector<16x32xbf16>
    %c0_42 = arith.constant 0 : index
    %c96 = arith.constant 96 : index
    %119 = vector.load %arg23[%c0_42, %c96] : memref<32x128xbf16, #tpu.memory_space<vmem>>, vector<16x32xbf16>
    tpu.vector_store %arg23[%c0_42, %c96], %118 {strides = array<i32>} : memref<32x128xbf16, #tpu.memory_space<vmem>>, vector<16x32xbf16>,
    %c1 = arith.constant 1 : index
    %c0_43 = arith.constant 0 : index
    %c0_44 = arith.constant 0 : index
    %120 = vector.load %arg4[%c1, %c0_43, %c0_44] : memref<2x1x128xf32, #tpu.memory_space<vmem>>, vector<1x1x128xf32>
    %121 = vector.shape_cast %120 : vector<1x1x128xf32> to vector<1x128xf32>
    %122 = vector.shape_cast %121 : vector<1x128xf32> to vector<1x128xf32>
    %123 = vector.broadcast %122 : vector<1x128xf32> to vector<16x128xf32>
    %124 = vector.extract_strided_slice %34 {offsets = [16, 0], sizes = [16, 128], strides = [1, 1]} : vector<32x128xbf16> to vector<16x128xbf16>
    %125 = vector.extract_strided_slice %35 {offsets = [128, 0], sizes = [128, 128], strides = [1, 1]} : vector<256x128xbf16> to vector<128x128xbf16>
    %126 = vector.extract_strided_slice %36 {offsets = [128, 0], sizes = [128, 128], strides = [1, 1]} : vector<256x128xbf16> to vector<128x128xbf16>
    %127 = vector.extract_strided_slice %124 {offsets = [0, 0], sizes = [16, 32], strides = [1, 1]} : vector<16x128xbf16> to vector<16x32xbf16>
    %128 = vector.extract_strided_slice %125 {offsets = [0, 0], sizes = [128, 32], strides = [1, 1]} : vector<128x128xbf16> to vector<128x32xbf16>
    %129 = vector.extract_strided_slice %126 {offsets = [0, 0], sizes = [128, 32], strides = [1, 1]} : vector<128x128xbf16> to vector<128x32xbf16>
    %cst_45 = arith.constant dense<0.000000e+00> : vector<16x128xf32>
    %130 = tpu.matmul %127, %128, %cst_45 {dimension_numbers = #tpu.dot_dimension_numbers<[1], [1], [0], [0], [0, 0, 1, 0], [], []>} : vector<16x32xbf16>, vector<128x32xbf16>, vector<16x128xf32> -> vector<16x128xf32>
    %131 = arith.addf %130, %123 : vector<16x128xf32>
    %cst_46 = arith.constant dense<0xFF800000> : vector<16xf32>
    %132 = vector.multi_reduction <maximumf>, %131, %cst_46 [1] : vector<16x128xf32> to vector<16xf32>
    %133 = vector.shape_cast %132 : vector<16xf32> to vector<16x1xf32>
    %134 = vector.broadcast %133 : vector<16x1xf32> to vector<16x128xf32>
    %135 = arith.subf %131, %134 : vector<16x128xf32>
    %136 = math.exp %135 : vector<16x128xf32>
    %cst_47 = arith.constant dense<0.000000e+00> : vector<16xf32>
    %137 = vector.multi_reduction <add>, %136, %cst_47 [1] : vector<16x128xf32> to vector<16xf32>
    %138 = vector.shape_cast %137 : vector<16xf32> to vector<16x1xf32>
    %139 = tpu.reciprocal %138 {approx = true} : vector<16x1xf32> -> vector<16x1xf32>
    %140 = vector.broadcast %139 : vector<16x1xf32> to vector<16x128xf32>
    %141 = arith.mulf %136, %140 : vector<16x128xf32>
    %142 = arith.truncf %141 : vector<16x128xf32> to vector<16x128xbf16>
    %cst_48 = arith.constant dense<0.000000e+00> : vector<16x32xf32>
    %143 = tpu.matmul %142, %129, %cst_48 {dimension_numbers = #tpu.dot_dimension_numbers<[1], [0], [0], [1], [0, 0, 1, 1], [], []>} : vector<16x128xbf16>, vector<128x32xbf16>, vector<16x32xf32> -> vector<16x32xf32>
    %144 = arith.truncf %143 : vector<16x32xf32> to vector<16x32xbf16>
    %c16 = arith.constant 16 : index
    %c0_49 = arith.constant 0 : index
    %145 = vector.load %arg23[%c16, %c0_49] : memref<32x128xbf16, #tpu.memory_space<vmem>>, vector<16x32xbf16>
    tpu.vector_store %arg23[%c16, %c0_49], %144 {strides = array<i32>} : memref<32x128xbf16, #tpu.memory_space<vmem>>, vector<16x32xbf16>,
    %146 = vector.extract_strided_slice %124 {offsets = [0, 32], sizes = [16, 32], strides = [1, 1]} : vector<16x128xbf16> to vector<16x32xbf16>
    %147 = vector.extract_strided_slice %125 {offsets = [0, 32], sizes = [128, 32], strides = [1, 1]} : vector<128x128xbf16> to vector<128x32xbf16>
    %148 = vector.extract_strided_slice %126 {offsets = [0, 32], sizes = [128, 32], strides = [1, 1]} : vector<128x128xbf16> to vector<128x32xbf16>
    %cst_50 = arith.constant dense<0.000000e+00> : vector<16x128xf32>
    %149 = tpu.matmul %146, %147, %cst_50 {dimension_numbers = #tpu.dot_dimension_numbers<[1], [1], [0], [0], [0, 0, 1, 0], [], []>} : vector<16x32xbf16>, vector<128x32xbf16>, vector<16x128xf32> -> vector<16x128xf32>
    %150 = arith.addf %149, %123 : vector<16x128xf32>
    %cst_51 = arith.constant dense<0xFF800000> : vector<16xf32>
    %151 = vector.multi_reduction <maximumf>, %150, %cst_51 [1] : vector<16x128xf32> to vector<16xf32>
    %152 = vector.shape_cast %151 : vector<16xf32> to vector<16x1xf32>
    %153 = vector.broadcast %152 : vector<16x1xf32> to vector<16x128xf32>
    %154 = arith.subf %150, %153 : vector<16x128xf32>
    %155 = math.exp %154 : vector<16x128xf32>
    %cst_52 = arith.constant dense<0.000000e+00> : vector<16xf32>
    %156 = vector.multi_reduction <add>, %155, %cst_52 [1] : vector<16x128xf32> to vector<16xf32>
    %157 = vector.shape_cast %156 : vector<16xf32> to vector<16x1xf32>
    %158 = tpu.reciprocal %157 {approx = true} : vector<16x1xf32> -> vector<16x1xf32>
    %159 = vector.broadcast %158 : vector<16x1xf32> to vector<16x128xf32>
    %160 = arith.mulf %155, %159 : vector<16x128xf32>
    %161 = arith.truncf %160 : vector<16x128xf32> to vector<16x128xbf16>
    %cst_53 = arith.constant dense<0.000000e+00> : vector<16x32xf32>
    %162 = tpu.matmul %161, %148, %cst_53 {dimension_numbers = #tpu.dot_dimension_numbers<[1], [0], [0], [1], [0, 0, 1, 1], [], []>} : vector<16x128xbf16>, vector<128x32xbf16>, vector<16x32xf32> -> vector<16x32xf32>
    %163 = arith.truncf %162 : vector<16x32xf32> to vector<16x32xbf16>
    %c16_54 = arith.constant 16 : index
    %c32_55 = arith.constant 32 : index
    %164 = vector.load %arg23[%c16_54, %c32_55] : memref<32x128xbf16, #tpu.memory_space<vmem>>, vector<16x32xbf16>
    tpu.vector_store %arg23[%c16_54, %c32_55], %163 {strides = array<i32>} : memref<32x128xbf16, #tpu.memory_space<vmem>>, vector<16x32xbf16>,
    %165 = vector.extract_strided_slice %124 {offsets = [0, 64], sizes = [16, 32], strides = [1, 1]} : vector<16x128xbf16> to vector<16x32xbf16>
    %166 = vector.extract_strided_slice %125 {offsets = [0, 64], sizes = [128, 32], strides = [1, 1]} : vector<128x128xbf16> to vector<128x32xbf16>
    %167 = vector.extract_strided_slice %126 {offsets = [0, 64], sizes = [128, 32], strides = [1, 1]} : vector<128x128xbf16> to vector<128x32xbf16>
    %cst_56 = arith.constant dense<0.000000e+00> : vector<16x128xf32>
    %168 = tpu.matmul %165, %166, %cst_56 {dimension_numbers = #tpu.dot_dimension_numbers<[1], [1], [0], [0], [0, 0, 1, 0], [], []>} : vector<16x32xbf16>, vector<128x32xbf16>, vector<16x128xf32> -> vector<16x128xf32>
    %169 = arith.addf %168, %123 : vector<16x128xf32>
    %cst_57 = arith.constant dense<0xFF800000> : vector<16xf32>
    %170 = vector.multi_reduction <maximumf>, %169, %cst_57 [1] : vector<16x128xf32> to vector<16xf32>
    %171 = vector.shape_cast %170 : vector<16xf32> to vector<16x1xf32>
    %172 = vector.broadcast %171 : vector<16x1xf32> to vector<16x128xf32>
    %173 = arith.subf %169, %172 : vector<16x128xf32>
    %174 = math.exp %173 : vector<16x128xf32>
    %cst_58 = arith.constant dense<0.000000e+00> : vector<16xf32>
    %175 = vector.multi_reduction <add>, %174, %cst_58 [1] : vector<16x128xf32> to vector<16xf32>
    %176 = vector.shape_cast %175 : vector<16xf32> to vector<16x1xf32>
    %177 = tpu.reciprocal %176 {approx = true} : vector<16x1xf32> -> vector<16x1xf32>
    %178 = vector.broadcast %177 : vector<16x1xf32> to vector<16x128xf32>
    %179 = arith.mulf %174, %178 : vector<16x128xf32>
    %180 = arith.truncf %179 : vector<16x128xf32> to vector<16x128xbf16>
    %cst_59 = arith.constant dense<0.000000e+00> : vector<16x32xf32>
    %181 = tpu.matmul %180, %167, %cst_59 {dimension_numbers = #tpu.dot_dimension_numbers<[1], [0], [0], [1], [0, 0, 1, 1], [], []>} : vector<16x128xbf16>, vector<128x32xbf16>, vector<16x32xf32> -> vector<16x32xf32>
    %182 = arith.truncf %181 : vector<16x32xf32> to vector<16x32xbf16>
    %c16_60 = arith.constant 16 : index
    %c64_61 = arith.constant 64 : index
    %183 = vector.load %arg23[%c16_60, %c64_61] : memref<32x128xbf16, #tpu.memory_space<vmem>>, vector<16x32xbf16>
    tpu.vector_store %arg23[%c16_60, %c64_61], %182 {strides = array<i32>} : memref<32x128xbf16, #tpu.memory_space<vmem>>, vector<16x32xbf16>,
    %184 = vector.extract_strided_slice %124 {offsets = [0, 96], sizes = [16, 32], strides = [1, 1]} : vector<16x128xbf16> to vector<16x32xbf16>
    %185 = vector.extract_strided_slice %125 {offsets = [0, 96], sizes = [128, 32], strides = [1, 1]} : vector<128x128xbf16> to vector<128x32xbf16>
    %186 = vector.extract_strided_slice %126 {offsets = [0, 96], sizes = [128, 32], strides = [1, 1]} : vector<128x128xbf16> to vector<128x32xbf16>
    %cst_62 = arith.constant dense<0.000000e+00> : vector<16x128xf32>
    %187 = tpu.matmul %184, %185, %cst_62 {dimension_numbers = #tpu.dot_dimension_numbers<[1], [1], [0], [0], [0, 0, 1, 0], [], []>} : vector<16x32xbf16>, vector<128x32xbf16>, vector<16x128xf32> -> vector<16x128xf32>
    %188 = arith.addf %187, %123 : vector<16x128xf32>
    %cst_63 = arith.constant dense<0xFF800000> : vector<16xf32>
    %189 = vector.multi_reduction <maximumf>, %188, %cst_63 [1] : vector<16x128xf32> to vector<16xf32>
    %190 = vector.shape_cast %189 : vector<16xf32> to vector<16x1xf32>
    %191 = vector.broadcast %190 : vector<16x1xf32> to vector<16x128xf32>
    %192 = arith.subf %188, %191 : vector<16x128xf32>
    %193 = math.exp %192 : vector<16x128xf32>
    %cst_64 = arith.constant dense<0.000000e+00> : vector<16xf32>
    %194 = vector.multi_reduction <add>, %193, %cst_64 [1] : vector<16x128xf32> to vector<16xf32>
    %195 = vector.shape_cast %194 : vector<16xf32> to vector<16x1xf32>
    %196 = tpu.reciprocal %195 {approx = true} : vector<16x1xf32> -> vector<16x1xf32>
    %197 = vector.broadcast %196 : vector<16x1xf32> to vector<16x128xf32>
    %198 = arith.mulf %193, %197 : vector<16x128xf32>
    %199 = arith.truncf %198 : vector<16x128xf32> to vector<16x128xbf16>
    %cst_65 = arith.constant dense<0.000000e+00> : vector<16x32xf32>
    %200 = tpu.matmul %199, %186, %cst_65 {dimension_numbers = #tpu.dot_dimension_numbers<[1], [0], [0], [1], [0, 0, 1, 1], [], []>} : vector<16x128xbf16>, vector<128x32xbf16>, vector<16x32xf32> -> vector<16x32xf32>
    %201 = arith.truncf %200 : vector<16x32xf32> to vector<16x32xbf16>
    %c16_66 = arith.constant 16 : index
    %c96_67 = arith.constant 96 : index
    %202 = vector.load %arg23[%c16_66, %c96_67] : memref<32x128xbf16, #tpu.memory_space<vmem>>, vector<16x32xbf16>
    tpu.vector_store %arg23[%c16_66, %c96_67], %201 {strides = array<i32>} : memref<32x128xbf16, #tpu.memory_space<vmem>>, vector<16x32xbf16>,
    %c0_68 = arith.constant 0 : index
    %c0_69 = arith.constant 0 : index
    %203 = vector.load %arg23[%c0_68, %c0_69] : memref<32x128xbf16, #tpu.memory_space<vmem>>, vector<32x128xbf16>
    %204 = arith.index_cast %arg1 : i32 to index
    %c0_70 = arith.constant 0 : index
    %c0_71 = arith.constant 0 : index
    %205 = vector.load %arg11[%204, %c0_70, %c0_71] : memref<2x128x128xbf16, #tpu.memory_space<vmem>>, vector<1x128x128xbf16>
    %206 = vector.shape_cast %205 : vector<1x128x128xbf16> to vector<128x128xbf16>
    %cst_72 = arith.constant dense<0.000000e+00> : vector<32x128xf32>
    %207 = tpu.matmul %203, %206, %cst_72 {dimension_numbers = #tpu.dot_dimension_numbers<[1], [0], [0], [1], [0, 0, 1, 1], [], []>} : vector<32x128xbf16>, vector<128x128xbf16>, vector<32x128xf32> -> vector<32x128xf32>
    %208 = arith.index_cast %arg1 : i32 to index
    %c0_73 = arith.constant 0 : index
    %c0_74 = arith.constant 0 : index
    %209 = vector.load %arg12[%208, %c0_73, %c0_74] : memref<2x1x128xf32, #tpu.memory_space<vmem>>, vector<1x1x128xf32>
    %210 = vector.shape_cast %209 : vector<1x1x128xf32> to vector<1x128xf32>
    %211 = vector.broadcast %210 : vector<1x128xf32> to vector<32x128xf32>
    %212 = arith.addf %207, %211 : vector<32x128xf32>
    %213 = arith.addf %3, %212 : vector<32x128xf32>
    %214 = arith.index_cast %arg1 : i32 to index
    %c0_75 = arith.constant 0 : index
    %c0_76 = arith.constant 0 : index
    %215 = vector.load %arg13[%214, %c0_75, %c0_76] : memref<2x1x128xf32, #tpu.memory_space<vmem>>, vector<1x1x128xf32>
    %216 = vector.shape_cast %215 : vector<1x1x128xf32> to vector<1x128xf32>
    %217 = arith.index_cast %arg1 : i32 to index
    %c0_77 = arith.constant 0 : index
    %c0_78 = arith.constant 0 : index
    %218 = vector.load %arg14[%217, %c0_77, %c0_78] : memref<2x1x128xf32, #tpu.memory_space<vmem>>, vector<1x1x128xf32>
    %219 = vector.shape_cast %218 : vector<1x1x128xf32> to vector<1x128xf32>
    %cst_79 = arith.constant dense<0.000000e+00> : vector<32xf32>
    %220 = vector.multi_reduction <add>, %213, %cst_79 [1] : vector<32x128xf32> to vector<32xf32>
    %221 = vector.shape_cast %220 : vector<32xf32> to vector<32x1xf32>
    %cst_80 = arith.constant 1.280000e+02 : f32
    %222 = vector.broadcast %cst_80 : f32 to vector<32x1xf32>
    %223 = arith.divf %221, %222 : vector<32x1xf32>
    %224 = vector.broadcast %223 : vector<32x1xf32> to vector<32x128xf32>
    %225 = arith.subf %213, %224 : vector<32x128xf32>
    %226 = arith.mulf %225, %225 : vector<32x128xf32>
    %cst_81 = arith.constant dense<0.000000e+00> : vector<32xf32>
    %227 = vector.multi_reduction <add>, %226, %cst_81 [1] : vector<32x128xf32> to vector<32xf32>
    %228 = vector.shape_cast %227 : vector<32xf32> to vector<32x1xf32>
    %cst_82 = arith.constant 1.280000e+02 : f32
    %229 = vector.broadcast %cst_82 : f32 to vector<32x1xf32>
    %230 = arith.divf %228, %229 : vector<32x1xf32>
    %231 = vector.broadcast %223 : vector<32x1xf32> to vector<32x128xf32>
    %232 = arith.subf %213, %231 : vector<32x128xf32>
    %cst_83 = arith.constant 9.99999974E-6 : f32
    %233 = vector.broadcast %cst_83 : f32 to vector<32x1xf32>
    %234 = arith.addf %230, %233 : vector<32x1xf32>
    %235 = math.rsqrt %234 : vector<32x1xf32>
    %236 = vector.broadcast %235 : vector<32x1xf32> to vector<32x128xf32>
    %237 = arith.mulf %232, %236 : vector<32x128xf32>
    %238 = vector.broadcast %216 : vector<1x128xf32> to vector<32x128xf32>
    %239 = arith.mulf %237, %238 : vector<32x128xf32>
    %240 = vector.broadcast %219 : vector<1x128xf32> to vector<32x128xf32>
    %241 = arith.addf %239, %240 : vector<32x128xf32>
    %242 = arith.truncf %241 : vector<32x128xf32> to vector<32x128xbf16>
    %243 = arith.index_cast %arg1 : i32 to index
    %c0_84 = arith.constant 0 : index
    %c0_85 = arith.constant 0 : index
    %244 = vector.load %arg15[%243, %c0_84, %c0_85] : memref<2x128x256xbf16, #tpu.memory_space<vmem>>, vector<1x128x256xbf16>
    %245 = vector.shape_cast %244 : vector<1x128x256xbf16> to vector<128x256xbf16>
    %cst_86 = arith.constant dense<0.000000e+00> : vector<32x256xf32>
    %246 = tpu.matmul %242, %245, %cst_86 {dimension_numbers = #tpu.dot_dimension_numbers<[1], [0], [0], [1], [0, 0, 1, 1], [], []>} : vector<32x128xbf16>, vector<128x256xbf16>, vector<32x256xf32> -> vector<32x256xf32>
    %247 = arith.index_cast %arg1 : i32 to index
    %c0_87 = arith.constant 0 : index
    %c0_88 = arith.constant 0 : index
    %248 = vector.load %arg16[%247, %c0_87, %c0_88] : memref<2x1x256xf32, #tpu.memory_space<vmem>>, vector<1x1x256xf32>
    %249 = vector.shape_cast %248 : vector<1x1x256xf32> to vector<1x256xf32>
    %250 = vector.broadcast %249 : vector<1x256xf32> to vector<32x256xf32>
    %251 = arith.addf %246, %250 : vector<32x256xf32>
    %cst_89 = arith.constant 0.000000e+00 : f32
    %252 = vector.broadcast %cst_89 : f32 to vector<32x256xf32>
    %253 = arith.maximumf %251, %252 : vector<32x256xf32>
    %254 = arith.truncf %253 : vector<32x256xf32> to vector<32x256xbf16>
    %255 = arith.index_cast %arg1 : i32 to index
    %c0_90 = arith.constant 0 : index
    %c0_91 = arith.constant 0 : index
    %256 = vector.load %arg17[%255, %c0_90, %c0_91] : memref<2x256x128xbf16, #tpu.memory_space<vmem>>, vector<1x256x128xbf16>
    %257 = vector.shape_cast %256 : vector<1x256x128xbf16> to vector<256x128xbf16>
    %cst_92 = arith.constant dense<0.000000e+00> : vector<32x128xf32>
    %258 = tpu.matmul %254, %257, %cst_92 {dimension_numbers = #tpu.dot_dimension_numbers<[1], [0], [0], [1], [0, 0, 1, 1], [], []>} : vector<32x256xbf16>, vector<256x128xbf16>, vector<32x128xf32> -> vector<32x128xf32>
    %259 = arith.index_cast %arg1 : i32 to index
    %c0_93 = arith.constant 0 : index
    %c0_94 = arith.constant 0 : index
    %260 = vector.load %arg18[%259, %c0_93, %c0_94] : memref<2x1x128xf32, #tpu.memory_space<vmem>>, vector<1x1x128xf32>
    %261 = vector.shape_cast %260 : vector<1x1x128xf32> to vector<1x128xf32>
    %262 = vector.broadcast %261 : vector<1x128xf32> to vector<32x128xf32>
    %263 = arith.addf %258, %262 : vector<32x128xf32>
    %264 = arith.addf %241, %263 : vector<32x128xf32>
    %265 = arith.index_cast %arg1 : i32 to index
    %c0_95 = arith.constant 0 : index
    %c0_96 = arith.constant 0 : index
    %266 = vector.load %arg19[%265, %c0_95, %c0_96] : memref<2x1x128xf32, #tpu.memory_space<vmem>>, vector<1x1x128xf32>
    %267 = vector.shape_cast %266 : vector<1x1x128xf32> to vector<1x128xf32>
    %268 = arith.index_cast %arg1 : i32 to index
    %c0_97 = arith.constant 0 : index
    %c0_98 = arith.constant 0 : index
    %269 = vector.load %arg20[%268, %c0_97, %c0_98] : memref<2x1x128xf32, #tpu.memory_space<vmem>>, vector<1x1x128xf32>
    %270 = vector.shape_cast %269 : vector<1x1x128xf32> to vector<1x128xf32>
    %cst_99 = arith.constant dense<0.000000e+00> : vector<32xf32>
    %271 = vector.multi_reduction <add>, %264, %cst_99 [1] : vector<32x128xf32> to vector<32xf32>
    %272 = vector.shape_cast %271 : vector<32xf32> to vector<32x1xf32>
    %cst_100 = arith.constant 1.280000e+02 : f32
    %273 = vector.broadcast %cst_100 : f32 to vector<32x1xf32>
    %274 = arith.divf %272, %273 : vector<32x1xf32>
    %275 = vector.broadcast %274 : vector<32x1xf32> to vector<32x128xf32>
    %276 = arith.subf %264, %275 : vector<32x128xf32>
    %277 = arith.mulf %276, %276 : vector<32x128xf32>
    %cst_101 = arith.constant dense<0.000000e+00> : vector<32xf32>
    %278 = vector.multi_reduction <add>, %277, %cst_101 [1] : vector<32x128xf32> to vector<32xf32>
    %279 = vector.shape_cast %278 : vector<32xf32> to vector<32x1xf32>
    %cst_102 = arith.constant 1.280000e+02 : f32
    %280 = vector.broadcast %cst_102 : f32 to vector<32x1xf32>
    %281 = arith.divf %279, %280 : vector<32x1xf32>
    %282 = vector.broadcast %274 : vector<32x1xf32> to vector<32x128xf32>
    %283 = arith.subf %264, %282 : vector<32x128xf32>
    %cst_103 = arith.constant 9.99999974E-6 : f32
    %284 = vector.broadcast %cst_103 : f32 to vector<32x1xf32>
    %285 = arith.addf %281, %284 : vector<32x1xf32>
    %286 = math.rsqrt %285 : vector<32x1xf32>
    %287 = vector.broadcast %286 : vector<32x1xf32> to vector<32x128xf32>
    %288 = arith.mulf %283, %287 : vector<32x128xf32>
    %289 = vector.broadcast %267 : vector<1x128xf32> to vector<32x128xf32>
    %290 = arith.mulf %288, %289 : vector<32x128xf32>
    %291 = vector.broadcast %270 : vector<1x128xf32> to vector<32x128xf32>
    %292 = arith.addf %290, %291 : vector<32x128xf32>
    %c0_104 = arith.constant 0 : index
    %c0_105 = arith.constant 0 : index
    %293 = vector.load %arg22[%c0_104, %c0_105] : memref<32x128xf32, #tpu.memory_space<vmem>>, vector<32x128xf32>
    tpu.vector_store %arg22[%c0_104, %c0_105], %292 {strides = array<i32>} : memref<32x128xf32, #tpu.memory_space<vmem>>, vector<32x128xf32>,
    %c1_i32 = arith.constant 1 : i32
    %294 = arith.cmpi eq, %arg1, %c1_i32 : i32
    %295 = arith.extui %294 : i1 to i32
    %c0_i32_106 = arith.constant 0 : i32
    %296 = arith.cmpi ne, %295, %c0_i32_106 : i32
    scf.if %296 {
      %297 = vector.shape_cast %292 : vector<32x128xf32> to vector<2x16x128xf32>
      %c0_107 = arith.constant 0 : index
      %c0_108 = arith.constant 0 : index
      %c0_109 = arith.constant 0 : index
      %298 = vector.load %arg21[%c0_107, %c0_108, %c0_109] : memref<2x16x128xf32, #tpu.memory_space<vmem>>, vector<2x16x128xf32>
      tpu.vector_store %arg21[%c0_107, %c0_108, %c0_109], %297 {strides = array<i32>} : memref<2x16x128xf32, #tpu.memory_space<vmem>>, vector<2x16x128xf32>,
    } else {
    }
    return
  }
  func.func @transform_0(%arg0: i32, %arg1: i32) -> (i32, i32, i32) {
    %c0_i32 = arith.constant 0 : i32
    %c0_i32_0 = arith.constant 0 : i32
    %c0_i32_1 = arith.constant 0 : i32
    return %arg0, %c0_i32, %c0_i32_0 : i32, i32, i32
  }
  func.func @transform_1(%arg0: i32, %arg1: i32) -> (i32, i32, i32) {
    %c0_i32 = arith.constant 0 : i32
    %c0_i32_0 = arith.constant 0 : i32
    %c0_i32_1 = arith.constant 0 : i32
    return %arg0, %c0_i32, %c0_i32_0 : i32, i32, i32
  }
  func.func @transform_2(%arg0: i32, %arg1: i32) -> (i32, i32, i32) {
    %c0_i32 = arith.constant 0 : i32
    %c0_i32_0 = arith.constant 0 : i32
    %c0_i32_1 = arith.constant 0 : i32
    return %arg0, %c0_i32, %c0_i32_0 : i32, i32, i32
  }
  func.func @transform_3(%arg0: i32, %arg1: i32) -> (i32, i32, i32) {
    %c0_i32 = arith.constant 0 : i32
    %c0_i32_0 = arith.constant 0 : i32
    %c0_i32_1 = arith.constant 0 : i32
    %c0_i32_2 = arith.constant 0 : i32
    return %c0_i32, %c0_i32_0, %c0_i32_1 : i32, i32, i32
  }
  func.func @transform_4(%arg0: i32, %arg1: i32) -> (i32, i32, i32) {
    %c0_i32 = arith.constant 0 : i32
    %c0_i32_0 = arith.constant 0 : i32
    %c0_i32_1 = arith.constant 0 : i32
    %c0_i32_2 = arith.constant 0 : i32
    return %c0_i32, %c0_i32_0, %c0_i32_1 : i32, i32, i32
  }
  func.func @transform_5(%arg0: i32, %arg1: i32) -> (i32, i32, i32) {
    %c0_i32 = arith.constant 0 : i32
    %c0_i32_0 = arith.constant 0 : i32
    %c0_i32_1 = arith.constant 0 : i32
    %c0_i32_2 = arith.constant 0 : i32
    return %c0_i32, %c0_i32_0, %c0_i32_1 : i32, i32, i32
  }
  func.func @transform_6(%arg0: i32, %arg1: i32) -> (i32, i32, i32) {
    %c0_i32 = arith.constant 0 : i32
    %c0_i32_0 = arith.constant 0 : i32
    %c0_i32_1 = arith.constant 0 : i32
    %c0_i32_2 = arith.constant 0 : i32
    return %c0_i32, %c0_i32_0, %c0_i32_1 : i32, i32, i32
  }
  func.func @transform_7(%arg0: i32, %arg1: i32) -> (i32, i32, i32) {
    %c0_i32 = arith.constant 0 : i32
    %c0_i32_0 = arith.constant 0 : i32
    %c0_i32_1 = arith.constant 0 : i32
    %c0_i32_2 = arith.constant 0 : i32
    return %c0_i32, %c0_i32_0, %c0_i32_1 : i32, i32, i32
  }
  func.func @transform_8(%arg0: i32, %arg1: i32) -> (i32, i32, i32) {
    %c0_i32 = arith.constant 0 : i32
    %c0_i32_0 = arith.constant 0 : i32
    %c0_i32_1 = arith.constant 0 : i32
    %c0_i32_2 = arith.constant 0 : i32
    return %c0_i32, %c0_i32_0, %c0_i32_1 : i32, i32, i32
  }
  func.func @transform_9(%arg0: i32, %arg1: i32) -> (i32, i32, i32) {
    %c0_i32 = arith.constant 0 : i32
    %c0_i32_0 = arith.constant 0 : i32
    %c0_i32_1 = arith.constant 0 : i32
    %c0_i32_2 = arith.constant 0 : i32
    return %c0_i32, %c0_i32_0, %c0_i32_1 : i32, i32, i32
  }
  func.func @transform_10(%arg0: i32, %arg1: i32) -> (i32, i32, i32) {
    %c0_i32 = arith.constant 0 : i32
    %c0_i32_0 = arith.constant 0 : i32
    %c0_i32_1 = arith.constant 0 : i32
    %c0_i32_2 = arith.constant 0 : i32
    return %c0_i32, %c0_i32_0, %c0_i32_1 : i32, i32, i32
  }
  func.func @transform_11(%arg0: i32, %arg1: i32) -> (i32, i32, i32) {
    %c0_i32 = arith.constant 0 : i32
    %c0_i32_0 = arith.constant 0 : i32
    %c0_i32_1 = arith.constant 0 : i32
    %c0_i32_2 = arith.constant 0 : i32
    return %c0_i32, %c0_i32_0, %c0_i32_1 : i32, i32, i32
  }
  func.func @transform_12(%arg0: i32, %arg1: i32) -> (i32, i32, i32) {
    %c0_i32 = arith.constant 0 : i32
    %c0_i32_0 = arith.constant 0 : i32
    %c0_i32_1 = arith.constant 0 : i32
    %c0_i32_2 = arith.constant 0 : i32
    return %c0_i32, %c0_i32_0, %c0_i32_1 : i32, i32, i32
  }
  func.func @transform_13(%arg0: i32, %arg1: i32) -> (i32, i32, i32) {
    %c0_i32 = arith.constant 0 : i32
    %c0_i32_0 = arith.constant 0 : i32
    %c0_i32_1 = arith.constant 0 : i32
    %c0_i32_2 = arith.constant 0 : i32
    return %c0_i32, %c0_i32_0, %c0_i32_1 : i32, i32, i32
  }
  func.func @transform_14(%arg0: i32, %arg1: i32) -> (i32, i32, i32) {
    %c0_i32 = arith.constant 0 : i32
    %c0_i32_0 = arith.constant 0 : i32
    %c0_i32_1 = arith.constant 0 : i32
    %c0_i32_2 = arith.constant 0 : i32
    return %c0_i32, %c0_i32_0, %c0_i32_1 : i32, i32, i32
  }
  func.func @transform_15(%arg0: i32, %arg1: i32) -> (i32, i32, i32) {
    %c0_i32 = arith.constant 0 : i32
    %c0_i32_0 = arith.constant 0 : i32
    %c0_i32_1 = arith.constant 0 : i32
    %c0_i32_2 = arith.constant 0 : i32
    return %c0_i32, %c0_i32_0, %c0_i32_1 : i32, i32, i32
  }
  func.func @transform_16(%arg0: i32, %arg1: i32) -> (i32, i32, i32) {
    %c0_i32 = arith.constant 0 : i32
    %c0_i32_0 = arith.constant 0 : i32
    %c0_i32_1 = arith.constant 0 : i32
    %c0_i32_2 = arith.constant 0 : i32
    return %c0_i32, %c0_i32_0, %c0_i32_1 : i32, i32, i32
  }
  func.func @transform_17(%arg0: i32, %arg1: i32) -> (i32, i32, i32) {
    %c0_i32 = arith.constant 0 : i32
    %c0_i32_0 = arith.constant 0 : i32
    %c0_i32_1 = arith.constant 0 : i32
    %c0_i32_2 = arith.constant 0 : i32
    return %c0_i32, %c0_i32_0, %c0_i32_1 : i32, i32, i32
  }
  func.func @transform_18(%arg0: i32, %arg1: i32) -> (i32, i32, i32) {
    %c0_i32 = arith.constant 0 : i32
    %c0_i32_0 = arith.constant 0 : i32
    %c0_i32_1 = arith.constant 0 : i32
    %c0_i32_2 = arith.constant 0 : i32
    return %c0_i32, %c0_i32_0, %c0_i32_1 : i32, i32, i32
  }
  func.func @transform_19(%arg0: i32, %arg1: i32) -> (i32, i32, i32) {
    %c0_i32 = arith.constant 0 : i32
    %c0_i32_0 = arith.constant 0 : i32
    %c0_i32_1 = arith.constant 0 : i32
    return %arg0, %c0_i32, %c0_i32_0 : i32, i32, i32
  }
}

</mosaic_0001>

<bundles_post_ra>
// kernel: tpu_custom_call.1
= control target key start
LH: loop header
LB: loop body
LE: loop exit
PB: predicated region body
PF: predicated region fallthrough
CT: control target
= control target key end

     0   :  { %s6519_s0 = inlined_call_operand.hbm [shape: bf16[2,16,128], index: 0, kind: input, shape index: {}]   ;;  %s6520_s1 = inlined_call_operand.hbm [shape: bf16[2,128,128], index: 1, kind: input, shape index: {}]   ;;  %s6521_s2 = inlined_call_operand.vmem [shape: f32[2,1,128], index: 2, kind: input, shape index: {}]   ;;  %s6522_s3 = inlined_call_operand.hbm [shape: bf16[2,128,128], index: 3, kind: input, shape index: {}]   ;;  %s6523_s4 = inlined_call_operand.hbm [shape: bf16[2,128,128], index: 4, kind: input, shape index: {}]   ;;  %s6524_s5 = inlined_call_operand.hbm [shape: bf16[2,128,128], index: 5, kind: input, shape index: {}]   ;;  %s6525_s6 = inlined_call_operand.vmem [shape: f32[2,1,128], index: 6, kind: input, shape index: {}]   ;;  %s6526_s7 = inlined_call_operand.vmem [shape: f32[2,1,128], index: 7, kind: input, shape index: {}]   ;;  %s6527_s8 = inlined_call_operand.vmem [shape: f32[2,1,128], index: 8, kind: input, shape index: {}]   ;;  %s6528_s9 = inlined_call_operand.hbm [shape: bf16[2,128,128], index: 9, kind: input, shape index: {}]   ;;  %s6529_s10 = inlined_call_operand.vmem [shape: f32[2,1,128], index: 10, kind: input, shape index: {}]   ;;  %s6530_s11 = inlined_call_operand.vmem [shape: f32[2,1,128], index: 11, kind: input, shape index: {}]   ;;  %s6531_s12 = inlined_call_operand.vmem [shape: f32[2,1,128], index: 12, kind: input, shape index: {}]   ;;  %s6532_s13 = inlined_call_operand.hbm [shape: bf16[2,128,256], index: 13, kind: input, shape index: {}]   ;;  %s6533_s14 = inlined_call_operand.vmem [shape: f32[2,1,256], index: 14, kind: input, shape index: {}]   ;;  %s6534_s15 = inlined_call_operand.hbm [shape: bf16[2,256,128], index: 15, kind: input, shape index: {}]   ;;  %s6535_s16 = inlined_call_operand.vmem [shape: f32[2,1,128], index: 16, kind: input, shape index: {}]   ;;  %s6536_s17 = inlined_call_operand.vmem [shape: f32[2,1,128], index: 17, kind: input, shape index: {}]   ;;  %s6537_s18 = inlined_call_operand.vmem [shape: f32[2,1,128], index: 18, kind: input, shape index: {}]   ;;  %s6538_s19 = inlined_call_operand.hbm [shape: f32[2,16,128], index: 19, kind: output, shape index: {}]  }
   0x1   :  { %6542 = sst [smem:[#allocation27_spill]] %s6519_s0 }
   0x2   :  { %6543 = sst [smem:[#allocation28_spill]] %s6520_s1 }
   0x3   :  { %6544 = sst [smem:[#allocation29_spill]] %s6521_s2 }
   0x4   :  { %6545 = sst [smem:[#allocation30_spill]] %s6522_s3 }
   0x5   :  { %6546 = sst [smem:[#allocation31_spill]] %s6523_s4 }
   0x6   :  { %6547 = sst [smem:[#allocation32_spill]] %s6528_s9 }
   0x7   :  { %6548 = sst [smem:[#allocation33_spill]] %s6538_s19 }
   0x8   :  { %24 = vsyncpa [#allocation5], 0 }
   0x9   :  { %25 = vsyncpa [#allocation8], 0 }
   0xa   :  { %26 = vsyncpa [#allocation11], 0 }
   0xb   :  { %27 = vsyncpa [#allocation14], 0 }
   0xc   :  { %28 = vsyncpa [#allocation17], 0 }
   0xd   :  { %29 = vsyncpa [#allocation6], 0  ;;  %s5384_s0 = smov 0   ;;  %s5386_s30 = smov 0  }
   0xe   :  { %s5388_s20 = smov 0  }
   0xf LB: > { %6549 = sst [smem:[#allocation25_spill]] %s5261_s20  ;;  %s6540_s21 = sadd.s32 4294967295, %s5261_s20   ;;  %s5261_s20 = sphi %s5388_s20, %s35_s20   ;;  %s5257_s30 = sphi %s5386_s30, %s6568_s30   ;;  %s5253_s0 = sphi %s5384_s0, %s6567_s0  }
  0x10   : > { %p3789_p0 = scmp.ge.s32.totalorder %s5261_s20, 1  ;;  %p492_p1 = scmp.lt.s32.totalorder %s5261_s20, 3 }
  0x11   : > { %p5404_p2 = scmp.eq.s32.totalorder %s6540_s21, 0  ;;  %s5263_s2 = smov [#allocation7]  }
  0x12   : > { %p5408_p3 = pnand %p3789_p0, %p492_p1  ;;  %s525_s23 = sshll.u32 %s5263_s2, 4  ;;  %s526_s23 = int_to_ptr.vmem [resolvable:$true] %s525_s23 }
  0x13   : > { %s5264_s24 = smov [#allocation10]   ;;  %s5265_s26 = smov [#allocation13]  }
  0x14   : > { %p4720_p4 = pneg %p5408_p3  ;;  %s559_s25 = sshll.u32 %s5264_s24, 4  ;;  %s5414_s25 = int_to_ptr.vmem [resolvable:$true] %s559_s25 }
  0x15   : > { %s594_s27 = sshll.u32 %s5265_s26, 4  ;;  %s4994_s29 = scalar_lea.vmem %s526_s23, 2048  ;;  %s5422_s27 = int_to_ptr.vmem [resolvable:$true] %s594_s27 }
  0x16   : > { %p5418_p5 = pnand %p5404_p2, %p4720_p4  ;;  %p4995_p7 = scmp.ne.s32.totalorder %s526_s23, %s4994_s29 }
  0x17   : > { %p5002_p10 = scmp.lt.s32.totalorder %s526_s23, %s526_s23  ;;  %p5003_p11 = scmp.lt.s32.totalorder %s4994_s29, %s4994_s29 }
  0x18   : > { %p5426_p6 = pneg %p5418_p5 }
  0x19   : > { %p5004_p12 = por %p5003_p11, %p5002_p10 }
  0x1a   : > { %p4997_p8 = pnand %p4995_p7, %p5426_p6 }
  0x1c   : > { %p4998_p9 = pneg %p4997_p8 }
  0x1e   : > { %p5005_p13 = pnand %p5004_p12, %p4998_p9 }
  0x20   : > { %5008 = shalt.err (!%p5005_p13)
}
  0x21   : > { %s5266_s2 = smov 64   ;;  %s5267_s24 = smov 4  }
  0x22   : > { %s6554_s19 = sld [smem:[#allocation28_spill]]  ;;  %s5020_s20 = scalar_lea.vmem %s5414_s25, 2048 }
  0x23   : > { %p5021_p0 = scmp.ne.s32.totalorder %s5414_s25, %s5020_s20  ;;  %p5028_p7 = scmp.lt.s32.totalorder %s5414_s25, %s5414_s25 }
  0x24   : > { %p5029_p8 = scmp.lt.s32.totalorder %s5020_s20, %s5020_s20 }
  0x25   : > { %p5023_p1 = pnand %p5021_p0, %p5426_p6 }
  0x26   : > { %p5030_p9 = por %p5029_p8, %p5028_p7 }
  0x27   : > { %p5024_p4 = pneg %p5023_p1 }
  0x28   : > { %4726 = dma.hbm_to_vmem [thread:$0]  (!%p5418_p5), %s6554_s19, 2048, %s526_s23, [#allocation8], %s5266_s2, %s5266_s2, %s5267_s24  }
  0x29   : > { %p5031_p10 = pnand %p5030_p9, %p5024_p4 }
  0x2b   : > { %5034 = shalt.err (!%p5031_p10)
}
  0x2c   : > { %s6555_s4 = sld [smem:[#allocation31_spill]]  ;;  %s5046_s19 = scalar_lea.vmem %s5422_s27, 2048 }
  0x2d   : > { %p5047_p11 = scmp.ne.s32.totalorder %s5422_s27, %s5046_s19  ;;  %p5054_p0 = scmp.lt.s32.totalorder %s5422_s27, %s5422_s27 }
  0x2e   : > { %p5055_p1 = scmp.lt.s32.totalorder %s5046_s19, %s5046_s19 }
  0x2f   : > { %p5049_p12 = pnand %p5047_p11, %p5426_p6 }
  0x30   : > { %p5056_p4 = por %p5055_p1, %p5054_p0 }
  0x31   : > { %p5050_p13 = pneg %p5049_p12 }
  0x32   : > { %4732 = dma.hbm_to_vmem [thread:$0]  (!%p5418_p5), %s6555_s4, 2048, %s5414_s25, [#allocation11], %s5266_s2, %s5266_s2, %s5267_s24  }
  0x33   : > { %p5057_p7 = pnand %p5056_p4, %p5050_p13 }
  0x35   : > { %5060 = shalt.err (!%p5057_p7)
}
  0x36   : > { %s6556_s9 = sld [smem:[#allocation32_spill]]  ;;  %s44_s25 = sadd.s32 1, %s5257_s30 }
  0x37   : > { %p45_p8 = scmp.ge.s32.totalorder %s44_s25, 2  ;;  %s5268_s26 = smov [#allocation4]  }
  0x38   : > { %s508_s29 = sshll.u32 %s5268_s26, 4  ;;  %s509_s29 = int_to_ptr.vmem [resolvable:$true] %s508_s29 }
  0x39   : > { %s6570_s25 = smov (%p45_p8, %s44_s25), 0  ;;  %s5072_s21 = scalar_lea.vmem %s509_s29, 256 }
  0x3a   : > { %6557 = sst [smem:[#allocation26_spill]] %s6570_s25  ;;  %p5073_p9 = scmp.ne.s32.totalorder %s509_s29, %s5072_s21 }
  0x3b   : > { %p5080_p12 = scmp.lt.s32.totalorder %s509_s29, %s509_s29  ;;  %p5081_p13 = scmp.lt.s32.totalorder %s5072_s21, %s5072_s21 }
  0x3c   : > { %4738 = dma.hbm_to_vmem [thread:$0]  (!%p5418_p5), %s6556_s9, 2048, %s5422_s27, [#allocation14], %s5266_s2, %s5266_s2, %s5267_s24  }
  0x3d   : > { %p5075_p10 = pnand %p5073_p9, %p5426_p6  ;;  %p5082_p0 = por %p5081_p13, %p5080_p12 }
  0x3f   : > { %p5076_p11 = pneg %p5075_p10 }
  0x41   : > { %p5083_p1 = pnand %p5082_p0, %p5076_p11 }
  0x43   : > { %5086 = shalt.err (!%p5083_p1)
}
  0x44   : > { %s6558_s20 = sld [smem:[#allocation27_spill]]  ;;  %s5269_s23 = smov [#allocation9]  }
  0x45   : > { %s546_s26 = sshll.u32 %s5269_s23, 4  ;;  %s5270_s4 = smov [#allocation12]   ;;  %s547_s26 = int_to_ptr.vmem [resolvable:$true] %s546_s26 }
  0x46   : > { %s572_s9 = sshll.u32 %s5270_s4, 4  ;;  %s5098_s25 = scalar_lea.vmem %s547_s26, 2048  ;;  %s573_s9 = int_to_ptr.vmem [resolvable:$true] %s572_s9 }
  0x47   : > { %p5099_p4 = scmp.ne.s32.totalorder %s547_s26, %s5098_s25  ;;  %p5106_p9 = scmp.lt.s32.totalorder %s547_s26, %s547_s26 }
  0x48   : > { %p5107_p10 = scmp.lt.s32.totalorder %s5098_s25, %s5098_s25 }
  0x49   : > { %p5101_p7 = pnand %p5099_p4, %p5426_p6 }
  0x4a   : > { %4723 = dma.hbm_to_vmem [thread:$0]  (!%p5418_p5), %s6558_s20, 256, %s509_s29, [#allocation5], %s5266_s2, %s5266_s2, %s5267_s24  }
  0x4b   : > { %p5102_p8 = pneg %p5101_p7  ;;  %p5108_p11 = por %p5107_p10, %p5106_p9 }
  0x4d   : > { %p5109_p12 = pnand %p5108_p11, %p5102_p8 }
  0x4f   : > { %5112 = shalt.err (!%p5109_p12)
}
  0x50   : > { %s6559_s27 = sld [smem:[#allocation30_spill]]  ;;  %s5124_s4 = scalar_lea.vmem %s573_s9, 2048 }
  0x51   : > { %p5125_p13 = scmp.ne.s32.totalorder %s573_s9, %s5124_s4  ;;  %p5132_p4 = scmp.lt.s32.totalorder %s573_s9, %s573_s9 }
  0x52   : > { %p5133_p7 = scmp.lt.s32.totalorder %s5124_s4, %s5124_s4 }
  0x53   : > { %p5127_p0 = pnand %p5125_p13, %p5426_p6 }
  0x54   : > { %p5134_p8 = por %p5133_p7, %p5132_p4 }
  0x55   : > { %p5128_p1 = pneg %p5127_p0 }
  0x56   : > { %4729 = dma.hbm_to_vmem [thread:$0]  (!%p5418_p5), %s6559_s27, 2048, %s547_s26, [#allocation8], %s5266_s2, %s5266_s2, %s5267_s24  }
  0x57   : > { %p5135_p9 = pnand %p5134_p8, %p5128_p1 }
  0x59   : > { %5138 = shalt.err (!%p5135_p9)
}
  0x5a   : > { %4735 = dma.hbm_to_vmem [thread:$0]  (!%p5418_p5), %s6524_s5, 2048, %s573_s9, [#allocation11], %s5266_s2, %s5266_s2, %s5267_s24  }
  0x5b   : > { %s5271_s20 = smov [#allocation15]  }
  0x5c   : > { %s616_s23 = sshll.u32 %s5271_s20, 4  ;;  %s617_s23 = int_to_ptr.vmem [resolvable:$true] %s616_s23 }
  0x5d   : > { %s5150_s26 = scalar_lea.vmem %s617_s23, 4096  ;;  %p5158_p13 = scmp.lt.s32.totalorder %s617_s23, %s617_s23 }
  0x5e   : > { %p5151_p10 = scmp.ne.s32.totalorder %s617_s23, %s5150_s26  ;;  %p5159_p0 = scmp.lt.s32.totalorder %s5150_s26, %s5150_s26 }
  0x60   : > { %p5153_p11 = pnand %p5151_p10, %p5426_p6  ;;  %p5160_p1 = por %p5159_p0, %p5158_p13 }
  0x62   : > { %p5154_p12 = pneg %p5153_p11 }
  0x64   : > { %p5161_p4 = pnand %p5160_p1, %p5154_p12 }
  0x66   : > { %5164 = shalt.err (!%p5161_p4)
}
  0x67   : > { %s5272_s29 = smov 128   ;;  %s5273_s21 = smov 8  }
  0x68   : > { %4741 = dma.hbm_to_vmem [thread:$0]  (!%p5418_p5), %s6532_s13, 4096, %s617_s23, [#allocation14], %s5272_s29, %s5272_s29, %s5273_s21  }
  0x69   : > { %s5274_s4 = smov [#allocation16]  }
  0x6a   : > { %s632_s25 = sshll.u32 %s5274_s4, 4  ;;  %s633_s25 = int_to_ptr.vmem [resolvable:$true] %s632_s25 }
  0x6b   : > { %s5176_s19 = scalar_lea.vmem %s633_s25, 4096  ;;  %p5184_p10 = scmp.lt.s32.totalorder %s633_s25, %s633_s25 }
  0x6c   : > { %p5177_p7 = scmp.ne.s32.totalorder %s633_s25, %s5176_s19  ;;  %p5185_p11 = scmp.lt.s32.totalorder %s5176_s19, %s5176_s19 }
  0x6e   : > { %p5179_p8 = pnand %p5177_p7, %p5426_p6  ;;  %p5186_p12 = por %p5185_p11, %p5184_p10 }
  0x70   : > { %p5180_p9 = pneg %p5179_p8 }
  0x72   : > { %p5187_p13 = pnand %p5186_p12, %p5180_p9 }
  0x74   : > { %5190 = shalt.err (!%p5187_p13)
}
  0x75   : > { %4744 = dma.hbm_to_vmem [thread:$0]  (!%p5418_p5), %s6534_s15, 4096, %s633_s25, [#allocation17], %s5266_s2, %s5266_s2, %s5267_s24  }
  0x76   : > { %657 = sbr.rel (%p5408_p3) target bundleno = 6131 (0x17f3), region = 96 }
  0x7b   : > { %5228 = dma.done.wait (%p5404_p2), [#allocation5], 256  }
  0x7c   : > { %5230 = vsyncadd (%p5404_p2), [#allocation5], 4294967040 }
  0x7d   : > { %5232 = dma.done.wait (%p5404_p2), [#allocation8], 4096  }
  0x7e   : > { %5234 = vsyncadd (%p5404_p2), [#allocation8], 4294963200 }
  0x7f   : > { %5236 = dma.done.wait (%p5404_p2), [#allocation11], 4096  }
  0x80   : > { %5238 = vsyncadd (%p5404_p2), [#allocation11], 4294963200 }
  0x81   : > { %5240 = dma.done.wait (%p5404_p2), [#allocation14], 6144  }
  0x82   : > { %5242 = vsyncadd (%p5404_p2), [#allocation14], 4294961152 }
  0x83   : > { %5244 = dma.done.wait (%p5404_p2), [#allocation17], 4096  }
  0x84   : > { %5246 = vsyncadd (%p5404_p2), [#allocation17], 4294963200  ;;  %p3808_p3 = scmp.ne.s32.totalorder %s5253_s0, 0 }
  0x86   : > { %747 = sbr.rel (%p3808_p3) target bundleno = 144 (0x90), region = 132 }
  0x8b   : > { %v3964_v0 = vld [vmem:[#allocation4] sm:$0xff]   ;;  %v3971_v1 = vld [vmem:[#allocation4 + $0x8] sm:$0xff]  }
  0x8c   : > { %v3965_v2 = vunpack.c.l.bf16 %v3964_v0  ;;  %v3966_v3 = vunpack.c.h.bf16 %v3964_v0  ;;  %v3969_v4 = vunpack.c.l.bf16 %v3971_v1  ;;  %v3970_v5 = vunpack.c.h.bf16 %v3971_v1 }
  0x8e   : > { %756 = vst [vmem:[#allocation2 + $0x10] sm:$0xff] %v3965_v2  ;;  %757 = vst [vmem:[#allocation2] sm:$0xff] %v3966_v3 }
  0x8f   : > { %758 = vst [vmem:[#allocation2 + $0x18] sm:$0xff] %v3969_v4  ;;  %759 = vst [vmem:[#allocation2 + $0x8] sm:$0xff] %v3970_v5 }
  0x90 PF: > { %s5544_s22 = sshll.u32 %s5253_s0, 6  ;;  %v5546_v6 = vld [vmem:[#allocation7] sm:$0xff]   ;;  %v5568_v23 = vld [vmem:[#allocation7 + $0x8] sm:$0xff]   ;;  %v5571_v25 = vld [vmem:[#allocation7 + $0x10] sm:$0xff]   ;;  %v5275_v36 = vmov 0.0   ;;  %vm5276_vm0 = vmmov 0   ;;  %s817_s24 = scalar_lea.vmem %s6525_s6, %s5253_s0 }
  0x91   : > { %s5549_s1 = scalar_lea.vmem [#allocation10], %s5544_s22  ;;  %4248 = vmatprep.mubr.bf16.mxu1 %v5546_v6  ;;  %s5558_s3 = scalar_lea.vmem [#allocation9], %s5544_s22  ;;  %v5576_v27 = vld [vmem:[#allocation7 + $0x18] sm:$0xff]   ;;  %v5579_v29 = vld [vmem:[#allocation7 + $0x20] sm:$0xff]   ;;  %v5583_v33 = vld [vmem:[#allocation7 + $0x28] sm:$0xff]   ;;  %vm1529_vm1 = vcmask 261120  }
  0x92   : > { %v4808_v7 = vld [vmem:[%s5549_s1 + $0x38] sm:$0xff]   ;;  %v4809_v8 = vld [vmem:[%s5549_s1 + $0x30] sm:$0xff]   ;;  %v4810_v9 = vld [vmem:[%s5549_s1 + $0x28] sm:$0xff]   ;;  %s5637_s21 = scalar_lea.vmem %s6526_s7, %s5253_s0  ;;  %s5277_s27 = smov 96   ;;  %vm1666_vm2 = vcmask 257024   ;;  %vm1868_vm3 = vcmask 519424  }
  0x93   : > { %4232 = vmatprep.subr.bf16.mxu1 %v4808_v7  ;;  %v4811_v10 = vld [vmem:[%s5549_s1 + $0x20] sm:$0xff]   ;;  %v4812_v11 = vld [vmem:[%s5549_s1 + $0x18] sm:$0xff]   ;;  %v4825_v13 = vld [vmem:[%s5558_s3 + $0x30] sm:$0xff]   ;;  %s5654_s9 = scalar_lea.vmem [#allocation12], %s5544_s22  ;;  %s1271_s19 = scalar_lea.vmem %s6527_s8, %s5253_s0  ;;  %vm2053_vm4 = vcmask 781824   ;;  %vm2238_vm5 = vcmask 1044224  }
  0x94   : > { %4233 = vmatpush3.bf16.msra.mxu1 %v4808_v7  ;;  %v4824_v12 = vld [vmem:[%s5558_s3 + $0x38] sm:$0xff]   ;;  %v4813_v14 = vld [vmem:[%s5549_s1 + $0x10] sm:$0xff]   ;;  %v4826_v15 = vld [vmem:[%s5558_s3 + $0x28] sm:$0xff]   ;;  %s5279_s28 = smov 32   ;;  %s2961_s26 = scalar_lea.vmem [#allocation13], %s5544_s22 }
  0x95   : > { %4234 = vmatprep.subr.bf16.mxu1 %v4809_v8  ;;  %4212 = vmatprep.subr.bf16.mxu0 %v4824_v12  ;;  %v4814_v16 = vld [vmem:[%s5549_s1 + $0x8] sm:$0xff]   ;;  %v4827_v17 = vld [vmem:[%s5558_s3 + $0x20] sm:$0xff]   ;;  %v760_v18 = vld [vmem:[#allocation2 + $0x10] sm:$0xff]  ;;  %s3099_s20 = scalar_lea.vmem %s6530_s11, %s5253_s0  ;;  %s3899_s2 = sshll.u32 %s5253_s0, 1 }
  0x96   : > { %4213 = vmatpush3.bf16.msra.mxu0 %v4824_v12  ;;  %v761_v19 = vld [vmem:[#allocation2] sm:$0xff]  ;;  %v4828_v22 = vld [vmem:[%s5558_s3 + $0x18] sm:$0xff]   ;;  %v4829_v24 = vld [vmem:[%s5558_s3 + $0x10] sm:$0xff]   ;;  %s3190_s22 = scalar_lea.vmem %s6533_s14, %s3899_s2  ;;  %s3539_s25 = scalar_lea.vmem %s6536_s17, %s5253_s0 }
  0x97   : > { %4214 = vmatprep.subr.bf16.mxu0 %v4825_v13  ;;  %v4815_v20 = vld [vmem:[%s5549_s1] sm:$0xff]   ;;  %v764_v21 = vpack.c.bf16 %v761_v19, %v760_v18  ;;  %v4830_v26 = vld [vmem:[%s5558_s3 + $0x8] sm:$0xff]   ;;  %v762_v30 = vld [vmem:[#allocation2 + $0x18] sm:$0xff]  ;;  %s6560_s1 = sld [smem:[#allocation29_spill]]  ;;  %s3541_s23 = scalar_lea.vmem %s6537_s18, %s5253_s0 }
  0x98   : > { %4235 = vmatpush3.bf16.msra.mxu1 %v4809_v8  ;;  %v4831_v28 = vld [vmem:[%s5558_s3] sm:$0xff]   ;;  %v763_v31 = vld [vmem:[#allocation2 + $0x8] sm:$0xff]  ;;  %v5585_v34 = vld [vmem:[#allocation7 + $0x30] sm:$0xff]   ;;  %s5278_s3 = smov 64   ;;  %p3936_p2 = scmp.ne.s32.totalorder %s5253_s0, 1 }
  0x99   : > { %4236 = vmatprep.subr.bf16.mxu1 %v4810_v9  ;;  %4228 = vmatprep.mubr.bf16.mxu0 %v764_v21  ;;  %v765_v32 = vpack.c.bf16 %v763_v31, %v762_v30  ;;  %v5590_v35 = vld [vmem:[#allocation7 + $0x38] sm:$0xff]   ;;  %v5594_v37 = vld [vmem:[#allocation7 + $0x40] sm:$0xff]   ;;  %v5596_v38 = vld [vmem:[#allocation7 + $0x48] sm:$0xff]  }
  0x9a   : > { %4215 = vmatpush3.bf16.msra.mxu0 %v4825_v13  ;;  %v5600_v39 = vld [vmem:[#allocation7 + $0x50] sm:$0xff]   ;;  %v5602_v40 = vld [vmem:[#allocation7 + $0x58] sm:$0xff]   ;;  %v5606_v41 = vld [vmem:[#allocation7 + $0x60] sm:$0xff]  }
  0x9b   : > { %4216 = vmatprep.subr.bf16.mxu0 %v4826_v15  ;;  %v5608_v42 = vld [vmem:[#allocation7 + $0x68] sm:$0xff]   ;;  %v5612_v43 = vld [vmem:[#allocation7 + $0x70] sm:$0xff]   ;;  %v5614_v44 = vld [vmem:[#allocation7 + $0x78] sm:$0xff]  }
  0x9c   : > { %4237 = vmatpush3.bf16.msra.mxu1 %v4810_v9  ;;  %v5628_v52 = vld [vmem:[%s817_s24] ss:$0 sm:$0xff]  ;;  %v4840_v7 = vld [vmem:[%s5654_s9 + $0x38] sm:$0xff]   ;;  %v4842_v21 = vld [vmem:[%s5654_s9 + $0x28] sm:$0xff]  }
  0x9d   : > { %4238 = vmatprep.subr.bf16.mxu1 %v4811_v10  ;;  %v5641_v61 = vld [vmem:[%s5637_s21] ss:$0 sm:$0xff] }
  0x9e   : > { %4217 = vmatpush3.bf16.msra.mxu0 %v4826_v15  ;;  %v4841_v15 = vld [vmem:[%s5654_s9 + $0x30] sm:$0xff]  }
  0x9f   : > { %4218 = vmatprep.subr.bf16.mxu0 %v4827_v17 }
  0xa0   : > { %4239 = vmatpush3.bf16.msra.mxu1 %v4811_v10 }
  0xa1   : > { %4240 = vmatprep.subr.bf16.mxu1 %v4812_v11 }
  0xa2   : > { %4219 = vmatpush3.bf16.msra.mxu0 %v4827_v17 }
  0xa3   : > { %4220 = vmatprep.subr.bf16.mxu0 %v4828_v22 }
  0xa4   : > { %4241 = vmatpush3.bf16.msra.mxu1 %v4812_v11 }
  0xa5   : > { %4242 = vmatprep.subr.bf16.mxu1 %v4813_v14 }
  0xa6   : > { %4221 = vmatpush3.bf16.msra.mxu0 %v4828_v22 }
  0xa7   : > { %4222 = vmatprep.subr.bf16.mxu0 %v4829_v24 }
  0xa8   : > { %4243 = vmatpush3.bf16.msra.mxu1 %v4813_v14 }
  0xa9   : > { %4244 = vmatprep.subr.bf16.mxu1 %v4814_v16 }
  0xaa   : > { %4223 = vmatpush3.bf16.msra.mxu0 %v4829_v24 }
  0xab   : > { %4224 = vmatprep.subr.bf16.mxu0 %v4830_v26 }
  0xac   : > { %4245 = vmatpush3.bf16.msra.mxu1 %v4814_v16 }
  0xad   : > { %4246 = vmatprep.subr.bf16.mxu1 %v4815_v20 }
  0xae   : > { %4225 = vmatpush3.bf16.msra.mxu0 %v4830_v26 }
  0xaf   : > { %4226 = vmatprep.subr.bf16.mxu0 %v4831_v28 }
  0xb0   : > { %4247 = vmatpush3.bf16.msra.mxu1 %v4815_v20 }
  0xb1   : > { %4328 = vmatprep.subr.bf16.mxu1 %v5275_v36 }
  0xb2   : > { %4227 = vmatpush3.bf16.msra.mxu0 %v4831_v28 }
  0xb3   : > { %4249 = vmatmul.mubr.bf16.vlgmr.msra.gmra.mxu1 %v5568_v23  ;;  %4280 = vmatprep.subr.bf16.mxu0 %v4840_v7 }
  0xb4   : > { %4252 = vmatprep.mubr.bf16.mxu1 %v5571_v25 }
  0xb5   : > { %4229 = vmatmul.mubr.bf16.vlgmr.msra.gmra.mxu0 %v765_v32 }
  0xb6   : > { %4296 = vmatprep.mubr.bf16.mxu0 %v5546_v6  ;;  %4281 = vmatpush3.bf16.msra.mxu0 %v4840_v7 }
  0xb7   : > { %4282 = vmatprep.subr.bf16.mxu0 %v4841_v15 }
  0xba   : > { %4283 = vmatpush3.bf16.msra.mxu0 %v4841_v15 }
  0xbb   : > { %4253 = vmatmul.mubr.bf16.gmra.mxu1 %v5576_v27  ;;  %4284 = vmatprep.subr.bf16.mxu0 %v4842_v21 }
  0xbc   : > { %4256 = vmatprep.mubr.bf16.mxu1 %v5579_v29 }
  0xbe   : > { %4285 = vmatpush3.bf16.msra.mxu0 %v4842_v21 }
  0xc3   : > { %4257 = vmatmul.mubr.bf16.gmra.mxu1 %v5583_v33 }
  0xc4   : > { %4260 = vmatprep.mubr.bf16.mxu1 %v5585_v34 }
  0xcb   : > { %4261 = vmatmul.mubr.bf16.gmra.mxu1 %v5590_v35 }
  0xcc   : > { %4264 = vmatprep.mubr.bf16.mxu1 %v5594_v37 }
  0xd3   : > { %4265 = vmatmul.mubr.bf16.gmra.mxu1 %v5596_v38 }
  0xd4   : > { %4268 = vmatprep.mubr.bf16.mxu1 %v5600_v39 }
  0xdb   : > { %4269 = vmatmul.mubr.bf16.gmra.mxu1 %v5602_v40 }
  0xdc   : > { %4272 = vmatprep.mubr.bf16.mxu1 %v5606_v41 }
  0xe3   : > { %4273 = vmatmul.mubr.bf16.gmra.mxu1 %v5608_v42 }
  0xe4   : > { %4276 = vmatprep.mubr.bf16.mxu1 %v5612_v43 }
  0xeb   : > { %4277 = vmatmul.mubr.bf16.gmra.mxu1 %v5614_v44 }
  0xec   : > { %4344 = vmatprep.mubr.msk.bf16.mxu1 %vm5276_vm0, %v5275_v36 }
 0x173   : > { %v5620_v45 = vpop.f32.mrf.mxu1 }
 0x175   : > { %v1126_v46 = vpop.f32.mrf.mxu1  ;;  %v4230_v54 = vpop.f32.mrf.mxu0 }
 0x176   : > { %v916_v55 = vadd.f32 %v4230_v54, %v5628_v52  ;;  %v1127_v22 = vadd.f32 %v5641_v61, %v1126_v46  ;;  %v4843_v46 = vld [vmem:[%s5654_s9 + $0x20] sm:$0xff]  }
 0x177   : > { %v5622_v47 = vpop.f32.mrf.mxu1  ;;  %v5631_v57 = vpop.f32.mrf.mxu0  ;;  %4286 = vmatprep.subr.bf16.mxu0 %v4843_v46 }
 0x178   : > { %4287 = vmatpush3.bf16.msra.mxu0 %v4843_v46 }
 0x179   : > { %v1129_v48 = vpop.f32.mrf.mxu1  ;;  %v4231_v59 = vpop.f32.mrf.mxu0 }
 0x17a   : > { %v919_v60 = vadd.f32 %v4231_v59, %v5628_v52  ;;  %v1130_v17 = vadd.f32 %v5641_v61, %v1129_v48  ;;  %v4844_v48 = vld [vmem:[%s5654_s9 + $0x18] sm:$0xff]   ;;  %v4846_v59 = vld [vmem:[%s5654_s9 + $0x8] sm:$0xff]  }
 0x17b   : > { %v4254_v49 = vpop.f32.mrf.mxu1  ;;  %4288 = vmatprep.subr.bf16.mxu0 %v4844_v48 }
 0x17c   : > { %v5645_v1 = vpack.c.bf16 %v919_v60, %v916_v55  ;;  %v5681_v28 = vpack.c.bf16 %v1130_v17, %v1127_v22  ;;  %v1151_v32 = vadd.f32 %v4254_v49, %v5641_v61  ;;  %v1135_v49 = vadd.f32 %v5620_v45, %v5641_v61  ;;  %4289 = vmatpush3.bf16.msra.mxu0 %v4844_v48 }
 0x17d   : > { %v1142_v50 = vpop.f32.mrf.mxu1  ;;  %v908_v55 = vadd.f32 %v5628_v52, %v5631_v57  ;;  %v4847_v57 = vld [vmem:[%s5654_s9] sm:$0xff]  }
 0x17e   : > { %v1143_v12 = vadd.f32 %v5641_v61, %v1142_v50  ;;  %v910_v50 = vpop.f32.mrf.mxu0 }
 0x17f   : > { %v4255_v51 = vpop.f32.mrf.mxu1 }
 0x180   : > { %v1154_v30 = vadd.f32 %v4255_v51, %v5641_v61 }
 0x181   : > { %v1145_v53 = vpop.f32.mrf.mxu1 }
 0x182   : > { %v1146_v9 = vadd.f32 %v5641_v61, %v1145_v53  ;;  %v1138_v53 = vadd.f32 %v5622_v47, %v5641_v61  ;;  %v5696_v51 = vpack.c.bf16 %v1154_v30, %v1151_v32  ;;  %v911_v47 = vadd.f32 %v5628_v52, %v910_v50 }
 0x183   : > { %v4258_v56 = vpop.f32.mrf.mxu1 }
 0x184   : > { %v1167_v63 = vadd.f32 %v4258_v56, %v5641_v61  ;;  %v5667_v18 = vpack.c.bf16 %v1146_v9, %v1143_v12  ;;  %v5707_v56 = vpack.c.bf16 %v1138_v53, %v1135_v49  ;;  %v5712_v45 = vpack.c.bf16 %v911_v47, %v908_v55 }
 0x185   : > { %v1158_v58 = vpop.f32.mrf.mxu1 }
 0x186   : > { %v1159_v6 = vadd.f32 %v5641_v61, %v1158_v58  ;;  %v4845_v58 = vld [vmem:[%s5654_s9 + $0x10] sm:$0xff]  }
 0x187   : > { %v4259_v62 = vpop.f32.mrf.mxu1  ;;  %4290 = vmatprep.subr.bf16.mxu0 %v4845_v58 }
 0x188   : > { %v1170_v0 = vadd.f32 %v4259_v62, %v5641_v61  ;;  %4291 = vmatpush3.bf16.msra.mxu0 %v4845_v58  ;;  %v1543_v62 = vsel %vm1529_vm1, %v5696_v51, 0 }
 0x189   : > { %v1161_v2 = vpop.f32.mrf.mxu1  ;;  %4292 = vmatprep.subr.bf16.mxu0 %v4846_v59 }
 0x18a   : > { %v5647_v3 = vpack.c.bf16 %v1170_v0, %v1167_v63  ;;  %v1162_v4 = vadd.f32 %v5641_v61, %v1161_v2  ;;  %v1540_v63 = vsel %vm1529_vm1, %v5667_v18, 0 }
 0x18b   : > { %v4262_v5 = vpop.f32.mrf.mxu1 }
 0x18c   : > { %1690 = vrot.lane.b32.xlu1 %v5647_v3, %s5277_s27  ;;  %v5658_v10 = vpack.c.bf16 %v1162_v4, %v1159_v6  ;;  %v1183_v13 = vadd.f32 %v4262_v5, %v5641_v61  ;;  %v1549_v52 = vsel %vm1529_vm1, %v5647_v3, 0  ;;  %4293 = vmatpush3.bf16.msra.mxu0 %v4846_v59 }
 0x18d   : > { %v1174_v8 = vpop.f32.mrf.mxu1  ;;  %4294 = vmatprep.subr.bf16.mxu0 %v4847_v57 }
 0x18e   : > { %v1175_v24 = vadd.f32 %v5641_v61, %v1174_v8  ;;  %v1546_v60 = vsel %vm1529_vm1, %v5658_v10, 0 }
 0x18f   : > { %v4263_v11 = vpop.f32.mrf.mxu1 }
 0x190   : > { %v1186_v14 = vadd.f32 %v4263_v11, %v5641_v61  ;;  %1688 = vrot.lane.b32.xlu1 %v5658_v10, %s5277_s27  ;;  %4295 = vmatpush3.bf16.msra.mxu0 %v4847_v57 }
 0x191   : > { %v1177_v16 = vpop.f32.mrf.mxu1  ;;  %4348 = vmatprep.subr.bf16.mxu0 %v5275_v36 }
 0x192   : > { %v5669_v19 = vpack.c.bf16 %v1186_v14, %v1183_v13  ;;  %v1178_v20 = vadd.f32 %v5641_v61, %v1177_v16 }
 0x193   : > { %4297 = vmatmul.mubr.bf16.vlgmr.msra.gmra.mxu0 %v5568_v23  ;;  %v1537_v23 = vsel %vm1529_vm1, %v5707_v56, 0 }
 0x194   : > { %1694 = vrot.lane.b32.xlu0 %v5669_v19, %s5277_s27  ;;  %1684 = vrot.lane.b32.xlu1 %v5667_v18, %s5277_s27  ;;  %v1555_v26 = vsel %vm1529_vm1, %v5669_v19, 0  ;;  %v5684_v31 = vpack.c.bf16 %v1178_v20, %v1175_v24 }
 0x195   : > { %4329 = vmatpush3.bf16.xpose.msra.mxu1 %v1555_v26  ;;  %4300 = vmatprep.mubr.bf16.mxu0 %v5571_v25  ;;  %v1534_v25 = vsel %vm1529_vm1, %v5681_v28, 0 }
 0x196   : > { %4330 = vmatprep.subr.bf16.mxu1 %v5275_v36  ;;  %v1552_v54 = vsel %vm1529_vm1, %v5684_v31, 0 }
 0x198   : > { %1692 = vrot.lane.b32.xlu0 %v5684_v31, %s5277_s27  ;;  %1680 = vrot.lane.b32.xlu1 %v5681_v28, %s5277_s27 }
 0x19b   : > { %4301 = vmatmul.mubr.bf16.gmra.mxu0 %v5576_v27  ;;  %v4266_v27 = vpop.f32.mrf.mxu1 }
 0x19c   : > { %1686 = vrot.lane.b32.xlu0 %v5696_v51, %s5277_s27  ;;  %4304 = vmatprep.mubr.bf16.mxu0 %v5579_v29 }
 0x19d   : > { %4331 = vmatpush3.bf16.xpose.msra.mxu1 %v1552_v54  ;;  %v1190_v29 = vpop.f32.mrf.mxu1 }
 0x19e   : > { %4332 = vmatprep.subr.bf16.mxu1 %v5275_v36 }
 0x1a0   : > { %1682 = vrot.lane.b32.xlu0 %v5707_v56, %s5277_s27 }
 0x1a3   : > { %4305 = vmatmul.mubr.bf16.gmra.mxu0 %v5583_v33  ;;  %v1199_v33 = vadd.f32 %v4266_v27, %v5641_v61 }
 0x1a4   : > { %1670 = vrot.lane.b32.xlu0 %v5712_v45, %s5277_s27  ;;  %4308 = vmatprep.mubr.bf16.mxu0 %v5585_v34  ;;  %v4267_v34 = vpop.f32.mrf.mxu1 }
 0x1a5   : > { %4333 = vmatpush3.bf16.xpose.msra.mxu1 %v1549_v52 }
 0x1a6   : > { %4334 = vmatprep.subr.bf16.mxu1 %v5275_v36 }
 0x1ab   : > { %4309 = vmatmul.mubr.bf16.gmra.mxu0 %v5590_v35  ;;  %v1191_v35 = vadd.f32 %v5641_v61, %v1190_v29 }
 0x1ac   : > { %4312 = vmatprep.mubr.bf16.mxu0 %v5594_v37  ;;  %v1202_v37 = vadd.f32 %v4267_v34, %v5641_v61 }
 0x1ad   : > { %4335 = vmatpush3.bf16.xpose.msra.mxu1 %v1546_v60 }
 0x1ae   : > { %4336 = vmatprep.subr.bf16.mxu1 %v5275_v36 }
 0x1b3   : > { %4313 = vmatmul.mubr.bf16.gmra.mxu0 %v5596_v38  ;;  %v1193_v38 = vpop.f32.mrf.mxu1 }
 0x1b4   : > { %4316 = vmatprep.mubr.bf16.mxu0 %v5600_v39  ;;  %v5762_v39 = vpack.c.bf16 %v1202_v37, %v1199_v33 }
 0x1b5   : > { %4337 = vmatpush3.bf16.xpose.msra.mxu1 %v1543_v62 }
 0x1b6   : > { %4338 = vmatprep.subr.bf16.mxu1 %v5275_v36 }
 0x1bb   : > { %4317 = vmatmul.mubr.bf16.gmra.mxu0 %v5602_v40  ;;  %v1194_v40 = vadd.f32 %v5641_v61, %v1193_v38 }
 0x1bc   : > { %4320 = vmatprep.mubr.bf16.mxu0 %v5606_v41  ;;  %v4270_v41 = vpop.f32.mrf.mxu1 }
 0x1bd   : > { %4339 = vmatpush3.bf16.xpose.msra.mxu1 %v1540_v63 }
 0x1be   : > { %4340 = vmatprep.subr.bf16.mxu1 %v5275_v36 }
 0x1c3   : > { %4321 = vmatmul.mubr.bf16.gmra.mxu0 %v5608_v42  ;;  %v5765_v42 = vpack.c.bf16 %v1194_v40, %v1191_v35 }
 0x1c4   : > { %4324 = vmatprep.mubr.bf16.mxu0 %v5612_v43  ;;  %v1206_v43 = vpop.f32.mrf.mxu1 }
 0x1c5   : > { %4341 = vmatpush3.bf16.xpose.msra.mxu1 %v1537_v23  ;;  %v1207_v2 = vadd.f32 %v5641_v61, %v1206_v43 }
 0x1c6   : > { %4342 = vmatprep.subr.bf16.mxu1 %v5275_v36  ;;  %v4271_v0 = vpop.f32.mrf.mxu1 }
 0x1c7   : > { %v1218_v4 = vadd.f32 %v4271_v0, %v5641_v61 }
 0x1c8   : > { %v1209_v5 = vpop.f32.mrf.mxu1 }
 0x1c9   : > { %v1210_v7 = vadd.f32 %v5641_v61, %v1209_v5 }
 0x1ca   : > { %v4274_v8 = vpop.f32.mrf.mxu1 }
 0x1cb   : > { %4325 = vmatmul.mubr.bf16.gmra.mxu0 %v5614_v44  ;;  %v1215_v44 = vadd.f32 %v4270_v41, %v5641_v61  ;;  %v5773_v9 = vpack.c.bf16 %v1210_v7, %v1207_v2  ;;  %v1231_v12 = vadd.f32 %v4274_v8, %v5641_v61  ;;  %v5812_v2 = vld [vmem:[%s1271_s19] ss:$0 sm:$0xff] }
 0x1cc   : > { %4364 = vmatprep.mubr.msk.bf16.mxu0 %vm5276_vm0, %v5275_v36  ;;  %v1222_v11 = vpop.f32.mrf.mxu1 }
 0x1cd   : > { %4343 = vmatpush3.bf16.xpose.msra.mxu1 %v1534_v25  ;;  %v5770_v6 = vpack.c.bf16 %v1218_v4, %v1215_v44  ;;  %v1223_v16 = vadd.f32 %v5641_v61, %v1222_v11 }
 0x1ce   : > { %4368 = vmatprep.subr.bf16.mxu1 %v5275_v36  ;;  %v4275_v13 = vpop.f32.mrf.mxu1 }
 0x1cf   : > { %v1234_v14 = vadd.f32 %v4275_v13, %v5641_v61 }
 0x1d0   : > { %v1225_v21 = vpop.f32.mrf.mxu1 }
 0x1d1   : > { %v5779_v20 = vpack.c.bf16 %v1234_v14, %v1231_v12  ;;  %v1226_v22 = vadd.f32 %v5641_v61, %v1225_v21 }
 0x1d2   : > { %v4278_v24 = vpop.f32.mrf.mxu1 }
 0x1d3   : > { %v5783_v26 = vpack.c.bf16 %v1226_v22, %v1223_v16  ;;  %v1247_v46 = vadd.f32 %v4278_v24, %v5641_v61  ;;  %v5831_v24 = vld [vmem:[%s6560_s1] ss:$0 sm:$0xff] }
 0x1d4   : > { %4345 = vmatmul.mubr.msk.bf16.vlgmr.msra.gmra.mxu1 %vm1529_vm1, %v5712_v45  ;;  %v5785_v30 = vpop.f32.mrf.mxu1 }
 0x1d5   : > { %4384 = vmatprep.mubr.msk.bf16.mxu1 %vm5276_vm0, %v5275_v36 }
 0x1d6   : > { %v4279_v48 = vpop.f32.mrf.mxu1 }
 0x1d7   : > { %v1250_v50 = vadd.f32 %v4279_v48, %v5641_v61 }
 0x1d8   : > { %v5823_v21 = vpop.f32.mrf.mxu1 }
 0x1d9   : > { %v5790_v49 = vpack.c.bf16 %v1250_v50, %v1247_v46 }
 0x1fe   : > { %v1691_v54 = vpop.permute.xlu1 %1690 }
 0x1ff   : > { %v1715_v55 = vsel %vm1529_vm1, %v1691_v54, 0 }
 0x202   : > { %v1689_v47 = vpop.permute.xlu1 %1688 }
 0x203   : > { %v1712_v58 = vsel %vm1529_vm1, %v1689_v47, 0 }
 0x206   : > { %v1695_v15 = vpop.permute.xlu0 %1694  ;;  %v1685_v52 = vpop.permute.xlu1 %1684 }
 0x207   : > { %v1721_v17 = vsel %vm1529_vm1, %v1695_v15, 0  ;;  %v1706_v57 = vsel %vm1529_vm1, %v1685_v52, 0 }
 0x208   : > { %4369 = vmatpush3.bf16.xpose.msra.mxu1 %v1721_v17 }
 0x209   : > { %4370 = vmatprep.subr.bf16.mxu1 %v5275_v36 }
 0x20a   : > { %v1693_v32 = vpop.permute.xlu0 %1692  ;;  %v1681_v63 = vpop.permute.xlu1 %1680 }
 0x20b   : > { %v1718_v53 = vsel %vm1529_vm1, %v1693_v32, 0  ;;  %v1700_v23 = vsel %vm1529_vm1, %v1681_v63, 0 }
 0x20e   : > { %v1687_v61 = vpop.permute.xlu0 %1686 }
 0x20f   : > { %v1709_v59 = vsel %vm1529_vm1, %v1687_v61, 0 }
 0x210   : > { %4371 = vmatpush3.bf16.xpose.msra.mxu1 %v1718_v53 }
 0x211   : > { %4372 = vmatprep.subr.bf16.mxu1 %v5275_v36 }
 0x212   : > { %v1683_v60 = vpop.permute.xlu0 %1682 }
 0x213   : > { %v1703_v62 = vsel %vm1529_vm1, %v1683_v60, 0 }
 0x216   : > { %v1671_v25 = vpop.permute.xlu0 %1670 }
 0x218   : > { %4373 = vmatpush3.bf16.xpose.msra.mxu1 %v1715_v55 }
 0x219   : > { %4374 = vmatprep.subr.bf16.mxu1 %v5275_v36 }
 0x220   : > { %4375 = vmatpush3.bf16.xpose.msra.mxu1 %v1712_v58 }
 0x221   : > { %4376 = vmatprep.subr.bf16.mxu1 %v5275_v36 }
 0x228   : > { %4377 = vmatpush3.bf16.xpose.msra.mxu1 %v1709_v59 }
 0x229   : > { %4378 = vmatprep.subr.bf16.mxu1 %v5275_v36 }
 0x230   : > { %4379 = vmatpush3.bf16.xpose.msra.mxu1 %v1706_v57 }
 0x231   : > { %4380 = vmatprep.subr.bf16.mxu1 %v5275_v36 }
 0x238   : > { %4381 = vmatpush3.bf16.xpose.msra.mxu1 %v1703_v62 }
 0x239   : > { %4382 = vmatprep.subr.bf16.mxu1 %v5275_v36 }
 0x240   : > { %4383 = vmatpush3.bf16.xpose.msra.mxu1 %v1700_v23 }
 0x241   : > { %4428 = vmatprep.subr.bf16.mxu1 %v5275_v36 }
 0x247   : > { %4385 = vmatmul.mubr.msk.bf16.vlgmr.msra.gmra.mxu1 %vm1529_vm1, %v1671_v25 }
 0x248   : > { %4444 = vmatprep.mubr.msk.bf16.mxu1 %vm5276_vm0, %v5275_v36 }
 0x253   : > { %v4298_v27 = vpop.f32.mrf.mxu0 }
 0x254   : > { %v1370_v63 = vadd.f32 %v4298_v27, %v5812_v2 }
 0x255   : > { %v1361_v29 = vpop.f32.mrf.mxu0 }
 0x257   : > { %v4299_v33 = vpop.f32.mrf.mxu0 }
 0x258   : > { %v1373_v23 = vadd.f32 %v4299_v33, %v5812_v2 }
 0x259   : > { %v1364_v34 = vpop.f32.mrf.mxu0 }
 0x25b   : > { %v4302_v35 = vpop.f32.mrf.mxu0 }
 0x25c   : > { %v1386_v55 = vadd.f32 %v4302_v35, %v5812_v2  ;;  %v1362_v35 = vadd.f32 %v5812_v2, %v1361_v29 }
 0x25d   : > { %v1377_v37 = vpop.f32.mrf.mxu0 }
 0x25e   : > { %v1378_v57 = vadd.f32 %v5812_v2, %v1377_v37  ;;  %v5860_v37 = vpack.c.bf16 %v1373_v23, %v1370_v63 }
 0x25f   : > { %v4303_v38 = vpop.f32.mrf.mxu0 }
 0x260   : > { %v1389_v47 = vadd.f32 %v4303_v38, %v5812_v2  ;;  %v1365_v38 = vadd.f32 %v5812_v2, %v1364_v34 }
 0x261   : > { %v1380_v40 = vpop.f32.mrf.mxu0 }
 0x262   : > { %v5848_v60 = vpack.c.bf16 %v1389_v47, %v1386_v55  ;;  %v1381_v62 = vadd.f32 %v5812_v2, %v1380_v40  ;;  %v5865_v40 = vpack.c.bf16 %v1365_v38, %v1362_v35 }
 0x263   : > { %v4306_v41 = vpop.f32.mrf.mxu0 }
 0x264   : > { %v1402_v16 = vadd.f32 %v4306_v41, %v5812_v2  ;;  %v5855_v25 = vpack.c.bf16 %v1381_v62, %v1378_v57 }
 0x265   : > { %v1393_v43 = vpop.f32.mrf.mxu0 }
 0x266   : > { %v1394_v32 = vadd.f32 %v5812_v2, %v1393_v43 }
 0x267   : > { %v4307_v44 = vpop.f32.mrf.mxu0 }
 0x268   : > { %v1405_v17 = vadd.f32 %v4307_v44, %v5812_v2 }
 0x269   : > { %v1396_v0 = vpop.f32.mrf.mxu0 }
 0x26a   : > { %v5834_v46 = vpack.c.bf16 %v1405_v17, %v1402_v16  ;;  %v1397_v48 = vadd.f32 %v5812_v2, %v1396_v0 }
 0x26b   : > { %v4310_v4 = vpop.f32.mrf.mxu0 }
 0x26c   : > { %v1418_v7 = vadd.f32 %v4310_v4, %v5812_v2  ;;  %v5842_v58 = vpack.c.bf16 %v1397_v48, %v1394_v32 }
 0x26d   : > { %v1409_v5 = vpop.f32.mrf.mxu0 }
 0x26e   : > { %v1410_v12 = vadd.f32 %v5812_v2, %v1409_v5 }
 0x26f   : > { %v4311_v8 = vpop.f32.mrf.mxu0 }
 0x270   : > { %v1421_v11 = vadd.f32 %v4311_v8, %v5812_v2 }
 0x271   : > { %v1412_v14 = vpop.f32.mrf.mxu0 }
 0x272   : > { %v5817_v13 = vpack.c.bf16 %v1421_v11, %v1418_v7  ;;  %v1413_v15 = vadd.f32 %v5812_v2, %v1412_v14 }
 0x274   : > { %4349 = vmatpush3.bf16.msra.mxu0 %v5817_v13  ;;  %v5825_v22 = vpack.c.bf16 %v1413_v15, %v1410_v12 }
 0x275   : > { %4350 = vmatprep.subr.bf16.mxu0 %v5275_v36 }
 0x278   : > { %4351 = vmatpush3.bf16.msra.mxu0 %v5825_v22 }
 0x279   : > { %4352 = vmatprep.subr.bf16.mxu0 %v5275_v36 }
 0x27c   : > { %4353 = vmatpush3.bf16.msra.mxu0 %v5834_v46 }
 0x27d   : > { %4354 = vmatprep.subr.bf16.mxu0 %v5275_v36 }
 0x280   : > { %4355 = vmatpush3.bf16.msra.mxu0 %v5842_v58 }
 0x281   : > { %4356 = vmatprep.subr.bf16.mxu0 %v5275_v36 }
 0x284   : > { %4357 = vmatpush3.bf16.msra.mxu0 %v5848_v60 }
 0x285   : > { %4358 = vmatprep.subr.bf16.mxu0 %v5275_v36 }
 0x288   : > { %4359 = vmatpush3.bf16.msra.mxu0 %v5855_v25 }
 0x289   : > { %4360 = vmatprep.subr.bf16.mxu0 %v5275_v36 }
 0x28c   : > { %4361 = vmatpush3.bf16.msra.mxu0 %v5860_v37 }
 0x28d   : > { %4362 = vmatprep.subr.bf16.mxu0 %v5275_v36 }
 0x290   : > { %4363 = vmatpush3.bf16.msra.mxu0 %v5865_v40 }
 0x291   : > { %4388 = vmatprep.subr.bf16.mxu0 %v5275_v36 }
 0x294   : > { %v1591_v50 = vpop.f32.mrf.mxu1 }
 0x295   : > { %v1592_v53 = vadd.f32 %v5831_v24, %v1591_v50 }
 0x296   : > { %v4346_v54 = vpop.f32.mrf.mxu1 }
 0x297   : > { %1598 = vmax.xlane.f32.xlu1 %v1592_v53 }
 0x298   : > { %v1594_v61 = vpop.f32.mrf.mxu1 }
 0x299   : > { %v1595_v59 = vadd.f32 %v5831_v24, %v1594_v61 }
 0x29a   : > { %v4347_v52 = vpop.f32.mrf.mxu1 }
 0x29b   : > { %1600 = vmax.xlane.f32.xlu0 %v1595_v59 }
 0x307   : > { %v1757_v27 = vpop.f32.mrf.mxu1 }
 0x308   : > { %v1758_v29 = vadd.f32 %v5831_v24, %v1757_v27 }
 0x309   : > { %v4386_v33 = vpop.f32.mrf.mxu1 }
 0x30a   : > { %1764 = vmax.xlane.f32.xlu0 %v1758_v29 }
 0x30b   : > { %v1760_v34 = vpop.f32.mrf.mxu1 }
 0x30c   : > { %v1761_v41 = vadd.f32 %v5831_v24, %v1760_v34  ;;  %v4314_v34 = vpop.f32.mrf.mxu0 }
 0x30d   : > { %v4387_v43 = vpop.f32.mrf.mxu1 }
 0x30e   : > { %1766 = vmax.xlane.f32.xlu1 %v1761_v41  ;;  %v1434_v43 = vadd.f32 %v4314_v34, %v5812_v2 }
 0x31f   : > { %1803 = vrot.lane.b32.xlu1 %v5825_v22, %s5277_s27 }
 0x320   : > { %v1599_v44 = vpop.xlane.xlu1 %1598 }
 0x321   : > { %v1602_v0 = vsub.f32 %v1592_v53, %v1599_v44 }
 0x323   : > { %v1604_v4 = vmul.f32 1.442695, %v1602_v0  ;;  %1797 = vrot.lane.b32.xlu1 %v5848_v60, %s5277_s27 }
 0x324   : > { %v1601_v5 = vpop.xlane.xlu0 %1600 }
 0x325   : > { %4898 = vpow2.f32 %v1604_v4  ;;  %v1603_v7 = vsub.f32 %v1595_v59, %v1601_v5 }
 0x327   : > { %v1606_v11 = vmul.f32 1.442695, %v1603_v7 }
 0x329   : > { %4900 = vpow2.f32 %v1606_v11 }
 0x332   : > { %v4899_v8 = vpop.eup %4898 }
 0x333   : > { %1608 = vadd.xlane.f32.xlu0 %v4899_v8 }
 0x336   : > { %v4901_v12 = vpop.eup %4900 }
 0x347   : > { %1610 = vadd.xlane.f32.xlu1 %v4901_v12 }
 0x349   : > { %1805 = vrot.lane.b32.xlu0 %v5817_v13, %s5277_s27 }
 0x34d   : > { %1801 = vrot.lane.b32.xlu0 %v5834_v46, %s5277_s27 }
 0x351   : > { %1799 = vrot.lane.b32.xlu0 %v5842_v58, %s5277_s27 }
 0x355   : > { %1795 = vrot.lane.b32.xlu0 %v5855_v25, %s5277_s27 }
 0x358   : > { %1793 = vrot.lane.b32.xlu1 %v5860_v37, %s5277_s27 }
 0x359   : > { %1791 = vrot.lane.b32.xlu0 %v5865_v40, %s5277_s27 }
 0x35d   : > { %1885 = vrot.lane.b32.xlu0 %v5684_v31, %s5278_s3 }
 0x361   : > { %1881 = vrot.lane.b32.xlu0 %v5658_v10, %s5278_s3 }
 0x365   : > { %1877 = vrot.lane.b32.xlu0 %v5667_v18, %s5278_s3 }
 0x369   : > { %1873 = vrot.lane.b32.xlu0 %v5681_v28, %s5278_s3 }
 0x393   : > { %v1765_v14 = vpop.xlane.xlu0 %1764 }
 0x394   : > { %v1768_v15 = vsub.f32 %v1758_v29, %v1765_v14 }
 0x396   : > { %v1770_v16 = vmul.f32 1.442695, %v1768_v15 }
 0x397   : > { %v1767_v17 = vpop.xlane.xlu1 %1766 }
 0x398   : > { %4902 = vpow2.f32 %v1770_v16  ;;  %v1769_v32 = vsub.f32 %v1761_v41, %v1767_v17  ;;  %v1425_v41 = vpop.f32.mrf.mxu0 }
 0x399   : > { %v1426_v0 = vadd.f32 %v5812_v2, %v1425_v41 }
 0x39a   : > { %v1772_v48 = vmul.f32 1.442695, %v1769_v32  ;;  %v4315_v44 = vpop.f32.mrf.mxu0 }
 0x39b   : > { %v1804_v54 = vpop.permute.xlu1 %1803  ;;  %v1437_v4 = vadd.f32 %v4315_v44, %v5812_v2 }
 0x39c   : > { %4904 = vpow2.f32 %v1772_v48  ;;  %v1428_v5 = vpop.f32.mrf.mxu0 }
 0x39d   : > { %v5926_v7 = vpack.c.bf16 %v1437_v4, %v1434_v43 }
 0x39e   : > { %v4318_v11 = vpop.f32.mrf.mxu0 }
 0x39f   : > { %v1798_v55 = vpop.permute.xlu1 %1797  ;;  %v1450_v15 = vadd.f32 %v4318_v11, %v5812_v2 }
 0x3a0   : > { %v1441_v14 = vpop.f32.mrf.mxu0 }
 0x3a1   : > { %v1442_v17 = vadd.f32 %v5812_v2, %v1441_v14 }
 0x3a2   : > { %v4319_v16 = vpop.f32.mrf.mxu0 }
 0x3a3   : > { %v1453_v32 = vadd.f32 %v4319_v16, %v5812_v2 }
 0x3a4   : > { %v1444_v48 = vpop.f32.mrf.mxu0 }
 0x3a5   : > { %v5897_v50 = vpop.eup %4902 }
 0x3a6   : > { %1774 = vadd.xlane.f32.xlu1 %v5897_v50 }
 0x3a9   : > { %v5900_v53 = vpop.eup %4904 }
 0x3aa   : > { %1776 = vadd.xlane.f32.xlu1 %v5900_v53 }
 0x3bb   : > { %1887 = vrot.lane.b32.xlu1 %v5669_v19, %s5278_s3 }
 0x3bc   : > { %v1609_v47 = vpop.xlane.xlu0 %1608 }
 0x3bd   : > { %4906 = vrcp.f32 %v1609_v47  ;;  %v4322_v47 = vpop.f32.mrf.mxu0 }
 0x3bf   : > { %1883 = vrot.lane.b32.xlu1 %v5647_v3, %s5278_s3 }
 0x3c0   : > { %v1806_v23 = vpop.permute.xlu0 %1805 }
 0x3c3   : > { %1879 = vrot.lane.b32.xlu1 %v5696_v51, %s5278_s3 }
 0x3c4   : > { %v1802_v35 = vpop.permute.xlu0 %1801 }
 0x3c7   : > { %1875 = vrot.lane.b32.xlu1 %v5707_v56, %s5278_s3 }
 0x3c8   : > { %v1800_v38 = vpop.permute.xlu0 %1799 }
 0x3ca   : > { %v4907_v59 = vpop.eup %4906 }
 0x3cb   : > { %1871 = vrot.lane.b32.xlu1 %v5712_v45, %s5278_s3  ;;  %v1614_v57 = vmul.f32 %v4907_v59, %v4899_v8  ;;  %v1429_v8 = vadd.f32 %v5812_v2, %v1428_v5  ;;  %v1457_v59 = vpop.f32.mrf.mxu0 }
 0x3cc   : > { %v1796_v27 = vpop.permute.xlu0 %1795 }
 0x3d0   : > { %v1611_v61 = vpop.xlane.xlu1 %1610  ;;  %v1792_v33 = vpop.permute.xlu0 %1791 }
 0x3d1   : > { %4908 = vrcp.f32 %v1611_v61 }
 0x3d4   : > { %v1794_v29 = vpop.permute.xlu1 %1793 }
 0x3de   : > { %v4909_v52 = vpop.eup %4908 }
 0x3df   : > { %v1615_v62 = vmul.f32 %v4909_v52, %v4901_v12  ;;  %v5929_v12 = vpack.c.bf16 %v1429_v8, %v1426_v0  ;;  %v1466_v52 = vadd.f32 %v4322_v47, %v5812_v2 }
 0x3e1   : > { %v1616_v63 = vpack.c.bf16 %v1615_v62, %v1614_v57  ;;  %v4323_v57 = vpop.f32.mrf.mxu0  ;;  %v1458_v62 = vadd.f32 %v5812_v2, %v1457_v59 }
 0x3e3   : > { %4365 = vmatmul.mubr.bf16.vlgmr.msra.gmra.mxu0 %v1616_v63  ;;  %v1469_v63 = vadd.f32 %v4323_v57, %v5812_v2 }
 0x3e4   : > { %4389 = vmatpush3.bf16.msra.mxu0 %v1806_v23  ;;  %4404 = vmatprep.mubr.msk.bf16.mxu0 %vm5276_vm0, %v5275_v36  ;;  %v1460_v23 = vpop.f32.mrf.mxu0 }
 0x3e5   : > { %4390 = vmatprep.subr.bf16.mxu0 %v5275_v36 }
 0x3e8   : > { %4391 = vmatpush3.bf16.msra.mxu0 %v1804_v54  ;;  %v5934_v54 = vpack.c.bf16 %v1453_v32, %v1450_v15  ;;  %v1886_v32 = vpop.permute.xlu0 %1885 }
 0x3e9   : > { %4392 = vmatprep.subr.bf16.mxu0 %v5275_v36 }
 0x3ec   : > { %4393 = vmatpush3.bf16.msra.mxu0 %v1802_v35  ;;  %v5942_v35 = vpack.c.bf16 %v1469_v63, %v1466_v52 }
 0x3ed   : > { %4394 = vmatprep.subr.bf16.mxu0 %v5275_v36 }
 0x3f0   : > { %4395 = vmatpush3.bf16.msra.mxu0 %v1800_v38  ;;  %v1461_v38 = vadd.f32 %v5812_v2, %v1460_v23 }
 0x3f1   : > { %4396 = vmatprep.subr.bf16.mxu0 %v5275_v36 }
 0x3f4   : > { %4397 = vmatpush3.bf16.msra.mxu0 %v1798_v55  ;;  %v1445_v55 = vadd.f32 %v5812_v2, %v1444_v48  ;;  %v1911_v48 = vsel %vm1529_vm1, %v1886_v32, 0 }
 0x3f5   : > { %4398 = vmatprep.subr.bf16.mxu0 %v5275_v36 }
 0x3f6   : > { %v5937_v61 = vpack.c.bf16 %v1445_v55, %v1442_v17  ;;  %v1882_v55 = vpop.permute.xlu0 %1881 }
 0x3f7   : > { %v1905_v47 = vsel %vm1529_vm1, %v1882_v55, 0 }
 0x3f8   : > { %4399 = vmatpush3.bf16.msra.mxu0 %v1796_v27  ;;  %v4326_v27 = vpop.f32.mrf.mxu0 }
 0x3f9   : > { %4400 = vmatprep.subr.bf16.mxu0 %v5275_v36  ;;  %v1482_v34 = vadd.f32 %v4326_v27, %v5812_v2 }
 0x3fa   : > { %v1878_v57 = vpop.permute.xlu0 %1877 }
 0x3fc   : > { %4401 = vmatpush3.bf16.msra.mxu0 %v1794_v29  ;;  %v5945_v29 = vpack.c.bf16 %v1461_v38, %v1458_v62  ;;  %v1899_v62 = vsel %vm1529_vm1, %v1878_v57, 0 }
 0x3fd   : > { %4402 = vmatprep.subr.bf16.mxu0 %v5275_v36 }
 0x3fe   : > { %v1874_v38 = vpop.permute.xlu0 %1873 }
 0x3ff   : > { %v1893_v27 = vsel %vm1529_vm1, %v1874_v38, 0 }
 0x400   : > { %4403 = vmatpush3.bf16.msra.mxu0 %v1792_v33  ;;  %v5947_v33 = vpop.f32.mrf.mxu0 }
 0x401   : > { %4408 = vmatprep.subr.bf16.mxu0 %v5275_v36 }
 0x402   : > { %v4327_v41 = vpop.f32.mrf.mxu0 }
 0x403   : > { %v1485_v43 = vadd.f32 %v4327_v41, %v5812_v2 }
 0x404   : > { %v5976_v41 = vpop.f32.mrf.mxu0 }
 0x405   : > { %v5951_v44 = vpack.c.bf16 %v1485_v43, %v1482_v34 }
 0x42f   : > { %v1775_v0 = vpop.xlane.xlu1 %1774 }
 0x430   : > { %4910 = vrcp.f32 %v1775_v0 }
 0x433   : > { %v1777_v4 = vpop.xlane.xlu1 %1776 }
 0x434   : > { %4912 = vrcp.f32 %v1777_v4 }
 0x437   : > { %v1888_v15 = vpop.permute.xlu1 %1887 }
 0x438   : > { %v1914_v17 = vsel %vm1529_vm1, %v1888_v15, 0 }
 0x43d   : > { %v4911_v5 = vpop.eup %4910 }
 0x43e   : > { %v1780_v11 = vmul.f32 %v4911_v5, %v5897_v50  ;;  %v1884_v50 = vpop.permute.xlu1 %1883 }
 0x441   : > { %v4913_v8 = vpop.eup %4912 }
 0x442   : > { %v1781_v14 = vmul.f32 %v4913_v8, %v5900_v53  ;;  %v1908_v53 = vsel %vm1529_vm1, %v1884_v50, 0  ;;  %v1880_v59 = vpop.permute.xlu1 %1879 }
 0x443   : > { %v1902_v52 = vsel %vm1529_vm1, %v1880_v59, 0 }
 0x444   : > { %v1782_v16 = vpack.c.bf16 %v1781_v14, %v1780_v11 }
 0x446   : > { %4405 = vmatmul.mubr.bf16.vlgmr.msra.gmra.mxu0 %v1782_v16  ;;  %v1876_v63 = vpop.permute.xlu1 %1875 }
 0x447   : > { %4409 = vmatpush3.bf16.xpose.msra.mxu0 %v1914_v17  ;;  %4424 = vmatprep.mubr.msk.bf16.mxu0 %vm5276_vm0, %v5275_v36  ;;  %v1896_v23 = vsel %vm1529_vm1, %v1876_v63, 0 }
 0x448   : > { %4410 = vmatprep.subr.bf16.mxu0 %v5275_v36 }
 0x44a   : > { %v1872_v34 = vpop.permute.xlu1 %1871 }
 0x44f   : > { %4411 = vmatpush3.bf16.xpose.msra.mxu0 %v1911_v48 }
 0x450   : > { %4412 = vmatprep.subr.bf16.mxu0 %v5275_v36 }
 0x457   : > { %4413 = vmatpush3.bf16.xpose.msra.mxu0 %v1908_v53 }
 0x458   : > { %4414 = vmatprep.subr.bf16.mxu0 %v5275_v36 }
 0x45f   : > { %4415 = vmatpush3.bf16.xpose.msra.mxu0 %v1905_v47 }
 0x460   : > { %4416 = vmatprep.subr.bf16.mxu0 %v5275_v36 }
 0x467   : > { %4417 = vmatpush3.bf16.xpose.msra.mxu0 %v1902_v52 }
 0x468   : > { %4418 = vmatprep.subr.bf16.mxu0 %v5275_v36 }
 0x46f   : > { %4419 = vmatpush3.bf16.xpose.msra.mxu0 %v1899_v62 }
 0x470   : > { %4420 = vmatprep.subr.bf16.mxu0 %v5275_v36 }
 0x477   : > { %4421 = vmatpush3.bf16.xpose.msra.mxu0 %v1896_v23 }
 0x478   : > { %4422 = vmatprep.subr.bf16.mxu0 %v5275_v36 }
 0x47f   : > { %4423 = vmatpush3.bf16.xpose.msra.mxu0 %v1893_v27 }
 0x480   : > { %4468 = vmatprep.subr.bf16.mxu0 %v5275_v36 }
 0x486   : > { %4425 = vmatmul.mubr.msk.bf16.vlgmr.msra.gmra.mxu0 %vm1529_vm1, %v1872_v34 }
 0x487   : > { %4484 = vmatprep.mubr.msk.bf16.mxu0 %vm5276_vm0, %v5275_v36 }
 0x4a3   : > { %v1651_v43 = vpop.f32.mrf.mxu0 }
 0x4a4   : > { %v3944_v0 = vpack.c.bf16 %v1651_v43, %v1651_v43 }
 0x4a5   : > { %v4366_v4 = vpop.f32.mrf.mxu0 }
 0x4a6   : > { %1667 = vst.msk [vmem:[#allocation3] sm:$0xf] %vm1666_vm2, %v3944_v0 }
 0x4a7   : > { %v1654_v5 = vpop.f32.mrf.mxu0 }
 0x4a8   : > { %v3945_v8 = vpack.c.bf16 %v1654_v5, %v1654_v5 }
 0x4a9   : > { %v4367_v11 = vpop.f32.mrf.mxu0 }
 0x4aa   : > { %1668 = vst.msk [vmem:[#allocation3 + $0x4] sm:$0xf] %vm1666_vm2, %v3945_v8 }
 0x506   : > { %v5980_v14 = vpop.f32.mrf.mxu0 }
 0x508   : > { %v4406_v15 = vpop.f32.mrf.mxu0 }
 0x50a   : > { %v5982_v16 = vpop.f32.mrf.mxu0 }
 0x50c   : > { %v4407_v17 = vpop.f32.mrf.mxu0 }
 0x546   : > { %v1950_v32 = vpop.f32.mrf.mxu0 }
 0x547   : > { %v1951_v48 = vadd.f32 %v5831_v24, %v1950_v32 }
 0x548   : > { %v4426_v50 = vpop.f32.mrf.mxu0 }
 0x549   : > { %1957 = vmax.xlane.f32.xlu0 %v1951_v48 }
 0x54a   : > { %v1953_v53 = vpop.f32.mrf.mxu0 }
 0x54b   : > { %v1954_v55 = vadd.f32 %v5831_v24, %v1953_v53 }
 0x54c   : > { %v4427_v47 = vpop.f32.mrf.mxu0 }
 0x54d   : > { %1959 = vmax.xlane.f32.xlu1 %v1954_v55 }
 0x55e   : > { %1988 = vrot.lane.b32.xlu1 %v5825_v22, %s5278_s3 }
 0x55f   : > { %1990 = vrot.lane.b32.xlu0 %v5817_v13, %s5278_s3 }
 0x562   : > { %1980 = vrot.lane.b32.xlu1 %v5855_v25, %s5278_s3 }
 0x563   : > { %1986 = vrot.lane.b32.xlu0 %v5834_v46, %s5278_s3 }
 0x567   : > { %1984 = vrot.lane.b32.xlu0 %v5842_v58, %s5278_s3 }
 0x56b   : > { %1982 = vrot.lane.b32.xlu0 %v5848_v60, %s5278_s3 }
 0x56f   : > { %1978 = vrot.lane.b32.xlu0 %v5860_v37, %s5278_s3 }
 0x573   : > { %2072 = vrot.lane.b32.xlu0 %v5669_v19, %s5279_s28 }
 0x577   : > { %2068 = vrot.lane.b32.xlu0 %v5647_v3, %s5279_s28 }
 0x57b   : > { %2064 = vrot.lane.b32.xlu0 %v5696_v51, %s5279_s28 }
 0x57f   : > { %2060 = vrot.lane.b32.xlu0 %v5707_v56, %s5279_s28 }
 0x583   : > { %2056 = vrot.lane.b32.xlu0 %v5712_v45, %s5279_s28 }
 0x5d2   : > { %v1958_v59 = vpop.xlane.xlu0 %1957 }
 0x5d3   : > { %v1961_v52 = vsub.f32 %v1951_v48, %v1958_v59 }
 0x5d5   : > { %v1963_v57 = vmul.f32 1.442695, %v1961_v52 }
 0x5d6   : > { %v1991_v62 = vpop.permute.xlu0 %1990  ;;  %v1960_v63 = vpop.xlane.xlu1 %1959 }
 0x5d7   : > { %4914 = vpow2.f32 %v1963_v57  ;;  %v1962_v23 = vsub.f32 %v1954_v55, %v1960_v63  ;;  %4429 = vmatpush3.bf16.msra.mxu1 %v1991_v62 }
 0x5d8   : > { %4430 = vmatprep.subr.bf16.mxu1 %v5275_v36 }
 0x5d9   : > { %v1965_v3 = vmul.f32 1.442695, %v1962_v23 }
 0x5da   : > { %v1987_v19 = vpop.permute.xlu0 %1986  ;;  %v1989_v38 = vpop.permute.xlu1 %1988 }
 0x5db   : > { %4916 = vpow2.f32 %v1965_v3  ;;  %4431 = vmatpush3.bf16.msra.mxu1 %v1989_v38  ;;  %v1477_v38 = vadd.f32 %v5812_v2, %v5976_v41 }
 0x5dc   : > { %4432 = vmatprep.subr.bf16.mxu1 %v5275_v36 }
 0x5de   : > { %v1985_v51 = vpop.permute.xlu0 %1984  ;;  %v1981_v34 = vpop.permute.xlu1 %1980 }
 0x5df   : > { %4433 = vmatpush3.bf16.msra.mxu1 %v1987_v19  ;;  %v1474_v19 = vadd.f32 %v5812_v2, %v5947_v33 }
 0x5e0   : > { %4434 = vmatprep.subr.bf16.mxu1 %v5275_v36 }
 0x5e2   : > { %v1983_v45 = vpop.permute.xlu0 %1982 }
 0x5e3   : > { %4435 = vmatpush3.bf16.msra.mxu1 %v1985_v51 }
 0x5e4   : > { %v4915_v56 = vpop.eup %4914  ;;  %4436 = vmatprep.subr.bf16.mxu1 %v5275_v36 }
 0x5e5   : > { %1967 = vadd.xlane.f32.xlu1 %v4915_v56 }
 0x5e6   : > { %v1979_v43 = vpop.permute.xlu0 %1978 }
 0x5e7   : > { %4437 = vmatpush3.bf16.msra.mxu1 %v1983_v45 }
 0x5e8   : > { %v4917_v27 = vpop.eup %4916  ;;  %4438 = vmatprep.subr.bf16.mxu1 %v5275_v36 }
 0x5e9   : > { %1969 = vadd.xlane.f32.xlu1 %v4917_v27 }
 0x5ea   : > { %v2073_v17 = vpop.permute.xlu0 %2072 }
 0x5eb   : > { %4439 = vmatpush3.bf16.msra.mxu1 %v1981_v34  ;;  %v2099_v32 = vsel %vm1529_vm1, %v2073_v17, 0 }
 0x5ec   : > { %4440 = vmatprep.subr.bf16.mxu1 %v5275_v36 }
 0x5ee   : > { %v2069_v48 = vpop.permute.xlu0 %2068 }
 0x5ef   : > { %4441 = vmatpush3.bf16.msra.mxu1 %v1979_v43  ;;  %v2093_v50 = vsel %vm1529_vm1, %v2069_v48, 0 }
 0x5f0   : > { %4442 = vmatprep.subr.bf16.mxu1 %v5275_v36 }
 0x5f2   : > { %v2065_v47 = vpop.permute.xlu0 %2064 }
 0x5f3   : > { %v2087_v59 = vsel %vm1529_vm1, %v2065_v47, 0 }
 0x5f6   : > { %v2061_v62 = vpop.permute.xlu0 %2060 }
 0x5f7   : > { %v2081_v63 = vsel %vm1529_vm1, %v2061_v62, 0  ;;  %v2274_v62 = vsel %vm1529_vm1, %v5790_v49, 0 }
 0x5fa   : > { %1976 = vrot.lane.b32.xlu1 %v5865_v40, %s5278_s3  ;;  %v2057_v51 = vpop.permute.xlu0 %2056 }
 0x5fe   : > { %2070 = vrot.lane.b32.xlu1 %v5684_v31, %s5279_s28 }
 0x602   : > { %2066 = vrot.lane.b32.xlu1 %v5658_v10, %s5279_s28 }
 0x606   : > { %2062 = vrot.lane.b32.xlu1 %v5667_v18, %s5279_s28 }
 0x60a   : > { %2058 = vrot.lane.b32.xlu1 %v5681_v28, %s5279_s28 }
 0x66e   : > { %v1968_v0 = vpop.xlane.xlu1 %1967 }
 0x66f   : > { %4918 = vrcp.f32 %v1968_v0 }
 0x672   : > { %v1970_v4 = vpop.xlane.xlu1 %1969 }
 0x673   : > { %4920 = vrcp.f32 %v1970_v4 }
 0x676   : > { %v1977_v5 = vpop.permute.xlu1 %1976 }
 0x677   : > { %4443 = vmatpush3.bf16.msra.mxu1 %v1977_v5 }
 0x678   : > { %4448 = vmatprep.subr.bf16.mxu1 %v5275_v36 }
 0x67a   : > { %v2071_v18 = vpop.permute.xlu1 %2070 }
 0x67b   : > { %v2096_v28 = vsel %vm1529_vm1, %v2071_v18, 0 }
 0x67c   : > { %v4919_v8 = vpop.eup %4918 }
 0x67d   : > { %v1973_v31 = vmul.f32 %v4919_v8, %v4915_v56  ;;  %v6055_v56 = vpack.c.bf16 %v1477_v38, %v1474_v19  ;;  %v2259_v19 = vsel %vm1529_vm1, %v5773_v9, 0  ;;  %v2256_v38 = vsel %vm1529_vm1, %v5762_v39, 0 }
 0x67e   : > { %v2067_v53 = vpop.permute.xlu1 %2066 }
 0x67f   : > { %v2090_v55 = vsel %vm1529_vm1, %v2067_v53, 0 }
 0x680   : > { %v4921_v11 = vpop.eup %4920 }
 0x681   : > { %v1974_v15 = vmul.f32 %v4921_v11, %v4917_v27 }
 0x682   : > { %v2063_v52 = vpop.permute.xlu1 %2062 }
 0x683   : > { %v1975_v10 = vpack.c.bf16 %v1974_v15, %v1973_v31  ;;  %v2084_v57 = vsel %vm1529_vm1, %v2063_v52, 0  ;;  %v4978_v52 = vld [vmem:[%s5637_s21] ss:$0 sm:$0xff]  ;;  %s2978_s21 = scalar_lea.vmem %s6529_s10, %s5253_s0 }
 0x685   : > { %4445 = vmatmul.mubr.bf16.vlgmr.msra.gmra.mxu1 %v1975_v10 }
 0x686   : > { %4449 = vmatpush3.bf16.xpose.msra.mxu1 %v2099_v32  ;;  %4464 = vmatprep.mubr.msk.bf16.mxu1 %vm5276_vm0, %v5275_v36  ;;  %v2059_v23 = vpop.permute.xlu1 %2058 }
 0x687   : > { %4450 = vmatprep.subr.bf16.mxu1 %v5275_v36  ;;  %v2078_v3 = vsel %vm1529_vm1, %v2059_v23, 0 }
 0x68e   : > { %4451 = vmatpush3.bf16.xpose.msra.mxu1 %v2096_v28 }
 0x68f   : > { %4452 = vmatprep.subr.bf16.mxu1 %v5275_v36 }
 0x696   : > { %4453 = vmatpush3.bf16.xpose.msra.mxu1 %v2093_v50 }
 0x697   : > { %4454 = vmatprep.subr.bf16.mxu1 %v5275_v36 }
 0x69e   : > { %4455 = vmatpush3.bf16.xpose.msra.mxu1 %v2090_v55 }
 0x69f   : > { %4456 = vmatprep.subr.bf16.mxu1 %v5275_v36 }
 0x6a6   : > { %4457 = vmatpush3.bf16.xpose.msra.mxu1 %v2087_v59 }
 0x6a7   : > { %4458 = vmatprep.subr.bf16.mxu1 %v5275_v36 }
 0x6ae   : > { %4459 = vmatpush3.bf16.xpose.msra.mxu1 %v2084_v57  ;;  %v1242_v57 = vadd.f32 %v4978_v52, %v5823_v21  ;;  %v2265_v21 = vsel %vm1529_vm1, %v5783_v26, 0 }
 0x6af   : > { %4460 = vmatprep.subr.bf16.mxu1 %v5275_v36 }
 0x6b6   : > { %4461 = vmatpush3.bf16.xpose.msra.mxu1 %v2081_v63 }
 0x6b7   : > { %4462 = vmatprep.subr.bf16.mxu1 %v5275_v36 }
 0x6be   : > { %4463 = vmatpush3.bf16.xpose.msra.mxu1 %v2078_v3  ;;  %v2262_v3 = vsel %vm1529_vm1, %v5770_v6, 0 }
 0x6bf   : > { %4508 = vmatprep.subr.bf16.mxu1 %v5275_v36 }
 0x6c5   : > { %4465 = vmatmul.mubr.msk.bf16.vlgmr.msra.gmra.mxu1 %vm1529_vm1, %v2057_v51  ;;  %v2253_v51 = vsel %vm1529_vm1, %v5765_v42, 0 }
 0x6c6   : > { %4509 = vmatpush3.bf16.msra.mxu1 %v5951_v44  ;;  %4524 = vmatprep.mubr.msk.bf16.mxu1 %vm5276_vm0, %v5275_v36 }
 0x6c7   : > { %4510 = vmatprep.subr.bf16.mxu1 %v5275_v36 }
 0x6ca   : > { %4511 = vmatpush3.bf16.msra.mxu1 %v6055_v56 }
 0x6cb   : > { %4512 = vmatprep.subr.bf16.mxu1 %v5275_v36 }
 0x6ce   : > { %4513 = vmatpush3.bf16.msra.mxu1 %v5942_v35 }
 0x6cf   : > { %4514 = vmatprep.subr.bf16.mxu1 %v5275_v36 }
 0x6d2   : > { %4515 = vmatpush3.bf16.msra.mxu1 %v5945_v29 }
 0x6d3   : > { %4516 = vmatprep.subr.bf16.mxu1 %v5275_v36 }
 0x6d6   : > { %4517 = vmatpush3.bf16.msra.mxu1 %v5934_v54 }
 0x6d7   : > { %4518 = vmatprep.subr.bf16.mxu1 %v5275_v36 }
 0x6da   : > { %4519 = vmatpush3.bf16.msra.mxu1 %v5937_v61 }
 0x6db   : > { %4520 = vmatprep.subr.bf16.mxu1 %v5275_v36 }
 0x6de   : > { %4521 = vmatpush3.bf16.msra.mxu1 %v5926_v7 }
 0x6df   : > { %4522 = vmatprep.subr.bf16.mxu1 %v5275_v36 }
 0x6e2   : > { %4523 = vmatpush3.bf16.msra.mxu1 %v5929_v12 }
 0x6e3   : > { %4528 = vmatprep.subr.bf16.mxu1 %v5275_v36 }
 0x745   : > { %v6071_v2 = vpop.f32.mrf.mxu1 }
 0x747   : > { %v4446_v33 = vpop.f32.mrf.mxu1 }
 0x749   : > { %v6073_v41 = vpop.f32.mrf.mxu1 }
 0x74b   : > { %v4447_v45 = vpop.f32.mrf.mxu1 }
 0x785   : > { %v2135_v27 = vpop.f32.mrf.mxu1 }
 0x786   : > { %v2136_v34 = vadd.f32 %v5831_v24, %v2135_v27 }
 0x787   : > { %v4466_v43 = vpop.f32.mrf.mxu1 }
 0x788   : > { %2142 = vmax.xlane.f32.xlu1 %v2136_v34  ;;  %v6143_v43 = vld [vmem:[%s6560_s1 + $0x1] ss:$0 sm:$0xff] }
 0x789   : > { %v2138_v0 = vpop.f32.mrf.mxu1 }
 0x78a   : > { %v2139_v4 = vadd.f32 %v5831_v24, %v2138_v0 }
 0x78b   : > { %v4467_v5 = vpop.f32.mrf.mxu1 }
 0x78c   : > { %2144 = vmax.xlane.f32.xlu0 %v2139_v4 }
 0x799   : > { %2173 = vrot.lane.b32.xlu1 %v5825_v22, %s5279_s28 }
 0x79d   : > { %2167 = vrot.lane.b32.xlu1 %v5848_v60, %s5279_s28 }
 0x7a2   : > { %2175 = vrot.lane.b32.xlu0 %v5817_v13, %s5279_s28 }
 0x7a6   : > { %2171 = vrot.lane.b32.xlu0 %v5834_v46, %s5279_s28 }
 0x7aa   : > { %2169 = vrot.lane.b32.xlu0 %v5842_v58, %s5279_s28 }
 0x7ae   : > { %2165 = vrot.lane.b32.xlu0 %v5855_v25, %s5279_s28 }
 0x7b2   : > { %2161 = vrot.lane.b32.xlu0 %v5865_v40, %s5279_s28 }
 0x811   : > { %v2143_v24 = vpop.xlane.xlu1 %2142 }
 0x812   : > { %v2146_v22 = vsub.f32 %v2136_v34, %v2143_v24 }
 0x814   : > { %v2148_v8 = vmul.f32 1.442695, %v2146_v22 }
 0x815   : > { %v2145_v11 = vpop.xlane.xlu0 %2144  ;;  %v2174_v46 = vpop.permute.xlu1 %2173 }
 0x816   : > { %4922 = vpow2.f32 %v2148_v8  ;;  %v2147_v60 = vsub.f32 %v2139_v4, %v2145_v11 }
 0x818   : > { %v2150_v31 = vmul.f32 1.442695, %v2147_v60 }
 0x819   : > { %v2176_v13 = vpop.permute.xlu0 %2175  ;;  %v2168_v17 = vpop.permute.xlu1 %2167 }
 0x81a   : > { %4924 = vpow2.f32 %v2150_v31  ;;  %4469 = vmatpush3.bf16.msra.mxu0 %v2176_v13 }
 0x81b   : > { %4470 = vmatprep.subr.bf16.mxu0 %v5275_v36 }
 0x81d   : > { %v2172_v58 = vpop.permute.xlu0 %2171 }
 0x81e   : > { %4471 = vmatpush3.bf16.msra.mxu0 %v2174_v46 }
 0x81f   : > { %4472 = vmatprep.subr.bf16.mxu0 %v5275_v36 }
 0x821   : > { %v2170_v40 = vpop.permute.xlu0 %2169 }
 0x822   : > { %4473 = vmatpush3.bf16.msra.mxu0 %v2172_v58 }
 0x823   : > { %v4923_v25 = vpop.eup %4922  ;;  %4474 = vmatprep.subr.bf16.mxu0 %v5275_v36 }
 0x824   : > { %2152 = vadd.xlane.f32.xlu1 %v4923_v25 }
 0x825   : > { %v2166_v10 = vpop.permute.xlu0 %2165 }
 0x826   : > { %4475 = vmatpush3.bf16.msra.mxu0 %v2170_v40 }
 0x827   : > { %v4925_v15 = vpop.eup %4924  ;;  %4476 = vmatprep.subr.bf16.mxu0 %v5275_v36 }
 0x828   : > { %2154 = vadd.xlane.f32.xlu1 %v4925_v15 }
 0x829   : > { %v2162_v48 = vpop.permute.xlu0 %2161 }
 0x82a   : > { %4477 = vmatpush3.bf16.msra.mxu0 %v2168_v17 }
 0x82b   : > { %4478 = vmatprep.subr.bf16.mxu0 %v5275_v36 }
 0x82e   : > { %4479 = vmatpush3.bf16.msra.mxu0 %v2166_v10 }
 0x82f   : > { %4480 = vmatprep.subr.bf16.mxu0 %v5275_v36 }
 0x839   : > { %2163 = vrot.lane.b32.xlu1 %v5860_v37, %s5279_s28  ;;  %v1239_v37 = vadd.f32 %v4978_v52, %v5785_v30  ;;  %v2268_v30 = vsel %vm1529_vm1, %v5779_v20, 0 }
 0x83b   : > { %v6109_v63 = vpack.c.bf16 %v1242_v57, %v1239_v37 }
 0x83d   : > { %v2271_v23 = vsel %vm1529_vm1, %v6109_v63, 0 }
 0x8ad   : > { %v2153_v32 = vpop.xlane.xlu1 %2152 }
 0x8ae   : > { %4926 = vrcp.f32 %v2153_v32 }
 0x8b1   : > { %v2155_v18 = vpop.xlane.xlu1 %2154 }
 0x8b2   : > { %4928 = vrcp.f32 %v2155_v18 }
 0x8b5   : > { %v2164_v28 = vpop.permute.xlu1 %2163 }
 0x8b6   : > { %4481 = vmatpush3.bf16.msra.mxu0 %v2164_v28 }
 0x8b7   : > { %4482 = vmatprep.subr.bf16.mxu0 %v5275_v36 }
 0x8ba   : > { %4483 = vmatpush3.bf16.msra.mxu0 %v2162_v48 }
 0x8bb   : > { %4488 = vmatprep.subr.bf16.mxu0 %v5275_v36  ;;  %v4927_v50 = vpop.eup %4926 }
 0x8bc   : > { %v2158_v55 = vmul.f32 %v4927_v50, %v4923_v25 }
 0x8bf   : > { %v4929_v53 = vpop.eup %4928 }
 0x8c0   : > { %v2159_v47 = vmul.f32 %v4929_v53, %v4925_v15 }
 0x8c2   : > { %v2160_v59 = vpack.c.bf16 %v2159_v47, %v2158_v55 }
 0x8c4   : > { %4485 = vmatmul.mubr.bf16.vlgmr.msra.gmra.mxu0 %v2160_v59 }
 0x8c5   : > { %4489 = vmatpush3.bf16.xpose.msra.mxu0 %v2274_v62  ;;  %4504 = vmatprep.mubr.msk.bf16.mxu0 %vm5276_vm0, %v5275_v36 }
 0x8c6   : > { %4490 = vmatprep.subr.bf16.mxu0 %v5275_v36 }
 0x8cd   : > { %4491 = vmatpush3.bf16.xpose.msra.mxu0 %v2271_v23 }
 0x8ce   : > { %4492 = vmatprep.subr.bf16.mxu0 %v5275_v36 }
 0x8d5   : > { %4493 = vmatpush3.bf16.xpose.msra.mxu0 %v2268_v30 }
 0x8d6   : > { %4494 = vmatprep.subr.bf16.mxu0 %v5275_v36 }
 0x8dd   : > { %4495 = vmatpush3.bf16.xpose.msra.mxu0 %v2265_v21 }
 0x8de   : > { %4496 = vmatprep.subr.bf16.mxu0 %v5275_v36 }
 0x8e5   : > { %4497 = vmatpush3.bf16.xpose.msra.mxu0 %v2262_v3 }
 0x8e6   : > { %4498 = vmatprep.subr.bf16.mxu0 %v5275_v36 }
 0x8ed   : > { %4499 = vmatpush3.bf16.xpose.msra.mxu0 %v2259_v19 }
 0x8ee   : > { %4500 = vmatprep.subr.bf16.mxu0 %v5275_v36 }
 0x8f5   : > { %4501 = vmatpush3.bf16.xpose.msra.mxu0 %v2256_v38 }
 0x8f6   : > { %4502 = vmatprep.subr.bf16.mxu0 %v5275_v36 }
 0x8fd   : > { %4503 = vmatpush3.bf16.xpose.msra.mxu0 %v2253_v51 }
 0x8fe   : > { %4548 = vmatprep.subr.bf16.mxu0 %v5275_v36 }
 0x904   : > { %4505 = vmatmul.mubr.msk.bf16.vlgmr.msra.gmra.mxu0 %vm1529_vm1, %v5645_v1 }
 0x905   : > { %4564 = vmatprep.mubr.msk.bf16.mxu0 %vm5276_vm0, %v5275_v36 }
 0x984   : > { %v6136_v33 = vpop.f32.mrf.mxu0 }
 0x986   : > { %v4486_v45 = vpop.f32.mrf.mxu0 }
 0x988   : > { %v6138_v27 = vpop.f32.mrf.mxu0 }
 0x98a   : > { %v4487_v34 = vpop.f32.mrf.mxu0 }
 0x9c4   : > { %v2310_v0 = vpop.f32.mrf.mxu0 }
 0x9c5   : > { %v2311_v4 = vadd.f32 %v6143_v43, %v2310_v0 }
 0x9c6   : > { %v4506_v5 = vpop.f32.mrf.mxu0 }
 0x9c7   : > { %2317 = vmax.xlane.f32.xlu1 %v2311_v4 }
 0x9c8   : > { %v2313_v24 = vpop.f32.mrf.mxu0 }
 0x9c9   : > { %v2314_v22 = vadd.f32 %v6143_v43, %v2313_v24 }
 0x9ca   : > { %v4507_v8 = vpop.f32.mrf.mxu0 }
 0x9cb   : > { %2319 = vmax.xlane.f32.xlu0 %v2314_v22 }
 0xa50   : > { %v2318_v11 = vpop.xlane.xlu1 %2317 }
 0xa51   : > { %v2321_v60 = vsub.f32 %v2311_v4, %v2318_v11 }
 0xa53   : > { %v2323_v31 = vmul.f32 1.442695, %v2321_v60 }
 0xa54   : > { %v2320_v13 = vpop.xlane.xlu0 %2319 }
 0xa55   : > { %4930 = vpow2.f32 %v2323_v31  ;;  %v2322_v46 = vsub.f32 %v2314_v22, %v2320_v13 }
 0xa57   : > { %v2325_v58 = vmul.f32 1.442695, %v2322_v46 }
 0xa59   : > { %4932 = vpow2.f32 %v2325_v58 }
 0xa62   : > { %v4931_v25 = vpop.eup %4930 }
 0xa63   : > { %2327 = vadd.xlane.f32.xlu0 %v4931_v25 }
 0xa66   : > { %v4933_v40 = vpop.eup %4932 }
 0xa67   : > { %2329 = vadd.xlane.f32.xlu1 %v4933_v40 }
 0xa78   : > { %2410 = vrot.lane.b32.xlu1 %v6109_v63, %s5277_s27 }
 0xa79   : > { %2412 = vrot.lane.b32.xlu0 %v5790_v49, %s5277_s27 }
 0xa7c   : > { %2408 = vrot.lane.b32.xlu1 %v5779_v20, %s5277_s27 }
 0xa7d   : > { %2406 = vrot.lane.b32.xlu0 %v5783_v26, %s5277_s27 }
 0xa80   : > { %2404 = vrot.lane.b32.xlu1 %v5770_v6, %s5277_s27 }
 0xa81   : > { %2402 = vrot.lane.b32.xlu0 %v5773_v9, %s5277_s27 }
 0xa84   : > { %2400 = vrot.lane.b32.xlu1 %v5762_v39, %s5277_s27 }
 0xa85   : > { %2398 = vrot.lane.b32.xlu0 %v5765_v42, %s5277_s27 }
 0xa88   : > { %2388 = vrot.lane.b32.xlu1 %v5645_v1, %s5277_s27 }
 0xaec   : > { %v2328_v15 = vpop.xlane.xlu0 %2327 }
 0xaed   : > { %4934 = vrcp.f32 %v2328_v15 }
 0xaf0   : > { %v2330_v17 = vpop.xlane.xlu1 %2329  ;;  %v2413_v48 = vpop.permute.xlu0 %2412 }
 0xaf1   : > { %4936 = vrcp.f32 %v2330_v17  ;;  %v2439_v53 = vsel %vm1529_vm1, %v2413_v48, 0 }
 0xaf4   : > { %v2411_v55 = vpop.permute.xlu1 %2410  ;;  %v2407_v37 = vpop.permute.xlu0 %2406 }
 0xaf5   : > { %v2436_v47 = vsel %vm1529_vm1, %v2411_v55, 0  ;;  %v2430_v57 = vsel %vm1529_vm1, %v2407_v37, 0 }
 0xaf8   : > { %v2409_v59 = vpop.permute.xlu1 %2408  ;;  %v2403_v30 = vpop.permute.xlu0 %2402 }
 0xaf9   : > { %v2433_v52 = vsel %vm1529_vm1, %v2409_v59, 0  ;;  %v2424_v21 = vsel %vm1529_vm1, %v2403_v30, 0 }
 0xafa   : > { %v4935_v10 = vpop.eup %4934 }
 0xafb   : > { %v2333_v18 = vmul.f32 %v4935_v10, %v4931_v25 }
 0xafc   : > { %v2405_v62 = vpop.permute.xlu1 %2404  ;;  %v2399_v38 = vpop.permute.xlu0 %2398 }
 0xafd   : > { %v2427_v23 = vsel %vm1529_vm1, %v2405_v62, 0  ;;  %v2418_v51 = vsel %vm1529_vm1, %v2399_v38, 0 }
 0xafe   : > { %v4937_v32 = vpop.eup %4936 }
 0xaff   : > { %v2334_v28 = vmul.f32 %v4937_v32, %v4933_v40 }
 0xb00   : > { %v2401_v3 = vpop.permute.xlu1 %2400 }
 0xb01   : > { %v2335_v50 = vpack.c.bf16 %v2334_v28, %v2333_v18  ;;  %v2421_v19 = vsel %vm1529_vm1, %v2401_v3, 0 }
 0xb03   : > { %4525 = vmatmul.mubr.bf16.vlgmr.msra.gmra.mxu1 %v2335_v50 }
 0xb04   : > { %4529 = vmatpush3.bf16.xpose.msra.mxu1 %v2439_v53  ;;  %4544 = vmatprep.mubr.msk.bf16.mxu1 %vm5276_vm0, %v5275_v36  ;;  %v2389_v45 = vpop.permute.xlu1 %2388 }
 0xb05   : > { %4530 = vmatprep.subr.bf16.mxu1 %v5275_v36 }
 0xb0c   : > { %4531 = vmatpush3.bf16.xpose.msra.mxu1 %v2436_v47 }
 0xb0d   : > { %4532 = vmatprep.subr.bf16.mxu1 %v5275_v36 }
 0xb14   : > { %4533 = vmatpush3.bf16.xpose.msra.mxu1 %v2433_v52 }
 0xb15   : > { %4534 = vmatprep.subr.bf16.mxu1 %v5275_v36 }
 0xb1c   : > { %4535 = vmatpush3.bf16.xpose.msra.mxu1 %v2430_v57 }
 0xb1d   : > { %4536 = vmatprep.subr.bf16.mxu1 %v5275_v36 }
 0xb24   : > { %4537 = vmatpush3.bf16.xpose.msra.mxu1 %v2427_v23 }
 0xb25   : > { %4538 = vmatprep.subr.bf16.mxu1 %v5275_v36 }
 0xb2c   : > { %4539 = vmatpush3.bf16.xpose.msra.mxu1 %v2424_v21 }
 0xb2d   : > { %4540 = vmatprep.subr.bf16.mxu1 %v5275_v36 }
 0xb34   : > { %4541 = vmatpush3.bf16.xpose.msra.mxu1 %v2421_v19 }
 0xb35   : > { %4542 = vmatprep.subr.bf16.mxu1 %v5275_v36 }
 0xb3c   : > { %4543 = vmatpush3.bf16.xpose.msra.mxu1 %v2418_v51 }
 0xb3d   : > { %4588 = vmatprep.subr.bf16.mxu1 %v5275_v36 }
 0xb43   : > { %4545 = vmatmul.mubr.msk.bf16.vlgmr.msra.gmra.mxu1 %vm1529_vm1, %v2389_v45 }
 0xb44   : > { %4604 = vmatprep.mubr.msk.bf16.mxu1 %vm5276_vm0, %v5275_v36 }
 0xbc3   : > { %v2370_v34 = vpop.f32.mrf.mxu1 }
 0xbc4   : > { %v3952_v0 = vpack.c.bf16 %v2370_v34, %v2370_v34 }
 0xbc5   : > { %v4526_v4 = vpop.f32.mrf.mxu1 }
 0xbc6   : > { %2385 = vst.msk [vmem:[#allocation3 + $0x8] sm:$0xf] %vm1666_vm2, %v3952_v0 }
 0xbc7   : > { %v2373_v5 = vpop.f32.mrf.mxu1 }
 0xbc8   : > { %v3953_v24 = vpack.c.bf16 %v2373_v5, %v2373_v5 }
 0xbc9   : > { %v4527_v22 = vpop.f32.mrf.mxu1 }
 0xbca   : > { %2386 = vst.msk [vmem:[#allocation3 + $0xc] sm:$0xf] %vm1666_vm2, %v3953_v24 }
 0xc03   : > { %v2475_v8 = vpop.f32.mrf.mxu1 }
 0xc04   : > { %v2476_v11 = vadd.f32 %v6143_v43, %v2475_v8 }
 0xc05   : > { %v4546_v60 = vpop.f32.mrf.mxu1 }
 0xc06   : > { %2482 = vmax.xlane.f32.xlu0 %v2476_v11 }
 0xc07   : > { %v2478_v31 = vpop.f32.mrf.mxu1 }
 0xc08   : > { %v2479_v13 = vadd.f32 %v6143_v43, %v2478_v31 }
 0xc09   : > { %v4547_v46 = vpop.f32.mrf.mxu1 }
 0xc0a   : > { %2484 = vmax.xlane.f32.xlu1 %v2479_v13 }
 0xc1b   : > { %2521 = vrot.lane.b32.xlu1 %v6055_v56, %s5277_s27 }
 0xc1c   : > { %2523 = vrot.lane.b32.xlu0 %v5951_v44, %s5277_s27 }
 0xc1f   : > { %2513 = vrot.lane.b32.xlu1 %v5937_v61, %s5277_s27 }
 0xc20   : > { %2519 = vrot.lane.b32.xlu0 %v5942_v35, %s5277_s27 }
 0xc24   : > { %2517 = vrot.lane.b32.xlu0 %v5945_v29, %s5277_s27 }
 0xc28   : > { %2515 = vrot.lane.b32.xlu0 %v5934_v54, %s5277_s27 }
 0xc2c   : > { %2511 = vrot.lane.b32.xlu0 %v5926_v7, %s5277_s27 }
 0xc30   : > { %2604 = vrot.lane.b32.xlu0 %v5790_v49, %s5278_s3 }
 0xc34   : > { %2600 = vrot.lane.b32.xlu0 %v5779_v20, %s5278_s3 }
 0xc38   : > { %2596 = vrot.lane.b32.xlu0 %v5770_v6, %s5278_s3 }
 0xc3c   : > { %2592 = vrot.lane.b32.xlu0 %v5762_v39, %s5278_s3 }
 0xc40   : > { %2588 = vrot.lane.b32.xlu0 %v5645_v1, %s5278_s3 }
 0xc8f   : > { %v2483_v58 = vpop.xlane.xlu0 %2482 }
 0xc90   : > { %v2486_v25 = vsub.f32 %v2476_v11, %v2483_v58 }
 0xc92   : > { %v2488_v40 = vmul.f32 1.442695, %v2486_v25 }
 0xc93   : > { %v2524_v15 = vpop.permute.xlu0 %2523  ;;  %v2485_v17 = vpop.xlane.xlu1 %2484 }
 0xc94   : > { %4938 = vpow2.f32 %v2488_v40  ;;  %v2487_v10 = vsub.f32 %v2479_v13, %v2485_v17  ;;  %4549 = vmatpush3.bf16.msra.mxu0 %v2524_v15 }
 0xc95   : > { %4550 = vmatprep.subr.bf16.mxu0 %v5275_v36 }
 0xc96   : > { %v2490_v32 = vmul.f32 1.442695, %v2487_v10 }
 0xc97   : > { %v2520_v18 = vpop.permute.xlu0 %2519  ;;  %v2522_v28 = vpop.permute.xlu1 %2521 }
 0xc98   : > { %4940 = vpow2.f32 %v2490_v32  ;;  %4551 = vmatpush3.bf16.msra.mxu0 %v2522_v28 }
 0xc99   : > { %4552 = vmatprep.subr.bf16.mxu0 %v5275_v36 }
 0xc9b   : > { %v2518_v48 = vpop.permute.xlu0 %2517  ;;  %v2514_v47 = vpop.permute.xlu1 %2513 }
 0xc9c   : > { %4553 = vmatpush3.bf16.msra.mxu0 %v2520_v18 }
 0xc9d   : > { %4554 = vmatprep.subr.bf16.mxu0 %v5275_v36 }
 0xc9f   : > { %v2516_v53 = vpop.permute.xlu0 %2515 }
 0xca0   : > { %4555 = vmatpush3.bf16.msra.mxu0 %v2518_v48 }
 0xca1   : > { %v4939_v50 = vpop.eup %4938  ;;  %4556 = vmatprep.subr.bf16.mxu0 %v5275_v36 }
 0xca2   : > { %2492 = vadd.xlane.f32.xlu1 %v4939_v50 }
 0xca3   : > { %v2512_v59 = vpop.permute.xlu0 %2511 }
 0xca4   : > { %4557 = vmatpush3.bf16.msra.mxu0 %v2516_v53 }
 0xca5   : > { %v4941_v55 = vpop.eup %4940  ;;  %4558 = vmatprep.subr.bf16.mxu0 %v5275_v36 }
 0xca6   : > { %2494 = vadd.xlane.f32.xlu1 %v4941_v55 }
 0xca7   : > { %v2605_v3 = vpop.permute.xlu0 %2604 }
 0xca8   : > { %4559 = vmatpush3.bf16.msra.mxu0 %v2514_v47  ;;  %v2631_v38 = vsel %vm1529_vm1, %v2605_v3, 0 }
 0xca9   : > { %4560 = vmatprep.subr.bf16.mxu0 %v5275_v36 }
 0xcab   : > { %v2601_v34 = vpop.permute.xlu0 %2600 }
 0xcac   : > { %4561 = vmatpush3.bf16.msra.mxu0 %v2512_v59  ;;  %v2625_v0 = vsel %vm1529_vm1, %v2601_v34, 0 }
 0xcad   : > { %4562 = vmatprep.subr.bf16.mxu0 %v5275_v36 }
 0xcaf   : > { %v2597_v24 = vpop.permute.xlu0 %2596 }
 0xcb0   : > { %v2619_v22 = vsel %vm1529_vm1, %v2597_v24, 0 }
 0xcb3   : > { %v2593_v60 = vpop.permute.xlu0 %2592 }
 0xcb4   : > { %v2613_v31 = vsel %vm1529_vm1, %v2593_v60, 0 }
 0xcb7   : > { %2509 = vrot.lane.b32.xlu1 %v5929_v12, %s5277_s27  ;;  %v2589_v58 = vpop.permute.xlu0 %2588 }
 0xcbb   : > { %2602 = vrot.lane.b32.xlu1 %v6109_v63, %s5278_s3 }
 0xcbf   : > { %2598 = vrot.lane.b32.xlu1 %v5783_v26, %s5278_s3 }
 0xcc3   : > { %2594 = vrot.lane.b32.xlu1 %v5773_v9, %s5278_s3 }
 0xcc7   : > { %2590 = vrot.lane.b32.xlu1 %v5765_v42, %s5278_s3 }
 0xd2b   : > { %v2493_v52 = vpop.xlane.xlu1 %2492 }
 0xd2c   : > { %4942 = vrcp.f32 %v2493_v52 }
 0xd2f   : > { %v2495_v37 = vpop.xlane.xlu1 %2494 }
 0xd30   : > { %4944 = vrcp.f32 %v2495_v37 }
 0xd33   : > { %v2510_v57 = vpop.permute.xlu1 %2509 }
 0xd34   : > { %4563 = vmatpush3.bf16.msra.mxu0 %v2510_v57 }
 0xd35   : > { %4568 = vmatprep.subr.bf16.mxu0 %v5275_v36 }
 0xd37   : > { %v2603_v51 = vpop.permute.xlu1 %2602 }
 0xd38   : > { %v2628_v45 = vsel %vm1529_vm1, %v2603_v51, 0 }
 0xd39   : > { %v4943_v62 = vpop.eup %4942 }
 0xd3a   : > { %v2498_v30 = vmul.f32 %v4943_v62, %v4939_v50 }
 0xd3b   : > { %v2599_v4 = vpop.permute.xlu1 %2598 }
 0xd3c   : > { %v2622_v5 = vsel %vm1529_vm1, %v2599_v4, 0 }
 0xd3d   : > { %v4945_v23 = vpop.eup %4944 }
 0xd3e   : > { %v2499_v21 = vmul.f32 %v4945_v23, %v4941_v55 }
 0xd3f   : > { %v2595_v8 = vpop.permute.xlu1 %2594 }
 0xd40   : > { %v2500_v19 = vpack.c.bf16 %v2499_v21, %v2498_v30  ;;  %v2616_v11 = vsel %vm1529_vm1, %v2595_v8, 0 }
 0xd42   : > { %4565 = vmatmul.mubr.bf16.vlgmr.msra.gmra.mxu0 %v2500_v19 }
 0xd43   : > { %4569 = vmatpush3.bf16.xpose.msra.mxu0 %v2631_v38  ;;  %4584 = vmatprep.mubr.msk.bf16.mxu0 %vm5276_vm0, %v5275_v36  ;;  %v2591_v13 = vpop.permute.xlu1 %2590 }
 0xd44   : > { %4570 = vmatprep.subr.bf16.mxu0 %v5275_v36  ;;  %v2610_v46 = vsel %vm1529_vm1, %v2591_v13, 0 }
 0xd4b   : > { %4571 = vmatpush3.bf16.xpose.msra.mxu0 %v2628_v45 }
 0xd4c   : > { %4572 = vmatprep.subr.bf16.mxu0 %v5275_v36 }
 0xd53   : > { %4573 = vmatpush3.bf16.xpose.msra.mxu0 %v2625_v0 }
 0xd54   : > { %4574 = vmatprep.subr.bf16.mxu0 %v5275_v36 }
 0xd5b   : > { %4575 = vmatpush3.bf16.xpose.msra.mxu0 %v2622_v5 }
 0xd5c   : > { %4576 = vmatprep.subr.bf16.mxu0 %v5275_v36 }
 0xd63   : > { %4577 = vmatpush3.bf16.xpose.msra.mxu0 %v2619_v22 }
 0xd64   : > { %4578 = vmatprep.subr.bf16.mxu0 %v5275_v36 }
 0xd6b   : > { %4579 = vmatpush3.bf16.xpose.msra.mxu0 %v2616_v11 }
 0xd6c   : > { %4580 = vmatprep.subr.bf16.mxu0 %v5275_v36 }
 0xd73   : > { %4581 = vmatpush3.bf16.xpose.msra.mxu0 %v2613_v31 }
 0xd74   : > { %4582 = vmatprep.subr.bf16.mxu0 %v5275_v36 }
 0xd7b   : > { %4583 = vmatpush3.bf16.xpose.msra.mxu0 %v2610_v46 }
 0xd7c   : > { %4628 = vmatprep.subr.bf16.mxu0 %v5275_v36 }
 0xd82   : > { %4585 = vmatmul.mubr.msk.bf16.vlgmr.msra.gmra.mxu0 %vm1529_vm1, %v2589_v58 }
 0xd83   : > { %4644 = vmatprep.mubr.msk.bf16.mxu0 %vm5276_vm0, %v5275_v36 }
 0xe02   : > { %v6253_v25 = vpop.f32.mrf.mxu0 }
 0xe04   : > { %v4566_v40 = vpop.f32.mrf.mxu0 }
 0xe06   : > { %v6255_v15 = vpop.f32.mrf.mxu0 }
 0xe08   : > { %v4567_v17 = vpop.f32.mrf.mxu0 }
 0xe42   : > { %v2667_v10 = vpop.f32.mrf.mxu0 }
 0xe43   : > { %v2668_v32 = vadd.f32 %v6143_v43, %v2667_v10 }
 0xe44   : > { %v4586_v18 = vpop.f32.mrf.mxu0 }
 0xe45   : > { %2674 = vmax.xlane.f32.xlu1 %v2668_v32 }
 0xe46   : > { %v2670_v28 = vpop.f32.mrf.mxu0 }
 0xe47   : > { %v2671_v48 = vadd.f32 %v6143_v43, %v2670_v28 }
 0xe48   : > { %v4587_v50 = vpop.f32.mrf.mxu0 }
 0xe49   : > { %2676 = vmax.xlane.f32.xlu0 %v2671_v48 }
 0xe56   : > { %2705 = vrot.lane.b32.xlu1 %v6055_v56, %s5278_s3 }
 0xe5a   : > { %2699 = vrot.lane.b32.xlu1 %v5934_v54, %s5278_s3 }
 0xe5e   : > { %2695 = vrot.lane.b32.xlu1 %v5926_v7, %s5278_s3 }
 0xe5f   : > { %2707 = vrot.lane.b32.xlu0 %v5951_v44, %s5278_s3 }
 0xe63   : > { %2703 = vrot.lane.b32.xlu0 %v5942_v35, %s5278_s3 }
 0xe67   : > { %2701 = vrot.lane.b32.xlu0 %v5945_v29, %s5278_s3 }
 0xe6b   : > { %2697 = vrot.lane.b32.xlu0 %v5937_v61, %s5278_s3 }
 0xe6f   : > { %2693 = vrot.lane.b32.xlu0 %v5929_v12, %s5278_s3 }
 0xe73   : > { %2786 = vrot.lane.b32.xlu0 %v6109_v63, %s5279_s28 }
 0xe77   : > { %2782 = vrot.lane.b32.xlu0 %v5783_v26, %s5279_s28 }
 0xe7b   : > { %2778 = vrot.lane.b32.xlu0 %v5773_v9, %s5279_s28 }
 0xe7f   : > { %2774 = vrot.lane.b32.xlu0 %v5765_v42, %s5279_s28 }
 0xece   : > { %v2675_v53 = vpop.xlane.xlu1 %2674 }
 0xecf   : > { %v2678_v55 = vsub.f32 %v2668_v32, %v2675_v53 }
 0xed1   : > { %v2680_v47 = vmul.f32 1.442695, %v2678_v55 }
 0xed2   : > { %v2677_v59 = vpop.xlane.xlu0 %2676  ;;  %v2706_v63 = vpop.permute.xlu1 %2705 }
 0xed3   : > { %4946 = vpow2.f32 %v2680_v47  ;;  %v2679_v52 = vsub.f32 %v2671_v48, %v2677_v59 }
 0xed5   : > { %v2682_v37 = vmul.f32 1.442695, %v2679_v52 }
 0xed6   : > { %v2708_v57 = vpop.permute.xlu0 %2707  ;;  %v2700_v23 = vpop.permute.xlu1 %2699 }
 0xed7   : > { %4948 = vpow2.f32 %v2682_v37  ;;  %4589 = vmatpush3.bf16.msra.mxu1 %v2708_v57 }
 0xed8   : > { %4590 = vmatprep.subr.bf16.mxu1 %v5275_v36 }
 0xeda   : > { %v2704_v26 = vpop.permute.xlu0 %2703  ;;  %v2696_v21 = vpop.permute.xlu1 %2695 }
 0xedb   : > { %4591 = vmatpush3.bf16.msra.mxu1 %v2706_v63 }
 0xedc   : > { %4592 = vmatprep.subr.bf16.mxu1 %v5275_v36 }
 0xede   : > { %v2702_v42 = vpop.permute.xlu0 %2701 }
 0xedf   : > { %4593 = vmatpush3.bf16.msra.mxu1 %v2704_v26 }
 0xee0   : > { %v4947_v9 = vpop.eup %4946  ;;  %4594 = vmatprep.subr.bf16.mxu1 %v5275_v36 }
 0xee1   : > { %2684 = vadd.xlane.f32.xlu1 %v4947_v9 }
 0xee2   : > { %v2698_v30 = vpop.permute.xlu0 %2697 }
 0xee3   : > { %4595 = vmatpush3.bf16.msra.mxu1 %v2702_v42 }
 0xee4   : > { %v4949_v62 = vpop.eup %4948  ;;  %4596 = vmatprep.subr.bf16.mxu1 %v5275_v36 }
 0xee5   : > { %2686 = vadd.xlane.f32.xlu1 %v4949_v62 }
 0xee6   : > { %v2694_v3 = vpop.permute.xlu0 %2693 }
 0xee7   : > { %4597 = vmatpush3.bf16.msra.mxu1 %v2700_v23 }
 0xee8   : > { %4598 = vmatprep.subr.bf16.mxu1 %v5275_v36 }
 0xeeb   : > { %4599 = vmatpush3.bf16.msra.mxu1 %v2698_v30 }
 0xeec   : > { %4600 = vmatprep.subr.bf16.mxu1 %v5275_v36 }
 0xeef   : > { %4601 = vmatpush3.bf16.msra.mxu1 %v2696_v21 }
 0xef0   : > { %4602 = vmatprep.subr.bf16.mxu1 %v5275_v36 }
 0xef3   : > { %4603 = vmatpush3.bf16.msra.mxu1 %v2694_v3 }
 0xef4   : > { %4608 = vmatprep.subr.bf16.mxu1 %v5275_v36 }
 0xef6   : > { %2788 = vrot.lane.b32.xlu1 %v5790_v49, %s5279_s28 }
 0xefa   : > { %2784 = vrot.lane.b32.xlu1 %v5779_v20, %s5279_s28 }
 0xefe   : > { %2780 = vrot.lane.b32.xlu1 %v5770_v6, %s5279_s28 }
 0xf02   : > { %2776 = vrot.lane.b32.xlu1 %v5762_v39, %s5279_s28 }
 0xf06   : > { %2772 = vrot.lane.b32.xlu1 %v5645_v1, %s5279_s28  ;;  %v2787_v1 = vpop.permute.xlu0 %2786 }
 0xf07   : > { %v2812_v39 = vsel %vm1529_vm1, %v2787_v1, 0 }
 0xf0a   : > { %v2783_v24 = vpop.permute.xlu0 %2782 }
 0xf0b   : > { %v2806_v22 = vsel %vm1529_vm1, %v2783_v24, 0 }
 0xf0e   : > { %v2779_v60 = vpop.permute.xlu0 %2778 }
 0xf0f   : > { %v2800_v31 = vsel %vm1529_vm1, %v2779_v60, 0  ;;  %v4852_v60 = vld [vmem:[%s2961_s26 + $0x20] sm:$0xff]  }
 0xf12   : > { %v2775_v58 = vpop.permute.xlu0 %2774 }
 0xf13   : > { %v2794_v40 = vsel %vm1529_vm1, %v2775_v58, 0  ;;  %v4856_v58 = vld [vmem:[%s2961_s26] sm:$0xff]  }
 0xf6a   : > { %v2685_v19 = vpop.xlane.xlu1 %2684 }
 0xf6b   : > { %4950 = vrcp.f32 %v2685_v19 }
 0xf6e   : > { %v2687_v38 = vpop.xlane.xlu1 %2686 }
 0xf6f   : > { %4952 = vrcp.f32 %v2687_v38  ;;  %v3947_v38 = vpack.c.bf16 %v5982_v16, %v5982_v16 }
 0xf72   : > { %v2789_v0 = vpop.permute.xlu1 %2788 }
 0xf73   : > { %v2815_v20 = vsel %vm1529_vm1, %v2789_v0, 0 }
 0xf76   : > { %v2785_v6 = vpop.permute.xlu1 %2784 }
 0xf77   : > { %v2809_v5 = vsel %vm1529_vm1, %v2785_v6, 0 }
 0xf78   : > { %v4951_v51 = vpop.eup %4950 }
 0xf79   : > { %v2690_v34 = vmul.f32 %v4951_v51, %v4947_v9  ;;  %v3955_v51 = vpack.c.bf16 %v6255_v15, %v6255_v15 }
 0xf7a   : > { %v2781_v8 = vpop.permute.xlu1 %2780 }
 0xf7b   : > { %v2803_v11 = vsel %vm1529_vm1, %v2781_v8, 0  ;;  %v4850_v8 = vld [vmem:[%s2961_s26 + $0x30] sm:$0xff]  }
 0xf7c   : > { %v4953_v45 = vpop.eup %4952 }
 0xf7d   : > { %v2691_v49 = vmul.f32 %v4953_v45, %v4949_v62 }
 0xf7e   : > { %v2777_v13 = vpop.permute.xlu1 %2776 }
 0xf7f   : > { %v2692_v4 = vpack.c.bf16 %v2691_v49, %v2690_v34  ;;  %v2797_v46 = vsel %vm1529_vm1, %v2777_v13, 0  ;;  %v4854_v13 = vld [vmem:[%s2961_s26 + $0x10] sm:$0xff]  }
 0xf81   : > { %4605 = vmatmul.mubr.bf16.vlgmr.msra.gmra.mxu1 %v2692_v4 }
 0xf82   : > { %4609 = vmatpush3.bf16.xpose.msra.mxu1 %v2815_v20  ;;  %4624 = vmatprep.mubr.msk.bf16.mxu1 %vm5276_vm0, %v5275_v36  ;;  %v2773_v17 = vpop.permute.xlu1 %2772 }
 0xf83   : > { %4610 = vmatprep.subr.bf16.mxu1 %v5275_v36 }
 0xf8a   : > { %4611 = vmatpush3.bf16.xpose.msra.mxu1 %v2812_v39 }
 0xf8b   : > { %4612 = vmatprep.subr.bf16.mxu1 %v5275_v36 }
 0xf92   : > { %4613 = vmatpush3.bf16.xpose.msra.mxu1 %v2809_v5 }
 0xf93   : > { %4614 = vmatprep.subr.bf16.mxu1 %v5275_v36 }
 0xf9a   : > { %4615 = vmatpush3.bf16.xpose.msra.mxu1 %v2806_v22  ;;  %v4849_v22 = vld [vmem:[%s2961_s26 + $0x38] sm:$0xff]  }
 0xf9b   : > { %4616 = vmatprep.subr.bf16.mxu1 %v5275_v36 }
 0xfa2   : > { %4617 = vmatpush3.bf16.xpose.msra.mxu1 %v2803_v11  ;;  %v4851_v11 = vld [vmem:[%s2961_s26 + $0x28] sm:$0xff]  }
 0xfa3   : > { %4618 = vmatprep.subr.bf16.mxu1 %v5275_v36 }
 0xfaa   : > { %4619 = vmatpush3.bf16.xpose.msra.mxu1 %v2800_v31  ;;  %v4853_v31 = vld [vmem:[%s2961_s26 + $0x18] sm:$0xff]  }
 0xfab   : > { %4620 = vmatprep.subr.bf16.mxu1 %v5275_v36 }
 0xfb2   : > { %4621 = vmatpush3.bf16.xpose.msra.mxu1 %v2797_v46  ;;  %v4855_v46 = vld [vmem:[%s2961_s26 + $0x8] sm:$0xff]  }
 0xfb3   : > { %4622 = vmatprep.subr.bf16.mxu1 %v5275_v36 }
 0xfba   : > { %4623 = vmatpush3.bf16.xpose.msra.mxu1 %v2794_v40 }
 0xfc1   : > { %4625 = vmatmul.mubr.msk.bf16.vlgmr.msra.gmra.mxu1 %vm1529_vm1, %v2773_v17 }
0x1041   : > { %v2751_v10 = vpop.f32.mrf.mxu1 }
0x1043   : > { %v4606_v32 = vpop.f32.mrf.mxu1 }
0x1045   : > { %v6319_v18 = vpop.f32.mrf.mxu1 }
0x1046   : > { %v3957_v16 = vpack.c.bf16 %v6319_v18, %v6319_v18 }
0x1047   : > { %v4607_v28 = vpop.f32.mrf.mxu1 }
0x1081   : > { %v2851_v48 = vpop.f32.mrf.mxu1 }
0x1082   : > { %v2852_v50 = vadd.f32 %v6143_v43, %v2851_v48 }
0x1083   : > { %v4626_v53 = vpop.f32.mrf.mxu1 }
0x1084   : > { %2858 = vmax.xlane.f32.xlu0 %v2852_v50 }
0x1085   : > { %v2854_v55 = vpop.f32.mrf.mxu1 }
0x1086   : > { %v2855_v47 = vadd.f32 %v6143_v43, %v2854_v55 }
0x1087   : > { %v4627_v59 = vpop.f32.mrf.mxu1 }
0x1088   : > { %2860 = vmax.xlane.f32.xlu1 %v2855_v47 }
0x1099   : > { %2889 = vrot.lane.b32.xlu1 %v6055_v56, %s5279_s28  ;;  %v3946_v56 = vpack.c.bf16 %v5980_v14, %v5980_v14 }
0x109a   : > { %2891 = vrot.lane.b32.xlu0 %v5951_v44, %s5279_s28 }
0x109d   : > { %2881 = vrot.lane.b32.xlu1 %v5937_v61, %s5279_s28  ;;  %v3948_v61 = vpack.c.bf16 %v6071_v2, %v6071_v2 }
0x109e   : > { %2887 = vrot.lane.b32.xlu0 %v5942_v35, %s5279_s28  ;;  %v3954_v35 = vpack.c.bf16 %v6253_v25, %v6253_v25 }
0x10a2   : > { %2885 = vrot.lane.b32.xlu0 %v5945_v29, %s5279_s28 }
0x10a6   : > { %2883 = vrot.lane.b32.xlu0 %v5934_v54, %s5279_s28  ;;  %v3950_v54 = vpack.c.bf16 %v6136_v33, %v6136_v33 }
0x10aa   : > { %2879 = vrot.lane.b32.xlu0 %v5926_v7, %s5279_s28  ;;  %v3956_v7 = vpack.c.bf16 %v2751_v10, %v2751_v10 }
0x10ae   : > { %1862 = vrot.lane.b32.xlu0 %v3946_v56, %s5279_s28 }
0x10b2   : > { %2047 = vrot.lane.b32.xlu0 %v3948_v61, %s5278_s3 }
0x10b6   : > { %2580 = vrot.lane.b32.xlu0 %v3954_v35, %s5279_s28 }
0x10ba   : > { %2232 = vrot.lane.b32.xlu0 %v3950_v54, %s5277_s27  ;;  %v4979_v54 = vld [vmem:[#allocation2 + $0x10] sm:$0xff] }
0x10be   : > { %2764 = vrot.lane.b32.xlu0 %v3956_v7, %s5278_s3 }
0x110d   : > { %v2859_v29 = vpop.xlane.xlu0 %2858 }
0x110e   : > { %v2862_v44 = vsub.f32 %v2852_v50, %v2859_v29 }
0x1110   : > { %v2864_v14 = vmul.f32 1.442695, %v2862_v44 }
0x1111   : > { %v2892_v43 = vpop.permute.xlu0 %2891  ;;  %v2861_v2 = vpop.xlane.xlu1 %2860 }
0x1112   : > { %4954 = vpow2.f32 %v2864_v14  ;;  %v2863_v52 = vsub.f32 %v2855_v47, %v2861_v2  ;;  %4629 = vmatpush3.bf16.msra.mxu0 %v2892_v43  ;;  %v3884_v47 = vld [vmem:[%s2978_s21] ss:$0 sm:$0xff]  ;;  %v4980_v14 = vld [vmem:[#allocation2 + $0x18] sm:$0xff] }
0x1113   : > { %4630 = vmatprep.subr.bf16.mxu0 %v5275_v36 }
0x1114   : > { %v2866_v25 = vmul.f32 1.442695, %v2863_v52  ;;  %v4981_v52 = vld [vmem:[#allocation2] sm:$0xff] }
0x1115   : > { %v2888_v37 = vpop.permute.xlu0 %2887  ;;  %v2890_v57 = vpop.permute.xlu1 %2889 }
0x1116   : > { %4956 = vpow2.f32 %v2866_v25  ;;  %4631 = vmatpush3.bf16.msra.mxu0 %v2890_v57 }
0x1117   : > { %4632 = vmatprep.subr.bf16.mxu0 %v5275_v36 }
0x1119   : > { %v2886_v33 = vpop.permute.xlu0 %2885  ;;  %v2882_v62 = vpop.permute.xlu1 %2881 }
0x111a   : > { %4633 = vmatpush3.bf16.msra.mxu0 %v2888_v37  ;;  %v4982_v37 = vld [vmem:[#allocation2 + $0x8] sm:$0xff] }
0x111b   : > { %4634 = vmatprep.subr.bf16.mxu0 %v5275_v36 }
0x111d   : > { %v2884_v63 = vpop.permute.xlu0 %2883 }
0x111e   : > { %4635 = vmatpush3.bf16.msra.mxu0 %v2886_v33 }
0x111f   : > { %v4955_v26 = vpop.eup %4954  ;;  %4636 = vmatprep.subr.bf16.mxu0 %v5275_v36 }
0x1120   : > { %2868 = vadd.xlane.f32.xlu1 %v4955_v26 }
0x1121   : > { %v2880_v9 = vpop.permute.xlu0 %2879 }
0x1122   : > { %4637 = vmatpush3.bf16.msra.mxu0 %v2884_v63 }
0x1123   : > { %v4957_v42 = vpop.eup %4956  ;;  %4638 = vmatprep.subr.bf16.mxu0 %v5275_v36 }
0x1124   : > { %2870 = vadd.xlane.f32.xlu1 %v4957_v42 }
0x1125   : > { %v1863_v23 = vpop.permute.xlu0 %1862 }
0x1126   : > { %1869 = vst.msk [vmem:[#allocation3] sm:$0xf] %vm1868_vm3, %v1863_v23  ;;  %4639 = vmatpush3.bf16.msra.mxu0 %v2882_v62 }
0x1127   : > { %4640 = vmatprep.subr.bf16.mxu0 %v5275_v36 }
0x1129   : > { %v2048_v30 = vpop.permute.xlu0 %2047 }
0x112a   : > { %2054 = vst.msk [vmem:[#allocation3] sm:$0xf] %vm2053_vm4, %v2048_v30  ;;  %4641 = vmatpush3.bf16.msra.mxu0 %v2880_v9 }
0x112b   : > { %4642 = vmatprep.subr.bf16.mxu0 %v5275_v36  ;;  %v3949_v36 = vpack.c.bf16 %v6073_v41, %v6073_v41 }
0x112d   : > { %v2581_v21 = vpop.permute.xlu0 %2580 }
0x112e   : > { %2586 = vst.msk [vmem:[#allocation3 + $0x8] sm:$0xf] %vm1868_vm3, %v2581_v21 }
0x1131   : > { %v2233_v3 = vpop.permute.xlu0 %2232 }
0x1132   : > { %2239 = vst.msk [vmem:[#allocation3] sm:$0xf] %vm2238_vm5, %v2233_v3 }
0x1135   : > { %v2765_v19 = vpop.permute.xlu0 %2764  ;;  %2877 = vrot.lane.b32.xlu1 %v5929_v12, %s5279_s28  ;;  %v3951_v12 = vpack.c.bf16 %v6138_v27, %v6138_v27 }
0x1136   : > { %2770 = vst.msk [vmem:[#allocation3 + $0x8] sm:$0xf] %vm2053_vm4, %v2765_v19 }
0x1139   : > { %1864 = vrot.lane.b32.xlu1 %v3947_v38, %s5279_s28 }
0x113d   : > { %2049 = vrot.lane.b32.xlu1 %v3949_v36, %s5278_s3 }
0x1141   : > { %2582 = vrot.lane.b32.xlu1 %v3955_v51, %s5279_s28  ;;  %s3101_s28 = scalar_lea.vmem %s6531_s12, %s5253_s0 }
0x1145   : > { %2234 = vrot.lane.b32.xlu1 %v3951_v12, %s5277_s27 }
0x1149   : > { %2766 = vrot.lane.b32.xlu1 %v3957_v16, %s5278_s3 }
0x11a9   : > { %v2869_v45 = vpop.xlane.xlu1 %2868 }
0x11aa   : > { %4958 = vrcp.f32 %v2869_v45 }
0x11ad   : > { %v2871_v41 = vpop.xlane.xlu1 %2870 }
0x11ae   : > { %4960 = vrcp.f32 %v2871_v41 }
0x11b1   : > { %v2878_v34 = vpop.permute.xlu1 %2877 }
0x11b2   : > { %4643 = vmatpush3.bf16.msra.mxu0 %v2878_v34 }
0x11b3   : > { %4648 = vmatprep.subr.bf16.mxu0 %v4849_v22 }
0x11b5   : > { %v1865_v49 = vpop.permute.xlu1 %1864 }
0x11b6   : > { %1870 = vst.msk [vmem:[#allocation3 + $0x4] sm:$0xf] %vm1868_vm3, %v1865_v49 }
0x11b7   : > { %v4959_v15 = vpop.eup %4958 }
0x11b8   : > { %v2874_v4 = vmul.f32 %v4959_v15, %v4955_v26 }
0x11b9   : > { %v2050_v0 = vpop.permute.xlu1 %2049 }
0x11ba   : > { %2055 = vst.msk [vmem:[#allocation3 + $0x4] sm:$0xf] %vm2053_vm4, %v2050_v0 }
0x11bb   : > { %v4961_v27 = vpop.eup %4960 }
0x11bc   : > { %v2875_v20 = vmul.f32 %v4961_v27, %v4957_v42 }
0x11bd   : > { %v2583_v1 = vpop.permute.xlu1 %2582 }
0x11be   : > { %2587 = vst.msk [vmem:[#allocation3 + $0xc] sm:$0xf] %vm1868_vm3, %v2583_v1  ;;  %v2876_v39 = vpack.c.bf16 %v2875_v20, %v2874_v4 }
0x11c0   : > { %4645 = vmatmul.mubr.bf16.vlgmr.msra.gmra.mxu0 %v2876_v39 }
0x11c1   : > { %v2235_v6 = vpop.permute.xlu1 %2234  ;;  %4649 = vmatpush3.bf16.msra.mxu0 %v4849_v22 }
0x11c2   : > { %2240 = vst.msk [vmem:[#allocation3 + $0x4] sm:$0xf] %vm2238_vm5, %v2235_v6  ;;  %4650 = vmatprep.subr.bf16.mxu0 %v4850_v8  ;;  %v5280_v6 = vmov 0  }
0x11c3   : > { %3315 = vmatprep.mubr.bf16.mxu1 %v5280_v6 }
0x11c5   : > { %v2767_v5 = vpop.permute.xlu1 %2766  ;;  %4651 = vmatpush3.bf16.msra.mxu0 %v4850_v8 }
0x11c6   : > { %2771 = vst.msk [vmem:[#allocation3 + $0xc] sm:$0xf] %vm2053_vm4, %v2767_v5  ;;  %4652 = vmatprep.subr.bf16.mxu0 %v4851_v11 }
0x11c9   : > { %v4848_v24 = vld [vmem:[#allocation3] sm:$0xff]   ;;  %4653 = vmatpush3.bf16.msra.mxu0 %v4851_v11 }
0x11ca   : > { %4664 = vmatprep.mubr.bf16.mxu0 %v4848_v24  ;;  %4654 = vmatprep.subr.bf16.mxu0 %v4852_v60 }
0x11cd   : > { %4655 = vmatpush3.bf16.msra.mxu0 %v4852_v60 }
0x11ce   : > { %4656 = vmatprep.subr.bf16.mxu0 %v4853_v31 }
0x11d1   : > { %4657 = vmatpush3.bf16.msra.mxu0 %v4853_v31 }
0x11d2   : > { %4658 = vmatprep.subr.bf16.mxu0 %v4854_v13 }
0x11d5   : > { %4659 = vmatpush3.bf16.msra.mxu0 %v4854_v13 }
0x11d6   : > { %4660 = vmatprep.subr.bf16.mxu0 %v4855_v46 }
0x11d9   : > { %4661 = vmatpush3.bf16.msra.mxu0 %v4855_v46 }
0x11da   : > { %4662 = vmatprep.subr.bf16.mxu0 %v4856_v58 }
0x11dd   : > { %4663 = vmatpush3.bf16.msra.mxu0 %v4856_v58 }
0x1280   : > { %v2935_v40 = vpop.f32.mrf.mxu0 }
0x1281   : > { %v3958_v17 = vpack.c.bf16 %v2935_v40, %v2935_v40 }
0x1282   : > { %v4646_v10 = vpop.f32.mrf.mxu0 }
0x1283   : > { %2948 = vrot.lane.b32.xlu0 %v3958_v17, %s5277_s27 }
0x1284   : > { %v2938_v32 = vpop.f32.mrf.mxu0 }
0x1285   : > { %v3959_v18 = vpack.c.bf16 %v2938_v32, %v2938_v32 }
0x1286   : > { %v4647_v28 = vpop.f32.mrf.mxu0 }
0x1287   : > { %2950 = vrot.lane.b32.xlu1 %v3959_v18, %s5277_s27  ;;  %s3961_s27 = sshll.u32 %s5253_s0, 7 }
0x1288   : > { %s6394_s9 = scalar_lea.vmem [#allocation15], %s3961_s27  ;;  %s6398_s4 = scalar_lea.vmem [#allocation16], %s3961_s27 }
0x1289   : > { %v4858_v33 = vld [vmem:[%s6394_s9 + $0x70] ss:$8 sps:$4 sm:$0xff]   ;;  %v4860_v63 = vld [vmem:[%s6394_s9 + $0x74] ss:$8 sps:$4 sm:$0xff]   ;;  %v4863_v34 = vld [vmem:[%s6394_s9 + $0x64] ss:$8 sps:$4 sm:$0xff]   ;;  %s3382_s27 = scalar_lea.vmem %s6535_s16, %s5253_s0 }
0x128a   : > { %3283 = vmatprep.subr.bf16.mxu1 %v4860_v63  ;;  %v4861_v49 = vld [vmem:[%s6394_s9 + $0x60] ss:$8 sps:$4 sm:$0xff]   ;;  %v4866_v15 = vld [vmem:[%s6394_s9 + $0x54] ss:$8 sps:$4 sm:$0xff]   ;;  %v4864_v0 = vld [vmem:[%s6394_s9 + $0x50] ss:$8 sps:$4 sm:$0xff]  }
0x128b   : > { %3284 = vmatpush1.bf16.msra.mxu1 %v4858_v33  ;;  %v4869_v27 = vld [vmem:[%s6394_s9 + $0x44] ss:$8 sps:$4 sm:$0xff]   ;;  %v4867_v4 = vld [vmem:[%s6394_s9 + $0x40] ss:$8 sps:$4 sm:$0xff]   ;;  %v4870_v20 = vld [vmem:[%s6394_s9 + $0x30] ss:$8 sps:$4 sm:$0xff]  }
0x128c   : > { %3285 = vmatprep.subr.bf16.mxu1 %v4863_v34  ;;  %v4872_v1 = vld [vmem:[%s6394_s9 + $0x34] ss:$8 sps:$4 sm:$0xff]   ;;  %v4875_v39 = vld [vmem:[%s6394_s9 + $0x24] ss:$8 sps:$4 sm:$0xff]   ;;  %v4873_v5 = vld [vmem:[%s6394_s9 + $0x20] ss:$8 sps:$4 sm:$0xff]  }
0x128d   : > { %v4878_v24 = vld [vmem:[%s6394_s9 + $0x14] ss:$8 sps:$4 sm:$0xff]   ;;  %v4876_v22 = vld [vmem:[%s6394_s9 + $0x10] ss:$8 sps:$4 sm:$0xff]   ;;  %v4881_v8 = vld [vmem:[%s6394_s9 + $0x4] ss:$8 sps:$4 sm:$0xff]  }
0x128e   : > { %v4879_v11 = vld [vmem:[%s6394_s9] ss:$8 sps:$4 sm:$0xff]   ;;  %v4882_v60 = vld [vmem:[%s6398_s4 + $0x78] sm:$0xff]   ;;  %v4884_v13 = vld [vmem:[%s6398_s4 + $0x70] sm:$0xff]  }
0x128f   : > { %3286 = vmatpush1.bf16.msra.mxu1 %v4861_v49  ;;  %v4883_v31 = vld [vmem:[%s6398_s4 + $0x38] sm:$0xff]   ;;  %4184 = vmatprep.subr.bf16.mxu0 %v4882_v60  ;;  %v4885_v46 = vld [vmem:[%s6398_s4 + $0x30] sm:$0xff]   ;;  %v4886_v58 = vld [vmem:[%s6398_s4 + $0x68] sm:$0xff]  }
0x1290   : > { %3287 = vmatprep.subr.bf16.mxu1 %v4866_v15  ;;  %v4887_v40 = vld [vmem:[%s6398_s4 + $0x28] sm:$0xff]   ;;  %v4888_v17 = vld [vmem:[%s6398_s4 + $0x60] sm:$0xff]   ;;  %v4890_v32 = vld [vmem:[%s6398_s4 + $0x58] sm:$0xff]  }
0x1291   : > { %v4889_v10 = vld [vmem:[%s6398_s4 + $0x20] sm:$0xff]   ;;  %v4891_v18 = vld [vmem:[%s6398_s4 + $0x18] sm:$0xff]  }
0x1293   : > { %3288 = vmatpush1.bf16.msra.mxu1 %v4864_v0  ;;  %v3191_v0 = vld [vmem:[%s3190_s22] sm:$0x3] }
0x1294   : > { %3289 = vmatprep.subr.bf16.mxu1 %v4869_v27 }
0x1297   : > { %3290 = vmatpush1.bf16.msra.mxu1 %v4867_v4 }
0x1298   : > { %3291 = vmatprep.subr.bf16.mxu1 %v4872_v1 }
0x129b   : > { %3292 = vmatpush1.bf16.msra.mxu1 %v4870_v20 }
0x129c   : > { %3293 = vmatprep.subr.bf16.mxu1 %v4875_v39 }
0x129f   : > { %3294 = vmatpush1.bf16.msra.mxu1 %v4873_v5 }
0x12a0   : > { %3295 = vmatprep.subr.bf16.mxu1 %v4878_v24 }
0x12a3   : > { %3296 = vmatpush1.bf16.msra.mxu1 %v4876_v22 }
0x12a4   : > { %3297 = vmatprep.subr.bf16.mxu1 %v4881_v8 }
0x12a7   : > { %3298 = vmatpush1.bf16.msra.mxu1 %v4879_v11 }
0x12a8   : > { %4668 = vmatprep.subr.bf16.mxu1 %v4882_v60 }
0x12f5   : > { %v2949_v48 = vpop.permute.xlu0 %2948 }
0x12f6   : > { %2954 = vst.msk [vmem:[#allocation3 + $0x8] sm:$0xf] %vm2238_vm5, %v2949_v48 }
0x12f9   : > { %v2951_v50 = vpop.permute.xlu1 %2950 }
0x12fa   : > { %2955 = vst.msk [vmem:[#allocation3 + $0xc] sm:$0xf] %vm2238_vm5, %v2951_v50 }
0x1301   : > { %v4857_v53 = vld [vmem:[#allocation3 + $0x8] sm:$0xff]  }
0x1302   : > { %4665 = vmatmul.mubr.bf16.vlgmr.msra.gmra.mxu0 %v4857_v53 }
0x1303   : > { %4185 = vmatpush3.bf16.msra.mxu0 %v4883_v31 }
0x1304   : > { %4186 = vmatprep.subr.bf16.mxu0 %v4884_v13 }
0x1307   : > { %4187 = vmatpush3.bf16.msra.mxu0 %v4885_v46 }
0x1308   : > { %4188 = vmatprep.subr.bf16.mxu0 %v4886_v58 }
0x130b   : > { %4189 = vmatpush3.bf16.msra.mxu0 %v4887_v40 }
0x130c   : > { %4190 = vmatprep.subr.bf16.mxu0 %v4888_v17 }
0x130f   : > { %4191 = vmatpush3.bf16.msra.mxu0 %v4889_v10 }
0x1310   : > { %4192 = vmatprep.subr.bf16.mxu0 %v4890_v32 }
0x1313   : > { %4193 = vmatpush3.bf16.msra.mxu0 %v4891_v18 }
0x13c2   : > { %v4666_v55 = vpop.f32.mrf.mxu0 }
0x13c3   : > { %v3089_v35 = vadd.f32 %v4666_v55, %v3884_v47 }
0x13c4   : > { %v3080_v59 = vpop.f32.mrf.mxu0 }
0x13c5   : > { %v3081_v56 = vadd.f32 %v3884_v47, %v3080_v59  ;;  %v3097_v43 = vadd.f32 %v4980_v14, %v3089_v35  ;;  %v3895_v14 = vld [vmem:[%s3099_s20] ss:$0 sm:$0xff] }
0x13c6   : > { %v4667_v61 = vpop.f32.mrf.mxu0 }
0x13c7   : > { %v3095_v7 = vadd.f32 %v4979_v54, %v3081_v56  ;;  %v3092_v2 = vadd.f32 %v4667_v61, %v3884_v47 }
0x13c8   : > { %v3083_v29 = vpop.f32.mrf.mxu0 }
0x13c9   : > { %v3084_v44 = vadd.f32 %v3884_v47, %v3083_v29  ;;  %3103 = vadd.xlane.f32.xlu0 %v3095_v7  ;;  %v3098_v57 = vadd.f32 %v4982_v37, %v3092_v2  ;;  %v3896_v37 = vld [vmem:[%s3101_s28] ss:$0 sm:$0xff] }
0x13cb   : > { %v3096_v25 = vadd.f32 %v4981_v52, %v3084_v44 }
0x13cd   : > { %3105 = vadd.xlane.f32.xlu1 %v3096_v25  ;;  %3107 = vadd.xlane.f32.xlu0 %v3097_v43 }
0x13d1   : > { %3109 = vadd.xlane.f32.xlu0 %v3098_v57 }
0x1452   : > { %v3104_v26 = vpop.xlane.xlu0 %3103 }
0x1453   : > { %v3112_v9 = vmul.f32 0.0078125, %v3104_v26 }
0x1455   : > { %v6400_v42 = vsub.f32 %v3095_v7, %v3112_v9 }
0x1456   : > { %v3106_v62 = vpop.xlane.xlu1 %3105  ;;  %v3108_v23 = vpop.xlane.xlu0 %3107 }
0x1457   : > { %v3113_v30 = vmul.f32 0.0078125, %v3106_v62  ;;  %v3114_v21 = vmul.f32 0.0078125, %v3108_v23  ;;  %v3120_v3 = vmul.f32 %v6400_v42, %v6400_v42 }
0x1459   : > { %v6404_v19 = vsub.f32 %v3096_v25, %v3113_v30  ;;  %v6406_v38 = vsub.f32 %v3097_v43, %v3114_v21  ;;  %3124 = vadd.xlane.f32.xlu1 %v3120_v3 }
0x145a   : > { %v3110_v36 = vpop.xlane.xlu0 %3109 }
0x145b   : > { %v3115_v51 = vmul.f32 0.0078125, %v3110_v36  ;;  %v3121_v12 = vmul.f32 %v6404_v19, %v6404_v19  ;;  %v3122_v16 = vmul.f32 %v6406_v38, %v6406_v38  ;;  %v4893_v36 = vld [vmem:[%s6398_s4 + $0x10] sm:$0xff]  }
0x145d   : > { %v6412_v45 = vsub.f32 %v3098_v57, %v3115_v51  ;;  %3126 = vadd.xlane.f32.xlu0 %v3121_v12  ;;  %3128 = vadd.xlane.f32.xlu1 %v3122_v16  ;;  %v4894_v51 = vld [vmem:[%s6398_s4 + $0x48] sm:$0xff]   ;;  %v4896_v16 = vld [vmem:[%s6398_s4 + $0x40] sm:$0xff]  }
0x145e   : > { %v4895_v12 = vld [vmem:[%s6398_s4 + $0x8] sm:$0xff]  }
0x145f   : > { %v3123_v41 = vmul.f32 %v6412_v45, %v6412_v45 }
0x1461   : > { %3130 = vadd.xlane.f32.xlu0 %v3123_v41  ;;  %v3193_v41 = vlaneseq }
0x1463   : > { %v3194_v34 = vshrl.u32 %v3193_v41, 7 }
0x1465   : > { %v3199_v49 = vsub.s32 1, %v3194_v34  ;;  %v3195_v15 = vsub.s32 0, %v3194_v34 }
0x1467   : > { %v3200_v4 = vrot.slane %v3191_v0, %v3199_v49  ;;  %v3196_v20 = vrot.slane %v3191_v0, %v3195_v15 }
0x14e2   : > { %v3125_v28 = vpop.xlane.xlu1 %3124 }
0x14e3   : > { %v3132_v48 = vmul.f32 0.0078125, %v3125_v28 }
0x14e5   : > { %v3136_v50 = vadd.f32 1e-05, %v3132_v48 }
0x14e6   : > { %v3129_v53 = vpop.xlane.xlu1 %3128  ;;  %v3127_v55 = vpop.xlane.xlu0 %3126 }
0x14e7   : > { %4962 = vrsqrt.f32 %v3136_v50  ;;  %v3134_v47 = vmul.f32 0.0078125, %v3129_v53  ;;  %v3133_v59 = vmul.f32 0.0078125, %v3127_v55 }
0x14e9   : > { %v3137_v56 = vadd.f32 1e-05, %v3133_v59  ;;  %v3138_v61 = vadd.f32 1e-05, %v3134_v47 }
0x14ea   : > { %v3131_v35 = vpop.xlane.xlu0 %3130 }
0x14eb   : > { %v3135_v54 = vmul.f32 0.0078125, %v3131_v35  ;;  %4964 = vrsqrt.f32 %v3137_v56 }
0x14ec   : > { %4966 = vrsqrt.f32 %v3138_v61 }
0x14ed   : > { %v3139_v7 = vadd.f32 1e-05, %v3135_v54  ;;  %v3917_v54 = vld [vmem:[%s3382_s27] ss:$0 sm:$0xff] }
0x14ef   : > { %4968 = vrsqrt.f32 %v3139_v7 }
0x14f4   : > { %v4963_v29 = vpop.eup %4962 }
0x14f5   : > { %v3144_v44 = vmul.f32 %v4963_v29, %v6400_v42 }
0x14f7   : > { %v3154_v52 = vmul.f32 %v3895_v14, %v3144_v44 }
0x14f8   : > { %v4965_v43 = vpop.eup %4964 }
0x14f9   : > { %v3145_v2 = vmul.f32 %v4965_v43, %v6404_v19  ;;  %v4967_v25 = vpop.eup %4966  ;;  %v6452_v26 = vadd.f32 %v3896_v37, %v3154_v52 }
0x14fa   : > { %v3146_v42 = vmul.f32 %v4967_v25, %v6406_v38  ;;  %v4892_v38 = vld [vmem:[%s6398_s4 + $0x50] sm:$0xff]  }
0x14fb   : > { %v3155_v33 = vmul.f32 %v3895_v14, %v3145_v2  ;;  %4194 = vmatprep.subr.bf16.mxu0 %v4892_v38 }
0x14fc   : > { %v4969_v57 = vpop.eup %4968  ;;  %v3156_v30 = vmul.f32 %v3895_v14, %v3146_v42  ;;  %4195 = vmatpush3.bf16.msra.mxu0 %v4893_v36 }
0x14fd   : > { %v3147_v63 = vmul.f32 %v4969_v57, %v6412_v45  ;;  %v6454_v9 = vadd.f32 %v3896_v37, %v3155_v33  ;;  %4196 = vmatprep.subr.bf16.mxu0 %v4894_v51  ;;  %v4897_v45 = vld [vmem:[%s6398_s4] sm:$0xff]  }
0x14fe   : > { %v6462_v3 = vadd.f32 %v3896_v37, %v3156_v30 }
0x14ff   : > { %v3168_v62 = vpack.c.bf16 %v6454_v9, %v6452_v26  ;;  %v3157_v23 = vmul.f32 %v3895_v14, %v3147_v63 }
0x1500   : > { %4197 = vmatpush3.bf16.msra.mxu0 %v4895_v12 }
0x1501   : > { %3316 = vmatmul.mubr.bf16.vlgmr.msra.gmra.mxu1 %v3168_v62  ;;  %v6460_v21 = vadd.f32 %v3896_v37, %v3157_v23  ;;  %4198 = vmatprep.subr.bf16.mxu0 %v4896_v16 }
0x1502   : > { %3325 = vmatprep.mubr.bf16.mxu1 %v5280_v6  ;;  %4676 = vmatpush3.bf16.msra.mxu1 %v4883_v31 }
0x1503   : > { %4669 = vmatprep.subr.bf16.mxu1 %v4884_v13  ;;  %v3169_v19 = vpack.c.bf16 %v6460_v21, %v6462_v3 }
0x1504   : > { %4199 = vmatpush3.bf16.msra.mxu0 %v4897_v45 }
0x1506   : > { %4677 = vmatpush3.bf16.msra.mxu1 %v4885_v46 }
0x1507   : > { %4670 = vmatprep.subr.bf16.mxu1 %v4886_v58 }
0x1509   : > { %3326 = vmatmul.mubr.bf16.gmra.mxu1 %v3169_v19 }
0x150a   : > { %4678 = vmatpush3.bf16.msra.mxu1 %v4887_v40 }
0x150b   : > { %4671 = vmatprep.subr.bf16.mxu1 %v4888_v17 }
0x150e   : > { %4679 = vmatpush3.bf16.msra.mxu1 %v4889_v10 }
0x150f   : > { %4672 = vmatprep.subr.bf16.mxu1 %v4890_v32 }
0x1512   : > { %4680 = vmatpush3.bf16.msra.mxu1 %v4891_v18 }
0x1513   : > { %4673 = vmatprep.subr.bf16.mxu1 %v4892_v38 }
0x1516   : > { %4681 = vmatpush3.bf16.msra.mxu1 %v4893_v36 }
0x1517   : > { %4674 = vmatprep.subr.bf16.mxu1 %v4894_v51 }
0x151a   : > { %4682 = vmatpush3.bf16.msra.mxu1 %v4895_v12 }
0x151b   : > { %4675 = vmatprep.subr.bf16.mxu1 %v4896_v16 }
0x151e   : > { %4683 = vmatpush3.bf16.msra.mxu1 %v4897_v45 }
0x15c1   : > { %v3317_v27 = vpop.f32.mrf.mxu1 }
0x15c2   : > { %v3318_v24 = vadd.f32 %v3317_v27, %v3196_v20 }
0x15c3   : > { %v3319_v1 = vpop.f32.mrf.mxu1 }
0x15c4   : > { %v3320_v6 = vadd.f32 %v3319_v1, %v3200_v4  ;;  %v3336_v46 = vmax.f32 %v3318_v24, 0.0 }
0x15c5   : > { %v3321_v39 = vpop.f32.mrf.mxu1 }
0x15c6   : > { %v3322_v5 = vadd.f32 %v3321_v39, %v3196_v20  ;;  %v3337_v31 = vmax.f32 %v3320_v6, 0.0 }
0x15c7   : > { %v3323_v22 = vpop.f32.mrf.mxu1 }
0x15c8   : > { %v3324_v8 = vadd.f32 %v3323_v22, %v3200_v4  ;;  %v3338_v11 = vmax.f32 %v3322_v5, 0.0 }
0x15c9   : > { %v3327_v60 = vpop.f32.mrf.mxu1 }
0x15ca   : > { %v3339_v13 = vmax.f32 %v3324_v8, 0.0  ;;  %v3344_v17 = vpack.c.bf16 %v3338_v11, %v3336_v46  ;;  %v3328_v28 = vadd.f32 %v3327_v60, %v3196_v20 }
0x15cb   : > { %v3329_v58 = vpop.f32.mrf.mxu1 }
0x15cc   : > { %v3345_v40 = vpack.c.bf16 %v3339_v13, %v3337_v31  ;;  %v3330_v32 = vadd.f32 %v3329_v58, %v3200_v4  ;;  %v3340_v59 = vmax.f32 %v3328_v28, 0.0 }
0x15cd   : > { %v3331_v10 = vpop.f32.mrf.mxu1 }
0x15ce   : > { %v3332_v18 = vadd.f32 %v3331_v10, %v3196_v20  ;;  %3518 = vmatprep.mubr.bf16.mxu0 %v3345_v40  ;;  %v3341_v55 = vmax.f32 %v3330_v32, 0.0  ;;  %v3934_v40 = vld [vmem:[%s3539_s25] ss:$0 sm:$0xff] }
0x15cf   : > { %v3333_v48 = vpop.f32.mrf.mxu1  ;;  %3519 = vmatmul.mubr.bf16.vlgmr.msra.gmra.mxu0 %v3344_v17  ;;  %v3935_v10 = vld [vmem:[%s3541_s23] ss:$0 sm:$0xff] }
0x15d0   : > { %v3334_v50 = vadd.f32 %v3333_v48, %v3200_v4  ;;  %v3342_v53 = vmax.f32 %v3332_v18, 0.0 }
0x15d2   : > { %v3343_v47 = vmax.f32 %v3334_v50, 0.0  ;;  %v3346_v61 = vpack.c.bf16 %v3342_v53, %v3340_v59 }
0x15d4   : > { %v3347_v56 = vpack.c.bf16 %v3343_v47, %v3341_v55 }
0x15d6   : > { %3526 = vmatprep.mubr.bf16.mxu1 %v3347_v56 }
0x15d7   : > { %3527 = vmatmul.mubr.bf16.vlgmr.msra.gmra.mxu1 %v3346_v61 }
0x168f   : > { %v4200_v35 = vpop.f32.mrf.mxu0 }
0x1691   : > { %v4201_v7 = vpop.f32.mrf.mxu0 }
0x1692   : > { %v4202_v29 = vadd.f32 %v4201_v7, %v4200_v35 }
0x1693   : > { %v4203_v44 = vpop.f32.mrf.mxu0 }
0x1694   : > { %v3521_v14 = vadd.f32 %v4202_v29, %v3917_v54 }
0x1695   : > { %v4204_v43 = vpop.f32.mrf.mxu0 }
0x1696   : > { %v4205_v2 = vadd.f32 %v4204_v43, %v4203_v44  ;;  %v3535_v52 = vadd.f32 %v3521_v14, %v6452_v26 }
0x1697   : > { %v4206_v25 = vpop.f32.mrf.mxu1 }
0x1698   : > { %v3524_v37 = vadd.f32 %v4205_v2, %v3917_v54  ;;  %3543 = vadd.xlane.f32.xlu1 %v3535_v52 }
0x1699   : > { %v4207_v57 = vpop.f32.mrf.mxu1 }
0x169a   : > { %v4208_v33 = vadd.f32 %v4207_v57, %v4206_v25  ;;  %v3536_v63 = vadd.f32 %v3524_v37, %v6454_v9 }
0x169b   : > { %v4209_v42 = vpop.f32.mrf.mxu1 }
0x169c   : > { %v3529_v62 = vadd.f32 %v4208_v33, %v3917_v54  ;;  %3545 = vadd.xlane.f32.xlu0 %v3536_v63 }
0x169d   : > { %v4210_v23 = vpop.f32.mrf.mxu1 }
0x169e   : > { %v4211_v30 = vadd.f32 %v4210_v23, %v4209_v42  ;;  %v3537_v19 = vadd.f32 %v3529_v62, %v6462_v3 }
0x16a0   : > { %v3532_v38 = vadd.f32 %v4211_v30, %v3917_v54  ;;  %3547 = vadd.xlane.f32.xlu1 %v3537_v19 }
0x16a2   : > { %v3538_v36 = vadd.f32 %v3532_v38, %v6460_v21 }
0x16a4   : > { %3549 = vadd.xlane.f32.xlu0 %v3538_v36 }
0x1721   : > { %v3544_v26 = vpop.xlane.xlu1 %3543 }
0x1722   : > { %v3551_v51 = vmul.f32 0.0078125, %v3544_v26 }
0x1724   : > { %v3555_v12 = vsub.f32 %v3535_v52, %v3551_v51 }
0x1725   : > { %v3546_v16 = vpop.xlane.xlu0 %3545 }
0x1726   : > { %v3552_v45 = vmul.f32 0.0078125, %v3546_v16  ;;  %v3559_v41 = vmul.f32 %v3555_v12, %v3555_v12 }
0x1728   : > { %v3556_v34 = vsub.f32 %v3536_v63, %v3552_v45  ;;  %3563 = vadd.xlane.f32.xlu1 %v3559_v41 }
0x1729   : > { %v3548_v9 = vpop.xlane.xlu1 %3547 }
0x172a   : > { %v3553_v49 = vmul.f32 0.0078125, %v3548_v9  ;;  %v3560_v15 = vmul.f32 %v3556_v34, %v3556_v34 }
0x172c   : > { %v3557_v0 = vsub.f32 %v3537_v19, %v3553_v49  ;;  %3565 = vadd.xlane.f32.xlu0 %v3560_v15 }
0x172d   : > { %v3550_v27 = vpop.xlane.xlu0 %3549 }
0x172e   : > { %v3554_v3 = vmul.f32 0.0078125, %v3550_v27  ;;  %v3561_v4 = vmul.f32 %v3557_v0, %v3557_v0 }
0x1730   : > { %v3558_v20 = vsub.f32 %v3538_v36, %v3554_v3  ;;  %3567 = vadd.xlane.f32.xlu1 %v3561_v4 }
0x1732   : > { %v3562_v21 = vmul.f32 %v3558_v20, %v3558_v20 }
0x1734   : > { %3569 = vadd.xlane.f32.xlu0 %v3562_v21 }
0x17b1   : > { %v3564_v1 = vpop.xlane.xlu1 %3563 }
0x17b2   : > { %v3571_v39 = vmul.f32 0.0078125, %v3564_v1 }
0x17b4   : > { %v3575_v6 = vadd.f32 1e-05, %v3571_v39 }
0x17b5   : > { %v3566_v5 = vpop.xlane.xlu0 %3565 }
0x17b6   : > { %4970 = vrsqrt.f32 %v3575_v6  ;;  %v3572_v24 = vmul.f32 0.0078125, %v3566_v5 }
0x17b8   : > { %v3576_v22 = vadd.f32 1e-05, %v3572_v24 }
0x17b9   : > { %v3568_v8 = vpop.xlane.xlu1 %3567 }
0x17ba   : > { %4972 = vrsqrt.f32 %v3576_v22  ;;  %v3573_v11 = vmul.f32 0.0078125, %v3568_v8 }
0x17bc   : > { %v3577_v60 = vadd.f32 1e-05, %v3573_v11 }
0x17bd   : > { %v3570_v31 = vpop.xlane.xlu0 %3569 }
0x17be   : > { %4974 = vrsqrt.f32 %v3577_v60  ;;  %v3574_v13 = vmul.f32 0.0078125, %v3570_v31 }
0x17c0   : > { %v3578_v46 = vadd.f32 1e-05, %v3574_v13 }
0x17c2   : > { %4976 = vrsqrt.f32 %v3578_v46 }
0x17c3   : > { %v4971_v58 = vpop.eup %4970 }
0x17c4   : > { %v3583_v17 = vmul.f32 %v4971_v58, %v3555_v12 }
0x17c6   : > { %v3593_v32 = vmul.f32 %v3934_v40, %v3583_v17 }
0x17c7   : > { %v4973_v18 = vpop.eup %4972 }
0x17c8   : > { %v3603_v28 = vadd.f32 %v3935_v10, %v3593_v32  ;;  %v3584_v48 = vmul.f32 %v4973_v18, %v3556_v34 }
0x17ca   : > { %3607 = vst [vmem:[#allocation2 + $0x10] sm:$0xff] %v3603_v28  ;;  %v3594_v50 = vmul.f32 %v3934_v40, %v3584_v48 }
0x17cb   : > { %v4975_v53 = vpop.eup %4974 }
0x17cc   : > { %v3604_v55 = vadd.f32 %v3935_v10, %v3594_v50  ;;  %v3585_v47 = vmul.f32 %v4975_v53, %v3557_v0 }
0x17ce   : > { %3608 = vst [vmem:[#allocation2] sm:$0xff] %v3604_v55  ;;  %v3595_v59 = vmul.f32 %v3934_v40, %v3585_v47 }
0x17cf   : > { %v4977_v56 = vpop.eup %4976 }
0x17d0   : > { %v3605_v61 = vadd.f32 %v3935_v10, %v3595_v59  ;;  %v3586_v35 = vmul.f32 %v4977_v56, %v3558_v20 }
0x17d2   : > { %3609 = vst [vmem:[#allocation2 + $0x18] sm:$0xff] %v3605_v61  ;;  %v3596_v54 = vmul.f32 %v3934_v40, %v3586_v35  ;;  %3614 = sbr.rel (%p3936_p2) target bundleno = 6105 (0x17d9), region = 136 }
0x17d4   : > { %v3606_v7 = vadd.f32 %v3935_v10, %v3596_v54 }
0x17d6   : > { %3610 = vst [vmem:[#allocation2 + $0x8] sm:$0xff] %v3606_v7 }
0x17d7   : > { %3615 = vst [vmem:[#allocation18] sm:$0xff] %v3603_v28  ;;  %3616 = vst [vmem:[#allocation18 + $0x8] sm:$0xff] %v3604_v55 }
0x17d8   : > { %3617 = vst [vmem:[#allocation18 + $0x10] sm:$0xff] %v3605_v61  ;;  %3618 = vst [vmem:[#allocation18 + $0x18] sm:$0xff] %v3606_v7 }
0x17d9 PF: > { %s6561_s3 = sld [smem:[#allocation25_spill]]  ;;  %s5281_s24 = smov [#allocation18]  }
0x17da   : > { %s3629_s26 = sshll.u32 %s5281_s24, 4  ;;  %s3630_s26 = int_to_ptr.vmem [resolvable:$true] %s3629_s26 }
0x17db   : > { %s5191_s22 = scalar_lea.vmem %s3630_s26, 512  ;;  %p5198_p4 = scmp.lt.s32.totalorder %s3630_s26, %s3630_s26 }
0x17dc   : > { %p5192_p6 = scmp.ne.s32.totalorder %s3630_s26, %s5191_s22  ;;  %p5199_p7 = scmp.lt.s32.totalorder %s5191_s22, %s5191_s22 }
0x17de   : > { %p5200_p8 = por %p5199_p7, %p5198_p4 }
0x17df   : > { %s6562_s28 = sadd.s32 4294967295, %s6561_s3  }
0x17e0   : > { %p6495_p5 = scmp.eq.s32.totalorder %s6562_s28, 1 }
0x17e2   : > { %p5193_p0 = pnand %p5192_p6, %p6495_p5 }
0x17e4   : > { %p5194_p1 = pneg %p5193_p0 }
0x17e6   : > { %p5201_p9 = pnand %p5200_p8, %p5194_p1 }
0x17e8   : > { %5204 = shalt.err (!%p5201_p9)
}
0x17e9   : > { %s5282_s0 = smov 128   ;;  %s5283_s29 = smov 8  }
0x17ea   : > { %s6564_s9 = sld [smem:[#allocation33_spill]] }
0x17f0   : > { %4717 = dma.vmem_to_hbm [thread:$0]  (%p6495_p5), %s3630_s26, 512, %s6564_s9, [#allocation6], %s5282_s0, %s5282_s0, %s5283_s29  }
0x17f1   : > { %5248 = dma.done.wait (%p6495_p5), [#allocation6], 512  }
0x17f2   : > { %5250 = vsyncadd (%p6495_p5), [#allocation6], 4294966784 }
0x17f3 PF: > { %s6565_s4 = sld [smem:[#allocation25_spill]]  ;;  %s6567_s0 = smov %s5257_s30 }
0x17f4   : > { %s6566_s25 = sld [smem:[#allocation26_spill]] }
0x17f9   : > { %s35_s20 = sadd.s32 1, %s6565_s4  }
0x17fa   : > { %p32_p10 = scmp.ge.s32.totalorder %s35_s20, 4   ;;  %s6568_s30 = smov %s6566_s25 }
0x17fc   :  { %34 = sbr.rel (!%p32_p10) target bundleno = 15 (0xf), region = 184 }
0x1801   :  { %3645 = vsyncpa [#allocation5], 1 }
0x1802   :  { %3647 = vsyncpa [#allocation5 + $0x1], 1 }
0x1803   :  { %3648 = vsyncpa [#allocation8], 1 }
0x1804   :  { %3649 = vsyncpa [#allocation11], 1 }
0x1805   :  { %3650 = vsyncpa [#allocation14], 1 }
0x1806   :  { %3651 = vsyncpa [#allocation17], 1 }
0x1807   :  { %3652 = vsyncpa [#allocation6], 1 }
0x1808   :  { %3654 = vsyncpa [#allocation6 + $0x1], 1 }

</bundles_post_ra>
